<compile_context>
chip_gen: v5e
topology: v5e:2x2
jax: 0.10.0
libtpu: 0.0.40
codegen_flags: <defaults>
</compile_context>

<pallas_src>
import functools
import math

import jax
import jax.numpy as jnp
import numpy as np
from jax.experimental import pallas as pl
from jax.experimental.pallas import tpu as pltpu


# ----------------------------- Pallas kernel ------------------------------ #
def _attn_kernel(xq_ref, xkv_ref,
                 wq_ref, bq_ref, wk_ref, bk_ref, wv_ref, bv_ref,
                 wo_ref, bo_ref, lng_ref, lnb_ref,
                 o_ref,
                 k_scr, v_scr,
                 *, num_heads, scale, kv_layernorm):
    """One (batch b, query-tile qi) grid step of MiT attention.

    xq_ref:  (1, TQ, C)  query tokens for this tile        (compute dtype)
    xkv_ref: (1, Nk, C)  key/value source tokens (per b)   (compute dtype)
    w*_ref:  (C, C)      projection weights, (in, out)     (compute dtype)
    b*_ref / ln*_ref: (1, C) biases / LayerNorm params     (f32)
    o_ref:   (1, TQ, C)  output tokens
    k_scr/v_scr: (Nk, C) VMEM-cached K / V for the current batch element.
    """
    cdt = xq_ref.dtype
    C = wq_ref.shape[1]
    hd = C // num_heads

    # --- K/V for this batch element: computed once (q-tile 0), cached in VMEM.
    @pl.when(pl.program_id(1) == 0)
    def _():
        xkv = xkv_ref[0].astype(jnp.float32)                       # (Nk, C)
        if kv_layernorm:  # sr_ratio > 1 path: LayerNorm over embed dim (eps=1e-5)
            mean = jnp.mean(xkv, axis=-1, keepdims=True)
            cen = xkv - mean
            var = jnp.mean(cen * cen, axis=-1, keepdims=True)
            xkv = cen * jax.lax.rsqrt(var + 1e-5) * lng_ref[...] + lnb_ref[...]
        xkv_c = xkv.astype(cdt)
        k_scr[...] = (jnp.dot(xkv_c, wk_ref[...],
                              preferred_element_type=jnp.float32)
                      + bk_ref[...]).astype(k_scr.dtype)
        v_scr[...] = (jnp.dot(xkv_c, wv_ref[...],
                              preferred_element_type=jnp.float32)
                      + bv_ref[...]).astype(v_scr.dtype)

    # --- Q projection for this tile.
    xq = xq_ref[0]                                                 # (TQ, C)
    q_all = (jnp.dot(xq, wq_ref[...], preferred_element_type=jnp.float32)
             + bq_ref[...]).astype(cdt)                            # (TQ, C)

    k_all = k_scr[...]                                             # (Nk, C)
    v_all = v_scr[...]                                             # (Nk, C)
    wo_all = wo_ref[...]                                           # (C, C)

    # --- Per-head attention; concat-over-heads + proj folded into a sum of
    #     per-head GEMMs (mathematically identical to concat then @ Wo).
    acc = jnp.zeros((q_all.shape[0], C), dtype=jnp.float32)
    for h in range(num_heads):
        lo = h * hd
        q_h = q_all[:, lo:lo + hd]                                 # (TQ, hd)
        k_h = k_all[:, lo:lo + hd]                                 # (Nk, hd)
        v_h = v_all[:, lo:lo + hd]                                 # (Nk, hd)

        s = jax.lax.dot_general(q_h, k_h, (((1,), (1,)), ((), ())),
                                preferred_element_type=jnp.float32) * scale
        s = s - jnp.max(s, axis=-1, keepdims=True)                 # (TQ, Nk)
        p = jnp.exp(s)
        p = p / jnp.sum(p, axis=-1, keepdims=True)                 # softmax (f32)

        ctx = jnp.dot(p.astype(cdt), v_h,
                      preferred_element_type=jnp.float32).astype(cdt)  # (TQ, hd)
        acc = acc + jnp.dot(ctx, wo_all[lo:lo + hd, :],
                            preferred_element_type=jnp.float32)

    o_ref[0] = (acc + bo_ref[...]).astype(o_ref.dtype)


def _pick_q_tile(n):
    for t in (512, 256, 128, 64, 32, 16, 8):
        if n % t == 0:
            return t
    return n  # fall back to the full (untiled) token axis


def _attention_pallas(xq, xkv, wq, bq, wk, bk, wv, bv, wo, bo, ln_g, ln_b,
                      *, num_heads, scale, kv_layernorm):
    B, N, C = xq.shape
    Nk = xkv.shape[1]
    tq = _pick_q_tile(N)
    grid = (B, N // tq)
    const = lambda b, qi: (0, 0)

    kernel = functools.partial(_attn_kernel, num_heads=num_heads, scale=scale,
                               kv_layernorm=kv_layernorm)

    return pl.pallas_call(
        kernel,
        out_shape=jax.ShapeDtypeStruct((B, N, C), xq.dtype),
        grid=grid,
        in_specs=[
            pl.BlockSpec((1, tq, C), lambda b, qi: (b, qi, 0)),   # x (queries)
            pl.BlockSpec((1, Nk, C), lambda b, qi: (b, 0, 0)),    # x_kv
            pl.BlockSpec((C, C), const), pl.BlockSpec((1, C), const),   # Wq, bq
            pl.BlockSpec((C, C), const), pl.BlockSpec((1, C), const),   # Wk, bk
            pl.BlockSpec((C, C), const), pl.BlockSpec((1, C), const),   # Wv, bv
            pl.BlockSpec((C, C), const), pl.BlockSpec((1, C), const),   # Wo, bo
            pl.BlockSpec((1, C), const), pl.BlockSpec((1, C), const),   # ln_w, ln_b
        ],
        out_specs=pl.BlockSpec((1, tq, C), lambda b, qi: (b, qi, 0)),
        scratch_shapes=[
            pltpu.VMEM((Nk, C), xkv.dtype),   # cached K
            pltpu.VMEM((Nk, C), xkv.dtype),   # cached V
        ],
        compiler_params=pltpu.CompilerParams(
            dimension_semantics=("parallel", "arbitrary")),
    )(xq, xkv, wq, bq, wk, bk, wv, bv, wo, bo, ln_g, ln_b)


# ------------------------------- JAX wrapper ------------------------------- #
def mit_attention(x, params, H, W, *, num_heads, sr_ratio=1,
                  compute_dtype=jnp.float32):
    """Forward pass of the MiT Attention module.  x: (B, N, C) with N == H*W."""
    B, N, C = x.shape
    assert N == H * W and C % num_heads == 0
    head_dim = C // num_heads
    scale = head_dim ** -0.5

    if sr_ratio > 1:
        # Spatial-reduction conv (XLA glue); its LayerNorm is fused in-kernel.
        x_ = jnp.transpose(x, (0, 2, 1)).reshape(B, C, H, W)
        x_ = jax.lax.conv_general_dilated(
            x_, params["sr_w"], window_strides=(sr_ratio, sr_ratio),
            padding="VALID", dimension_numbers=("NCHW", "OIHW", "NCHW"))
        x_ = x_ + params["sr_b"][None, :, None, None]
        x_kv = jnp.transpose(x_.reshape(B, C, -1), (0, 2, 1))     # (B, Nk, C)
        ln_w, ln_b = params["ln_w"], params["ln_b"]
        kv_layernorm = True
    else:
        x_kv = x
        ln_w = jnp.ones((C,), jnp.float32)
        ln_b = jnp.zeros((C,), jnp.float32)
        kv_layernorm = False

    cdt = compute_dtype
    f32 = jnp.float32
    return _attention_pallas(
        x.astype(cdt), x_kv.astype(cdt),
        params["wq"].astype(cdt), params["bq"].reshape(1, C).astype(f32),
        params["wk"].astype(cdt), params["bk"].reshape(1, C).astype(f32),
        params["wv"].astype(cdt), params["bv"].reshape(1, C).astype(f32),
        params["wo"].astype(cdt), params["bo"].reshape(1, C).astype(f32),
        ln_w.reshape(1, C).astype(f32), ln_b.reshape(1, C).astype(f32),
        num_heads=num_heads, scale=scale, kv_layernorm=kv_layernorm)


# ---------------------------- Reference (JAX) ------------------------------ #
def mit_attention_ref(x, params, H, W, *, num_heads, sr_ratio=1):
    B, N, C = x.shape
    hd = C // num_heads
    scale = hd ** -0.5

    q = x @ params["wq"] + params["bq"]
    q = q.reshape(B, N, num_heads, hd).transpose(0, 2, 1, 3)       # (B,h,N,hd)

    if sr_ratio > 1:
        x_ = jnp.transpose(x, (0, 2, 1)).reshape(B, C, H, W)
        x_ = jax.lax.conv_general_dilated(
            x_, params["sr_w"], window_strides=(sr_ratio, sr_ratio),
            padding="VALID", dimension_numbers=("NCHW", "OIHW", "NCHW"))
        x_ = x_ + params["sr_b"][None, :, None, None]
        x_ = jnp.transpose(x_.reshape(B, C, -1), (0, 2, 1))
        mean = jnp.mean(x_, axis=-1, keepdims=True)
        var = jnp.mean((x_ - mean) ** 2, axis=-1, keepdims=True)
        x_kv = (x_ - mean) / jnp.sqrt(var + 1e-5) * params["ln_w"] + params["ln_b"]
    else:
        x_kv = x

    Nk = x_kv.shape[1]
    k = (x_kv @ params["wk"] + params["bk"]).reshape(B, Nk, num_heads, hd)
    v = (x_kv @ params["wv"] + params["bv"]).reshape(B, Nk, num_heads, hd)
    k = k.transpose(0, 2, 1, 3)
    v = v.transpose(0, 2, 1, 3)

    attn = jnp.einsum("bhqd,bhkd->bhqk", q, k) * scale
    attn = jax.nn.softmax(attn, axis=-1)
    out = jnp.einsum("bhqk,bhkd->bhqd", attn, v)
    out = out.transpose(0, 2, 1, 3).reshape(B, N, C)
    return out @ params["wo"] + params["bo"]


# --------------------------------- Main ------------------------------------ #
if __name__ == "__main__":
    # Small shapes consistent with the module: dim divisible by num_heads, N = H*W.
    B, C, H, W = 2, 64, 8, 8
    num_heads = 8
    N = H * W

    key = jax.random.PRNGKey(0)
    keys = jax.random.split(key, 6)

    x = jax.random.normal(keys[0], (B, N, C), dtype=jnp.float32)

    def trunc_normal(k, shape, std=0.02):
        return std * jax.random.truncated_normal(k, -2.0, 2.0, shape, jnp.float32)

    # Module init: Linear weights trunc_normal(std=0.02), biases 0 (qkv_bias=False).
    params = dict(
        wq=trunc_normal(keys[1], (C, C)), bq=jnp.zeros((C,), jnp.float32),
        wk=trunc_normal(keys[2], (C, C)), bk=jnp.zeros((C,), jnp.float32),
        wv=trunc_normal(keys[3], (C, C)), bv=jnp.zeros((C,), jnp.float32),
        wo=trunc_normal(keys[4], (C, C)), bo=jnp.zeros((C,), jnp.float32),
    )

    # --- sr_ratio = 1, f32 end-to-end (tight correctness check) ---
    out_f32 = mit_attention(x, params, H, W, num_heads=num_heads, sr_ratio=1,
                            compute_dtype=jnp.float32)
    out_f32 = jax.block_until_ready(out_f32)
    ref1 = mit_attention_ref(x, params, H, W, num_heads=num_heads, sr_ratio=1)
    np.testing.assert_allclose(np.asarray(out_f32), np.asarray(ref1),
                               rtol=1e-4, atol=1e-5)

    # --- sr_ratio = 1, bf16 MXU/HBM streaming (f32 accumulation; loose check) ---
    out_bf16 = mit_attention(x, params, H, W, num_heads=num_heads, sr_ratio=1,
                             compute_dtype=jnp.bfloat16)
    out_bf16 = jax.block_until_ready(out_bf16)
    np.testing.assert_allclose(np.asarray(out_bf16.astype(jnp.float32)),
                               np.asarray(ref1), rtol=5e-2, atol=5e-4)

    # --- sr_ratio = 2 path (strided conv KV reduction + fused LayerNorm), f32 ---
    sr = 2
    fan_out = sr * sr * C
    params_sr = dict(
        params,
        sr_w=jax.random.normal(keys[5], (C, C, sr, sr), dtype=jnp.float32)
        * math.sqrt(2.0 / fan_out),
        sr_b=jnp.zeros((C,), jnp.float32),
        ln_w=jnp.ones((C,), jnp.float32),
        ln_b=jnp.zeros((C,), jnp.float32),
    )
    out_sr = mit_attention(x, params_sr, H, W, num_heads=num_heads, sr_ratio=sr,
                           compute_dtype=jnp.float32)
    out_sr = jax.block_until_ready(out_sr)
    ref_sr = mit_attention_ref(x, params_sr, H, W, num_heads=num_heads, sr_ratio=sr)
    np.testing.assert_allclose(np.asarray(out_sr), np.asarray(ref_sr),
                               rtol=1e-4, atol=1e-5)

    print("KERNEL_OK")
</pallas_src>

<mosaic_0001>
module attributes {stable_mosaic.version = 11 : i64} {
  func.func @_attn_kernel(%arg0: i32, %arg1: i32, %arg2: memref<1x64x64xf32, #tpu.memory_space<vmem>>, %arg3: memref<1x64x64xf32, #tpu.memory_space<vmem>>, %arg4: memref<64x64xf32, #tpu.memory_space<vmem>>, %arg5: memref<1x64xf32, #tpu.memory_space<vmem>>, %arg6: memref<64x64xf32, #tpu.memory_space<vmem>>, %arg7: memref<1x64xf32, #tpu.memory_space<vmem>>, %arg8: memref<64x64xf32, #tpu.memory_space<vmem>>, %arg9: memref<1x64xf32, #tpu.memory_space<vmem>>, %arg10: memref<64x64xf32, #tpu.memory_space<vmem>>, %arg11: memref<1x64xf32, #tpu.memory_space<vmem>>, %arg12: memref<1x64xf32, #tpu.memory_space<vmem>>, %arg13: memref<1x64xf32, #tpu.memory_space<vmem>>, %arg14: memref<1x64x64xf32, #tpu.memory_space<vmem>>, %arg15: memref<64x64xf32, #tpu.memory_space<vmem>>, %arg16: memref<64x64xf32, #tpu.memory_space<vmem>>) attributes {dimension_semantics = [#tpu.dimension_semantics<parallel>, #tpu.dimension_semantics<arbitrary>], iteration_bounds = array<i64: 2, 1>, scalar_prefetch = 0 : i64, scratch_operands = 2 : i64, tpu.core_type = #tpu.core_type<tc>, window_params = [{transform_indices = @transform_0, window_bounds = array<i64: 1, 64, 64>}, {transform_indices = @transform_1, window_bounds = array<i64: 1, 64, 64>}, {pipeline_mode = #tpu.pipeline_mode<synchronous>, transform_indices = @transform_2, window_bounds = array<i64: 64, 64>}, {pipeline_mode = #tpu.pipeline_mode<synchronous>, transform_indices = @transform_3, window_bounds = array<i64: 1, 64>}, {pipeline_mode = #tpu.pipeline_mode<synchronous>, transform_indices = @transform_4, window_bounds = array<i64: 64, 64>}, {pipeline_mode = #tpu.pipeline_mode<synchronous>, transform_indices = @transform_5, window_bounds = array<i64: 1, 64>}, {pipeline_mode = #tpu.pipeline_mode<synchronous>, transform_indices = @transform_6, window_bounds = array<i64: 64, 64>}, {pipeline_mode = #tpu.pipeline_mode<synchronous>, transform_indices = @transform_7, window_bounds = array<i64: 1, 64>}, {pipeline_mode = #tpu.pipeline_mode<synchronous>, transform_indices = @transform_8, window_bounds = array<i64: 64, 64>}, {pipeline_mode = #tpu.pipeline_mode<synchronous>, transform_indices = @transform_9, window_bounds = array<i64: 1, 64>}, {pipeline_mode = #tpu.pipeline_mode<synchronous>, transform_indices = @transform_10, window_bounds = array<i64: 1, 64>}, {pipeline_mode = #tpu.pipeline_mode<synchronous>, transform_indices = @transform_11, window_bounds = array<i64: 1, 64>}, {transform_indices = @transform_12, window_bounds = array<i64: 1, 64, 64>}]} {
    %c0_i32 = arith.constant 0 : i32
    %0 = arith.cmpi eq, %arg1, %c0_i32 : i32
    %1 = arith.extui %0 : i1 to i32
    %c0_i32_0 = arith.constant 0 : i32
    %2 = arith.cmpi ne, %1, %c0_i32_0 : i32
    scf.if %2 {
      %c0_67 = arith.constant 0 : index
      %c0_68 = arith.constant 0 : index
      %c0_69 = arith.constant 0 : index
      %172 = vector.load %arg3[%c0_67, %c0_68, %c0_69] : memref<1x64x64xf32, #tpu.memory_space<vmem>>, vector<1x64x64xf32>
      %173 = vector.shape_cast %172 : vector<1x64x64xf32> to vector<64x64xf32>
      %c0_70 = arith.constant 0 : index
      %c0_71 = arith.constant 0 : index
      %174 = vector.load %arg6[%c0_70, %c0_71] : memref<64x64xf32, #tpu.memory_space<vmem>>, vector<64x64xf32>
      %cst_72 = arith.constant dense<0.000000e+00> : vector<64x64xf32>
      %175 = tpu.matmul %173, %174, %cst_72 {dimension_numbers = #tpu.dot_dimension_numbers<[1], [0], [0], [1], [0, 0, 1, 1], [], []>} : vector<64x64xf32>, vector<64x64xf32>, vector<64x64xf32> -> vector<64x64xf32>
      %c0_73 = arith.constant 0 : index
      %c0_74 = arith.constant 0 : index
      %176 = vector.load %arg7[%c0_73, %c0_74] : memref<1x64xf32, #tpu.memory_space<vmem>>, vector<1x64xf32>
      %177 = vector.broadcast %176 : vector<1x64xf32> to vector<64x64xf32>
      %178 = arith.addf %175, %177 : vector<64x64xf32>
      %c0_75 = arith.constant 0 : index
      %c0_76 = arith.constant 0 : index
      %179 = vector.load %arg15[%c0_75, %c0_76] : memref<64x64xf32, #tpu.memory_space<vmem>>, vector<64x64xf32>
      tpu.vector_store %arg15[%c0_75, %c0_76], %178 {strides = array<i32>} : memref<64x64xf32, #tpu.memory_space<vmem>>, vector<64x64xf32>,
      %c0_77 = arith.constant 0 : index
      %c0_78 = arith.constant 0 : index
      %180 = vector.load %arg8[%c0_77, %c0_78] : memref<64x64xf32, #tpu.memory_space<vmem>>, vector<64x64xf32>
      %cst_79 = arith.constant dense<0.000000e+00> : vector<64x64xf32>
      %181 = tpu.matmul %173, %180, %cst_79 {dimension_numbers = #tpu.dot_dimension_numbers<[1], [0], [0], [1], [0, 0, 1, 1], [], []>} : vector<64x64xf32>, vector<64x64xf32>, vector<64x64xf32> -> vector<64x64xf32>
      %c0_80 = arith.constant 0 : index
      %c0_81 = arith.constant 0 : index
      %182 = vector.load %arg9[%c0_80, %c0_81] : memref<1x64xf32, #tpu.memory_space<vmem>>, vector<1x64xf32>
      %183 = vector.broadcast %182 : vector<1x64xf32> to vector<64x64xf32>
      %184 = arith.addf %181, %183 : vector<64x64xf32>
      %c0_82 = arith.constant 0 : index
      %c0_83 = arith.constant 0 : index
      %185 = vector.load %arg16[%c0_82, %c0_83] : memref<64x64xf32, #tpu.memory_space<vmem>>, vector<64x64xf32>
      tpu.vector_store %arg16[%c0_82, %c0_83], %184 {strides = array<i32>} : memref<64x64xf32, #tpu.memory_space<vmem>>, vector<64x64xf32>,
    } else {
    }
    %c0 = arith.constant 0 : index
    %c0_1 = arith.constant 0 : index
    %c0_2 = arith.constant 0 : index
    %3 = vector.load %arg2[%c0, %c0_1, %c0_2] : memref<1x64x64xf32, #tpu.memory_space<vmem>>, vector<1x64x64xf32>
    %4 = vector.shape_cast %3 : vector<1x64x64xf32> to vector<64x64xf32>
    %c0_3 = arith.constant 0 : index
    %c0_4 = arith.constant 0 : index
    %5 = vector.load %arg4[%c0_3, %c0_4] : memref<64x64xf32, #tpu.memory_space<vmem>>, vector<64x64xf32>
    %cst = arith.constant dense<0.000000e+00> : vector<64x64xf32>
    %6 = tpu.matmul %4, %5, %cst {dimension_numbers = #tpu.dot_dimension_numbers<[1], [0], [0], [1], [0, 0, 1, 1], [], []>} : vector<64x64xf32>, vector<64x64xf32>, vector<64x64xf32> -> vector<64x64xf32>
    %c0_5 = arith.constant 0 : index
    %c0_6 = arith.constant 0 : index
    %7 = vector.load %arg5[%c0_5, %c0_6] : memref<1x64xf32, #tpu.memory_space<vmem>>, vector<1x64xf32>
    %8 = vector.broadcast %7 : vector<1x64xf32> to vector<64x64xf32>
    %9 = arith.addf %6, %8 : vector<64x64xf32>
    %c0_7 = arith.constant 0 : index
    %c0_8 = arith.constant 0 : index
    %10 = vector.load %arg15[%c0_7, %c0_8] : memref<64x64xf32, #tpu.memory_space<vmem>>, vector<64x64xf32>
    %c0_9 = arith.constant 0 : index
    %c0_10 = arith.constant 0 : index
    %11 = vector.load %arg16[%c0_9, %c0_10] : memref<64x64xf32, #tpu.memory_space<vmem>>, vector<64x64xf32>
    %c0_11 = arith.constant 0 : index
    %c0_12 = arith.constant 0 : index
    %12 = vector.load %arg10[%c0_11, %c0_12] : memref<64x64xf32, #tpu.memory_space<vmem>>, vector<64x64xf32>
    %cst_13 = arith.constant 0.000000e+00 : f32
    %13 = vector.broadcast %cst_13 : f32 to vector<64x64xf32>
    %14 = vector.extract_strided_slice %9 {offsets = [0, 0], sizes = [64, 8], strides = [1, 1]} : vector<64x64xf32> to vector<64x8xf32>
    %15 = vector.extract_strided_slice %10 {offsets = [0, 0], sizes = [64, 8], strides = [1, 1]} : vector<64x64xf32> to vector<64x8xf32>
    %16 = vector.extract_strided_slice %11 {offsets = [0, 0], sizes = [64, 8], strides = [1, 1]} : vector<64x64xf32> to vector<64x8xf32>
    %cst_14 = arith.constant dense<0.000000e+00> : vector<64x64xf32>
    %17 = tpu.matmul %14, %15, %cst_14 {dimension_numbers = #tpu.dot_dimension_numbers<[1], [1], [0], [0], [0, 0, 1, 0], [], []>} : vector<64x8xf32>, vector<64x8xf32>, vector<64x64xf32> -> vector<64x64xf32>
    %cst_15 = arith.constant 0.353553385 : f32
    %18 = vector.broadcast %cst_15 : f32 to vector<64x64xf32>
    %19 = arith.mulf %17, %18 : vector<64x64xf32>
    %cst_16 = arith.constant dense<0xFF800000> : vector<64xf32>
    %20 = vector.multi_reduction <maximumf>, %19, %cst_16 [1] : vector<64x64xf32> to vector<64xf32>
    %21 = vector.shape_cast %20 : vector<64xf32> to vector<64x1xf32>
    %22 = vector.broadcast %21 : vector<64x1xf32> to vector<64x64xf32>
    %23 = arith.subf %19, %22 : vector<64x64xf32>
    %24 = math.exp %23 : vector<64x64xf32>
    %cst_17 = arith.constant dense<0.000000e+00> : vector<64xf32>
    %25 = vector.multi_reduction <add>, %24, %cst_17 [1] : vector<64x64xf32> to vector<64xf32>
    %26 = vector.shape_cast %25 : vector<64xf32> to vector<64x1xf32>
    %27 = vector.broadcast %26 : vector<64x1xf32> to vector<64x64xf32>
    %28 = arith.divf %24, %27 : vector<64x64xf32>
    %cst_18 = arith.constant dense<0.000000e+00> : vector<64x8xf32>
    %29 = tpu.matmul %28, %16, %cst_18 {dimension_numbers = #tpu.dot_dimension_numbers<[1], [0], [0], [1], [0, 0, 1, 1], [], []>} : vector<64x64xf32>, vector<64x8xf32>, vector<64x8xf32> -> vector<64x8xf32>
    %30 = vector.extract_strided_slice %12 {offsets = [0, 0], sizes = [8, 64], strides = [1, 1]} : vector<64x64xf32> to vector<8x64xf32>
    %cst_19 = arith.constant dense<0.000000e+00> : vector<64x64xf32>
    %31 = tpu.matmul %29, %30, %cst_19 {dimension_numbers = #tpu.dot_dimension_numbers<[1], [0], [0], [1], [0, 0, 1, 1], [], []>} : vector<64x8xf32>, vector<8x64xf32>, vector<64x64xf32> -> vector<64x64xf32>
    %32 = arith.addf %13, %31 : vector<64x64xf32>
    %33 = vector.extract_strided_slice %9 {offsets = [0, 8], sizes = [64, 8], strides = [1, 1]} : vector<64x64xf32> to vector<64x8xf32>
    %34 = vector.extract_strided_slice %10 {offsets = [0, 8], sizes = [64, 8], strides = [1, 1]} : vector<64x64xf32> to vector<64x8xf32>
    %35 = vector.extract_strided_slice %11 {offsets = [0, 8], sizes = [64, 8], strides = [1, 1]} : vector<64x64xf32> to vector<64x8xf32>
    %cst_20 = arith.constant dense<0.000000e+00> : vector<64x64xf32>
    %36 = tpu.matmul %33, %34, %cst_20 {dimension_numbers = #tpu.dot_dimension_numbers<[1], [1], [0], [0], [0, 0, 1, 0], [], []>} : vector<64x8xf32>, vector<64x8xf32>, vector<64x64xf32> -> vector<64x64xf32>
    %cst_21 = arith.constant 0.353553385 : f32
    %37 = vector.broadcast %cst_21 : f32 to vector<64x64xf32>
    %38 = arith.mulf %36, %37 : vector<64x64xf32>
    %cst_22 = arith.constant dense<0xFF800000> : vector<64xf32>
    %39 = vector.multi_reduction <maximumf>, %38, %cst_22 [1] : vector<64x64xf32> to vector<64xf32>
    %40 = vector.shape_cast %39 : vector<64xf32> to vector<64x1xf32>
    %41 = vector.broadcast %40 : vector<64x1xf32> to vector<64x64xf32>
    %42 = arith.subf %38, %41 : vector<64x64xf32>
    %43 = math.exp %42 : vector<64x64xf32>
    %cst_23 = arith.constant dense<0.000000e+00> : vector<64xf32>
    %44 = vector.multi_reduction <add>, %43, %cst_23 [1] : vector<64x64xf32> to vector<64xf32>
    %45 = vector.shape_cast %44 : vector<64xf32> to vector<64x1xf32>
    %46 = vector.broadcast %45 : vector<64x1xf32> to vector<64x64xf32>
    %47 = arith.divf %43, %46 : vector<64x64xf32>
    %cst_24 = arith.constant dense<0.000000e+00> : vector<64x8xf32>
    %48 = tpu.matmul %47, %35, %cst_24 {dimension_numbers = #tpu.dot_dimension_numbers<[1], [0], [0], [1], [0, 0, 1, 1], [], []>} : vector<64x64xf32>, vector<64x8xf32>, vector<64x8xf32> -> vector<64x8xf32>
    %49 = vector.extract_strided_slice %12 {offsets = [8, 0], sizes = [8, 64], strides = [1, 1]} : vector<64x64xf32> to vector<8x64xf32>
    %cst_25 = arith.constant dense<0.000000e+00> : vector<64x64xf32>
    %50 = tpu.matmul %48, %49, %cst_25 {dimension_numbers = #tpu.dot_dimension_numbers<[1], [0], [0], [1], [0, 0, 1, 1], [], []>} : vector<64x8xf32>, vector<8x64xf32>, vector<64x64xf32> -> vector<64x64xf32>
    %51 = arith.addf %32, %50 : vector<64x64xf32>
    %52 = vector.extract_strided_slice %9 {offsets = [0, 16], sizes = [64, 8], strides = [1, 1]} : vector<64x64xf32> to vector<64x8xf32>
    %53 = vector.extract_strided_slice %10 {offsets = [0, 16], sizes = [64, 8], strides = [1, 1]} : vector<64x64xf32> to vector<64x8xf32>
    %54 = vector.extract_strided_slice %11 {offsets = [0, 16], sizes = [64, 8], strides = [1, 1]} : vector<64x64xf32> to vector<64x8xf32>
    %cst_26 = arith.constant dense<0.000000e+00> : vector<64x64xf32>
    %55 = tpu.matmul %52, %53, %cst_26 {dimension_numbers = #tpu.dot_dimension_numbers<[1], [1], [0], [0], [0, 0, 1, 0], [], []>} : vector<64x8xf32>, vector<64x8xf32>, vector<64x64xf32> -> vector<64x64xf32>
    %cst_27 = arith.constant 0.353553385 : f32
    %56 = vector.broadcast %cst_27 : f32 to vector<64x64xf32>
    %57 = arith.mulf %55, %56 : vector<64x64xf32>
    %cst_28 = arith.constant dense<0xFF800000> : vector<64xf32>
    %58 = vector.multi_reduction <maximumf>, %57, %cst_28 [1] : vector<64x64xf32> to vector<64xf32>
    %59 = vector.shape_cast %58 : vector<64xf32> to vector<64x1xf32>
    %60 = vector.broadcast %59 : vector<64x1xf32> to vector<64x64xf32>
    %61 = arith.subf %57, %60 : vector<64x64xf32>
    %62 = math.exp %61 : vector<64x64xf32>
    %cst_29 = arith.constant dense<0.000000e+00> : vector<64xf32>
    %63 = vector.multi_reduction <add>, %62, %cst_29 [1] : vector<64x64xf32> to vector<64xf32>
    %64 = vector.shape_cast %63 : vector<64xf32> to vector<64x1xf32>
    %65 = vector.broadcast %64 : vector<64x1xf32> to vector<64x64xf32>
    %66 = arith.divf %62, %65 : vector<64x64xf32>
    %cst_30 = arith.constant dense<0.000000e+00> : vector<64x8xf32>
    %67 = tpu.matmul %66, %54, %cst_30 {dimension_numbers = #tpu.dot_dimension_numbers<[1], [0], [0], [1], [0, 0, 1, 1], [], []>} : vector<64x64xf32>, vector<64x8xf32>, vector<64x8xf32> -> vector<64x8xf32>
    %68 = vector.extract_strided_slice %12 {offsets = [16, 0], sizes = [8, 64], strides = [1, 1]} : vector<64x64xf32> to vector<8x64xf32>
    %cst_31 = arith.constant dense<0.000000e+00> : vector<64x64xf32>
    %69 = tpu.matmul %67, %68, %cst_31 {dimension_numbers = #tpu.dot_dimension_numbers<[1], [0], [0], [1], [0, 0, 1, 1], [], []>} : vector<64x8xf32>, vector<8x64xf32>, vector<64x64xf32> -> vector<64x64xf32>
    %70 = arith.addf %51, %69 : vector<64x64xf32>
    %71 = vector.extract_strided_slice %9 {offsets = [0, 24], sizes = [64, 8], strides = [1, 1]} : vector<64x64xf32> to vector<64x8xf32>
    %72 = vector.extract_strided_slice %10 {offsets = [0, 24], sizes = [64, 8], strides = [1, 1]} : vector<64x64xf32> to vector<64x8xf32>
    %73 = vector.extract_strided_slice %11 {offsets = [0, 24], sizes = [64, 8], strides = [1, 1]} : vector<64x64xf32> to vector<64x8xf32>
    %cst_32 = arith.constant dense<0.000000e+00> : vector<64x64xf32>
    %74 = tpu.matmul %71, %72, %cst_32 {dimension_numbers = #tpu.dot_dimension_numbers<[1], [1], [0], [0], [0, 0, 1, 0], [], []>} : vector<64x8xf32>, vector<64x8xf32>, vector<64x64xf32> -> vector<64x64xf32>
    %cst_33 = arith.constant 0.353553385 : f32
    %75 = vector.broadcast %cst_33 : f32 to vector<64x64xf32>
    %76 = arith.mulf %74, %75 : vector<64x64xf32>
    %cst_34 = arith.constant dense<0xFF800000> : vector<64xf32>
    %77 = vector.multi_reduction <maximumf>, %76, %cst_34 [1] : vector<64x64xf32> to vector<64xf32>
    %78 = vector.shape_cast %77 : vector<64xf32> to vector<64x1xf32>
    %79 = vector.broadcast %78 : vector<64x1xf32> to vector<64x64xf32>
    %80 = arith.subf %76, %79 : vector<64x64xf32>
    %81 = math.exp %80 : vector<64x64xf32>
    %cst_35 = arith.constant dense<0.000000e+00> : vector<64xf32>
    %82 = vector.multi_reduction <add>, %81, %cst_35 [1] : vector<64x64xf32> to vector<64xf32>
    %83 = vector.shape_cast %82 : vector<64xf32> to vector<64x1xf32>
    %84 = vector.broadcast %83 : vector<64x1xf32> to vector<64x64xf32>
    %85 = arith.divf %81, %84 : vector<64x64xf32>
    %cst_36 = arith.constant dense<0.000000e+00> : vector<64x8xf32>
    %86 = tpu.matmul %85, %73, %cst_36 {dimension_numbers = #tpu.dot_dimension_numbers<[1], [0], [0], [1], [0, 0, 1, 1], [], []>} : vector<64x64xf32>, vector<64x8xf32>, vector<64x8xf32> -> vector<64x8xf32>
    %87 = vector.extract_strided_slice %12 {offsets = [24, 0], sizes = [8, 64], strides = [1, 1]} : vector<64x64xf32> to vector<8x64xf32>
    %cst_37 = arith.constant dense<0.000000e+00> : vector<64x64xf32>
    %88 = tpu.matmul %86, %87, %cst_37 {dimension_numbers = #tpu.dot_dimension_numbers<[1], [0], [0], [1], [0, 0, 1, 1], [], []>} : vector<64x8xf32>, vector<8x64xf32>, vector<64x64xf32> -> vector<64x64xf32>
    %89 = arith.addf %70, %88 : vector<64x64xf32>
    %90 = vector.extract_strided_slice %9 {offsets = [0, 32], sizes = [64, 8], strides = [1, 1]} : vector<64x64xf32> to vector<64x8xf32>
    %91 = vector.extract_strided_slice %10 {offsets = [0, 32], sizes = [64, 8], strides = [1, 1]} : vector<64x64xf32> to vector<64x8xf32>
    %92 = vector.extract_strided_slice %11 {offsets = [0, 32], sizes = [64, 8], strides = [1, 1]} : vector<64x64xf32> to vector<64x8xf32>
    %cst_38 = arith.constant dense<0.000000e+00> : vector<64x64xf32>
    %93 = tpu.matmul %90, %91, %cst_38 {dimension_numbers = #tpu.dot_dimension_numbers<[1], [1], [0], [0], [0, 0, 1, 0], [], []>} : vector<64x8xf32>, vector<64x8xf32>, vector<64x64xf32> -> vector<64x64xf32>
    %cst_39 = arith.constant 0.353553385 : f32
    %94 = vector.broadcast %cst_39 : f32 to vector<64x64xf32>
    %95 = arith.mulf %93, %94 : vector<64x64xf32>
    %cst_40 = arith.constant dense<0xFF800000> : vector<64xf32>
    %96 = vector.multi_reduction <maximumf>, %95, %cst_40 [1] : vector<64x64xf32> to vector<64xf32>
    %97 = vector.shape_cast %96 : vector<64xf32> to vector<64x1xf32>
    %98 = vector.broadcast %97 : vector<64x1xf32> to vector<64x64xf32>
    %99 = arith.subf %95, %98 : vector<64x64xf32>
    %100 = math.exp %99 : vector<64x64xf32>
    %cst_41 = arith.constant dense<0.000000e+00> : vector<64xf32>
    %101 = vector.multi_reduction <add>, %100, %cst_41 [1] : vector<64x64xf32> to vector<64xf32>
    %102 = vector.shape_cast %101 : vector<64xf32> to vector<64x1xf32>
    %103 = vector.broadcast %102 : vector<64x1xf32> to vector<64x64xf32>
    %104 = arith.divf %100, %103 : vector<64x64xf32>
    %cst_42 = arith.constant dense<0.000000e+00> : vector<64x8xf32>
    %105 = tpu.matmul %104, %92, %cst_42 {dimension_numbers = #tpu.dot_dimension_numbers<[1], [0], [0], [1], [0, 0, 1, 1], [], []>} : vector<64x64xf32>, vector<64x8xf32>, vector<64x8xf32> -> vector<64x8xf32>
    %106 = vector.extract_strided_slice %12 {offsets = [32, 0], sizes = [8, 64], strides = [1, 1]} : vector<64x64xf32> to vector<8x64xf32>
    %cst_43 = arith.constant dense<0.000000e+00> : vector<64x64xf32>
    %107 = tpu.matmul %105, %106, %cst_43 {dimension_numbers = #tpu.dot_dimension_numbers<[1], [0], [0], [1], [0, 0, 1, 1], [], []>} : vector<64x8xf32>, vector<8x64xf32>, vector<64x64xf32> -> vector<64x64xf32>
    %108 = arith.addf %89, %107 : vector<64x64xf32>
    %109 = vector.extract_strided_slice %9 {offsets = [0, 40], sizes = [64, 8], strides = [1, 1]} : vector<64x64xf32> to vector<64x8xf32>
    %110 = vector.extract_strided_slice %10 {offsets = [0, 40], sizes = [64, 8], strides = [1, 1]} : vector<64x64xf32> to vector<64x8xf32>
    %111 = vector.extract_strided_slice %11 {offsets = [0, 40], sizes = [64, 8], strides = [1, 1]} : vector<64x64xf32> to vector<64x8xf32>
    %cst_44 = arith.constant dense<0.000000e+00> : vector<64x64xf32>
    %112 = tpu.matmul %109, %110, %cst_44 {dimension_numbers = #tpu.dot_dimension_numbers<[1], [1], [0], [0], [0, 0, 1, 0], [], []>} : vector<64x8xf32>, vector<64x8xf32>, vector<64x64xf32> -> vector<64x64xf32>
    %cst_45 = arith.constant 0.353553385 : f32
    %113 = vector.broadcast %cst_45 : f32 to vector<64x64xf32>
    %114 = arith.mulf %112, %113 : vector<64x64xf32>
    %cst_46 = arith.constant dense<0xFF800000> : vector<64xf32>
    %115 = vector.multi_reduction <maximumf>, %114, %cst_46 [1] : vector<64x64xf32> to vector<64xf32>
    %116 = vector.shape_cast %115 : vector<64xf32> to vector<64x1xf32>
    %117 = vector.broadcast %116 : vector<64x1xf32> to vector<64x64xf32>
    %118 = arith.subf %114, %117 : vector<64x64xf32>
    %119 = math.exp %118 : vector<64x64xf32>
    %cst_47 = arith.constant dense<0.000000e+00> : vector<64xf32>
    %120 = vector.multi_reduction <add>, %119, %cst_47 [1] : vector<64x64xf32> to vector<64xf32>
    %121 = vector.shape_cast %120 : vector<64xf32> to vector<64x1xf32>
    %122 = vector.broadcast %121 : vector<64x1xf32> to vector<64x64xf32>
    %123 = arith.divf %119, %122 : vector<64x64xf32>
    %cst_48 = arith.constant dense<0.000000e+00> : vector<64x8xf32>
    %124 = tpu.matmul %123, %111, %cst_48 {dimension_numbers = #tpu.dot_dimension_numbers<[1], [0], [0], [1], [0, 0, 1, 1], [], []>} : vector<64x64xf32>, vector<64x8xf32>, vector<64x8xf32> -> vector<64x8xf32>
    %125 = vector.extract_strided_slice %12 {offsets = [40, 0], sizes = [8, 64], strides = [1, 1]} : vector<64x64xf32> to vector<8x64xf32>
    %cst_49 = arith.constant dense<0.000000e+00> : vector<64x64xf32>
    %126 = tpu.matmul %124, %125, %cst_49 {dimension_numbers = #tpu.dot_dimension_numbers<[1], [0], [0], [1], [0, 0, 1, 1], [], []>} : vector<64x8xf32>, vector<8x64xf32>, vector<64x64xf32> -> vector<64x64xf32>
    %127 = arith.addf %108, %126 : vector<64x64xf32>
    %128 = vector.extract_strided_slice %9 {offsets = [0, 48], sizes = [64, 8], strides = [1, 1]} : vector<64x64xf32> to vector<64x8xf32>
    %129 = vector.extract_strided_slice %10 {offsets = [0, 48], sizes = [64, 8], strides = [1, 1]} : vector<64x64xf32> to vector<64x8xf32>
    %130 = vector.extract_strided_slice %11 {offsets = [0, 48], sizes = [64, 8], strides = [1, 1]} : vector<64x64xf32> to vector<64x8xf32>
    %cst_50 = arith.constant dense<0.000000e+00> : vector<64x64xf32>
    %131 = tpu.matmul %128, %129, %cst_50 {dimension_numbers = #tpu.dot_dimension_numbers<[1], [1], [0], [0], [0, 0, 1, 0], [], []>} : vector<64x8xf32>, vector<64x8xf32>, vector<64x64xf32> -> vector<64x64xf32>
    %cst_51 = arith.constant 0.353553385 : f32
    %132 = vector.broadcast %cst_51 : f32 to vector<64x64xf32>
    %133 = arith.mulf %131, %132 : vector<64x64xf32>
    %cst_52 = arith.constant dense<0xFF800000> : vector<64xf32>
    %134 = vector.multi_reduction <maximumf>, %133, %cst_52 [1] : vector<64x64xf32> to vector<64xf32>
    %135 = vector.shape_cast %134 : vector<64xf32> to vector<64x1xf32>
    %136 = vector.broadcast %135 : vector<64x1xf32> to vector<64x64xf32>
    %137 = arith.subf %133, %136 : vector<64x64xf32>
    %138 = math.exp %137 : vector<64x64xf32>
    %cst_53 = arith.constant dense<0.000000e+00> : vector<64xf32>
    %139 = vector.multi_reduction <add>, %138, %cst_53 [1] : vector<64x64xf32> to vector<64xf32>
    %140 = vector.shape_cast %139 : vector<64xf32> to vector<64x1xf32>
    %141 = vector.broadcast %140 : vector<64x1xf32> to vector<64x64xf32>
    %142 = arith.divf %138, %141 : vector<64x64xf32>
    %cst_54 = arith.constant dense<0.000000e+00> : vector<64x8xf32>
    %143 = tpu.matmul %142, %130, %cst_54 {dimension_numbers = #tpu.dot_dimension_numbers<[1], [0], [0], [1], [0, 0, 1, 1], [], []>} : vector<64x64xf32>, vector<64x8xf32>, vector<64x8xf32> -> vector<64x8xf32>
    %144 = vector.extract_strided_slice %12 {offsets = [48, 0], sizes = [8, 64], strides = [1, 1]} : vector<64x64xf32> to vector<8x64xf32>
    %cst_55 = arith.constant dense<0.000000e+00> : vector<64x64xf32>
    %145 = tpu.matmul %143, %144, %cst_55 {dimension_numbers = #tpu.dot_dimension_numbers<[1], [0], [0], [1], [0, 0, 1, 1], [], []>} : vector<64x8xf32>, vector<8x64xf32>, vector<64x64xf32> -> vector<64x64xf32>
    %146 = arith.addf %127, %145 : vector<64x64xf32>
    %147 = vector.extract_strided_slice %9 {offsets = [0, 56], sizes = [64, 8], strides = [1, 1]} : vector<64x64xf32> to vector<64x8xf32>
    %148 = vector.extract_strided_slice %10 {offsets = [0, 56], sizes = [64, 8], strides = [1, 1]} : vector<64x64xf32> to vector<64x8xf32>
    %149 = vector.extract_strided_slice %11 {offsets = [0, 56], sizes = [64, 8], strides = [1, 1]} : vector<64x64xf32> to vector<64x8xf32>
    %cst_56 = arith.constant dense<0.000000e+00> : vector<64x64xf32>
    %150 = tpu.matmul %147, %148, %cst_56 {dimension_numbers = #tpu.dot_dimension_numbers<[1], [1], [0], [0], [0, 0, 1, 0], [], []>} : vector<64x8xf32>, vector<64x8xf32>, vector<64x64xf32> -> vector<64x64xf32>
    %cst_57 = arith.constant 0.353553385 : f32
    %151 = vector.broadcast %cst_57 : f32 to vector<64x64xf32>
    %152 = arith.mulf %150, %151 : vector<64x64xf32>
    %cst_58 = arith.constant dense<0xFF800000> : vector<64xf32>
    %153 = vector.multi_reduction <maximumf>, %152, %cst_58 [1] : vector<64x64xf32> to vector<64xf32>
    %154 = vector.shape_cast %153 : vector<64xf32> to vector<64x1xf32>
    %155 = vector.broadcast %154 : vector<64x1xf32> to vector<64x64xf32>
    %156 = arith.subf %152, %155 : vector<64x64xf32>
    %157 = math.exp %156 : vector<64x64xf32>
    %cst_59 = arith.constant dense<0.000000e+00> : vector<64xf32>
    %158 = vector.multi_reduction <add>, %157, %cst_59 [1] : vector<64x64xf32> to vector<64xf32>
    %159 = vector.shape_cast %158 : vector<64xf32> to vector<64x1xf32>
    %160 = vector.broadcast %159 : vector<64x1xf32> to vector<64x64xf32>
    %161 = arith.divf %157, %160 : vector<64x64xf32>
    %cst_60 = arith.constant dense<0.000000e+00> : vector<64x8xf32>
    %162 = tpu.matmul %161, %149, %cst_60 {dimension_numbers = #tpu.dot_dimension_numbers<[1], [0], [0], [1], [0, 0, 1, 1], [], []>} : vector<64x64xf32>, vector<64x8xf32>, vector<64x8xf32> -> vector<64x8xf32>
    %163 = vector.extract_strided_slice %12 {offsets = [56, 0], sizes = [8, 64], strides = [1, 1]} : vector<64x64xf32> to vector<8x64xf32>
    %cst_61 = arith.constant dense<0.000000e+00> : vector<64x64xf32>
    %164 = tpu.matmul %162, %163, %cst_61 {dimension_numbers = #tpu.dot_dimension_numbers<[1], [0], [0], [1], [0, 0, 1, 1], [], []>} : vector<64x8xf32>, vector<8x64xf32>, vector<64x64xf32> -> vector<64x64xf32>
    %165 = arith.addf %146, %164 : vector<64x64xf32>
    %c0_62 = arith.constant 0 : index
    %c0_63 = arith.constant 0 : index
    %166 = vector.load %arg11[%c0_62, %c0_63] : memref<1x64xf32, #tpu.memory_space<vmem>>, vector<1x64xf32>
    %167 = vector.broadcast %166 : vector<1x64xf32> to vector<64x64xf32>
    %168 = arith.addf %165, %167 : vector<64x64xf32>
    %c0_64 = arith.constant 0 : index
    %c0_65 = arith.constant 0 : index
    %c0_66 = arith.constant 0 : index
    %169 = vector.load %arg14[%c0_64, %c0_65, %c0_66] : memref<1x64x64xf32, #tpu.memory_space<vmem>>, vector<1x64x64xf32>
    %170 = vector.shape_cast %169 : vector<1x64x64xf32> to vector<64x64xf32>
    %171 = vector.shape_cast %168 : vector<64x64xf32> to vector<1x64x64xf32>
    tpu.vector_store %arg14[%c0_64, %c0_65, %c0_66], %171 {strides = array<i32>} : memref<1x64x64xf32, #tpu.memory_space<vmem>>, vector<1x64x64xf32>,
    return
  }
  func.func @transform_0(%arg0: i32, %arg1: i32) -> (i32, i32, i32) {
    %c0_i32 = arith.constant 0 : i32
    %c0_i32_0 = arith.constant 0 : i32
    return %arg0, %arg1, %c0_i32 : i32, i32, i32
  }
  func.func @transform_1(%arg0: i32, %arg1: i32) -> (i32, i32, i32) {
    %c0_i32 = arith.constant 0 : i32
    %c0_i32_0 = arith.constant 0 : i32
    %c0_i32_1 = arith.constant 0 : i32
    return %arg0, %c0_i32, %c0_i32_0 : i32, i32, i32
  }
  func.func @transform_2(%arg0: i32, %arg1: i32) -> (i32, i32) {
    %c0_i32 = arith.constant 0 : i32
    %c0_i32_0 = arith.constant 0 : i32
    %c0_i32_1 = arith.constant 0 : i32
    return %c0_i32, %c0_i32_0 : i32, i32
  }
  func.func @transform_3(%arg0: i32, %arg1: i32) -> (i32, i32) {
    %c0_i32 = arith.constant 0 : i32
    %c0_i32_0 = arith.constant 0 : i32
    %c0_i32_1 = arith.constant 0 : i32
    return %c0_i32, %c0_i32_0 : i32, i32
  }
  func.func @transform_4(%arg0: i32, %arg1: i32) -> (i32, i32) {
    %c0_i32 = arith.constant 0 : i32
    %c0_i32_0 = arith.constant 0 : i32
    %c0_i32_1 = arith.constant 0 : i32
    return %c0_i32, %c0_i32_0 : i32, i32
  }
  func.func @transform_5(%arg0: i32, %arg1: i32) -> (i32, i32) {
    %c0_i32 = arith.constant 0 : i32
    %c0_i32_0 = arith.constant 0 : i32
    %c0_i32_1 = arith.constant 0 : i32
    return %c0_i32, %c0_i32_0 : i32, i32
  }
  func.func @transform_6(%arg0: i32, %arg1: i32) -> (i32, i32) {
    %c0_i32 = arith.constant 0 : i32
    %c0_i32_0 = arith.constant 0 : i32
    %c0_i32_1 = arith.constant 0 : i32
    return %c0_i32, %c0_i32_0 : i32, i32
  }
  func.func @transform_7(%arg0: i32, %arg1: i32) -> (i32, i32) {
    %c0_i32 = arith.constant 0 : i32
    %c0_i32_0 = arith.constant 0 : i32
    %c0_i32_1 = arith.constant 0 : i32
    return %c0_i32, %c0_i32_0 : i32, i32
  }
  func.func @transform_8(%arg0: i32, %arg1: i32) -> (i32, i32) {
    %c0_i32 = arith.constant 0 : i32
    %c0_i32_0 = arith.constant 0 : i32
    %c0_i32_1 = arith.constant 0 : i32
    return %c0_i32, %c0_i32_0 : i32, i32
  }
  func.func @transform_9(%arg0: i32, %arg1: i32) -> (i32, i32) {
    %c0_i32 = arith.constant 0 : i32
    %c0_i32_0 = arith.constant 0 : i32
    %c0_i32_1 = arith.constant 0 : i32
    return %c0_i32, %c0_i32_0 : i32, i32
  }
  func.func @transform_10(%arg0: i32, %arg1: i32) -> (i32, i32) {
    %c0_i32 = arith.constant 0 : i32
    %c0_i32_0 = arith.constant 0 : i32
    %c0_i32_1 = arith.constant 0 : i32
    return %c0_i32, %c0_i32_0 : i32, i32
  }
  func.func @transform_11(%arg0: i32, %arg1: i32) -> (i32, i32) {
    %c0_i32 = arith.constant 0 : i32
    %c0_i32_0 = arith.constant 0 : i32
    %c0_i32_1 = arith.constant 0 : i32
    return %c0_i32, %c0_i32_0 : i32, i32
  }
  func.func @transform_12(%arg0: i32, %arg1: i32) -> (i32, i32, i32) {
    %c0_i32 = arith.constant 0 : i32
    %c0_i32_0 = arith.constant 0 : i32
    return %arg0, %arg1, %c0_i32 : i32, i32, i32
  }
}

</mosaic_0001>

<bundles_post_ra>
// kernel: tpu_custom_call.1
= control target key start
LH: loop header
LB: loop body
LE: loop exit
PB: predicated region body
PF: predicated region fallthrough
CT: control target
= control target key end

     0   :  { %s8319_s0 = inlined_call_operand.hbm [shape: f32[2,64,64], index: 0, kind: input, shape index: {}]   ;;  %s8320_s1 = inlined_call_operand.hbm [shape: f32[2,64,64], index: 1, kind: input, shape index: {}]   ;;  %s8321_s2 = inlined_call_operand.hbm [shape: f32[64,64], index: 2, kind: input, shape index: {}]   ;;  %s8322_s3 = inlined_call_operand.vmem [shape: f32[1,64], index: 3, kind: input, shape index: {}]   ;;  %s8323_s4 = inlined_call_operand.hbm [shape: f32[64,64], index: 4, kind: input, shape index: {}]   ;;  %s8324_s5 = inlined_call_operand.vmem [shape: f32[1,64], index: 5, kind: input, shape index: {}]   ;;  %s8325_s6 = inlined_call_operand.hbm [shape: f32[64,64], index: 6, kind: input, shape index: {}]   ;;  %s8326_s7 = inlined_call_operand.vmem [shape: f32[1,64], index: 7, kind: input, shape index: {}]   ;;  %s8327_s8 = inlined_call_operand.hbm [shape: f32[64,64], index: 8, kind: input, shape index: {}]   ;;  %s8328_s9 = inlined_call_operand.vmem [shape: f32[1,64], index: 9, kind: input, shape index: {}]   ;;  %s8329_s10 = inlined_call_operand.vmem [shape: f32[1,64], index: 10, kind: input, shape index: {}]   ;;  %s8330_s11 = inlined_call_operand.vmem [shape: f32[1,64], index: 11, kind: input, shape index: {}]   ;;  %s8331_s12 = inlined_call_operand.hbm [shape: f32[2,64,64], index: 12, kind: output, shape index: {}]  }
   0x1   :  { %8345 = sst [smem:[#allocation48_spill]] %s8321_s2 }
   0x2   :  { %8346 = sst [smem:[#allocation49_spill]] %s8323_s4 }
   0x3   :  { %8347 = sst [smem:[#allocation50_spill]] %s8325_s6 }
   0x4   :  { %8348 = sst [smem:[#allocation51_spill]] %s8327_s8 }
   0x5   :  { %17 = vsyncpa [#allocation5], 0 }
   0x6   :  { %19 = vsyncpa [#allocation5 + $0x1], 0 }
   0x7   :  { %20 = vsyncpa [#allocation8], 0 }
   0x8   :  { %22 = vsyncpa [#allocation8 + $0x1], 0 }
   0x9   :  { %23 = vsyncpa [#allocation11], 0 }
   0xa   :  { %24 = vsyncpa [#allocation14], 0 }
   0xb   :  { %25 = vsyncpa [#allocation6], 0 }
   0xc   :  { %27 = vsyncpa [#allocation6 + $0x1], 0  ;;  %s5955_s21 = smov 0   ;;  %s5957_s22 = smov 0  }
   0xd   :  { %s5959_s23 = smov 0   ;;  %s5961_s10 = smov 0  }
   0xe   :  { %s5963_s11 = smov 0   ;;  %s5965_s24 = smov 0  }
   0xf LB: > { %8349 = sst [smem:[#allocation22_spill]] %s5853_s21  ;;  %s5986_s25 = sadd.s32 4294967295, %s5873_s24   ;;  %s5873_s24 = sphi %s5965_s24, %s33_s24   ;;  %s5869_s11 = sphi %s5963_s11, %s8458_s11   ;;  %s5865_s10 = sphi %s5961_s10, %s8453_s10   ;;  %s5861_s23 = sphi %s5959_s23, %s8457_s23   ;;  %s5857_s22 = sphi %s5957_s22, %s8456_s22   ;;  %s5853_s21 = sphi %s5955_s21, %s8455_s21  }
  0x10   : > { %8350 = sst [smem:[#allocation23_spill]] %s5861_s23  ;;  %s4707_s26 = sadd.s32 4294967294, %s5873_s24  }
  0x11   : > { %8351 = sst [smem:[#allocation24_spill]] %s5869_s11  ;;  %p67_p0 = scmp.ne.s32.totalorder %s5857_s22, %s5853_s21 }
  0x12   : > { %p68_p1 = scmp.eq.s32.totalorder %s5986_s25, 0  ;;  %p329_p2 = scmp.eq.s32.totalorder %s5986_s25, 1 }
  0x13   : > { %p335_p3 = scmp.eq.s32.totalorder %s4707_s26, 1  ;;  %p4708_p5 = scmp.ge.s32.totalorder %s5873_s24, 1 }
  0x14   : > { %p5995_p4 = por %p68_p1, %p67_p0  ;;  %p342_p7 = scmp.lt.s32.totalorder %s5873_s24, 3 }
  0x15   : > { %p6000_p6 = por %p335_p3, %p67_p0  ;;  %s8355_s2 = sld [smem:[#allocation48_spill]] }
  0x16   : > { %p6008_p8 = pnand %p4708_p5, %p342_p7  ;;  %s5875_s15 = smov [#allocation9]  }
  0x17   : > { %s8353_s28 = scalar_select %p6000_p6, 1, 0 }
  0x18   : > { %p5062_p9 = pneg %p6008_p8  ;;  %s355_s16 = sshll.u32 %s5875_s15, 4  ;;  %s356_s16 = int_to_ptr.vmem [resolvable:$true] %s355_s16 }
  0x19   : > { %8354 = sst [smem:[#allocation25_spill]] %s8353_s28  ;;  %p4713_p11 = scmp.ge.s32.totalorder %s5873_s24, 2 }
  0x1a   : > { %p6016_p10 = pnand %p5062_p9, %p68_p1  ;;  %s8358_s4 = sld [smem:[#allocation49_spill]] }
  0x1b   : > { %s353_s13 = sshll.u32 %s8355_s2, 4  ;;  %s8334_s26 = smov 128   ;;  %s354_s13 = int_to_ptr.hbm [resolvable:$true] %s353_s13 }
  0x1c   : > { %s8336_s29 = smov 8   ;;  %s5878_s30 = smov [#allocation10]  }
  0x1d   : > { %5065 = dma.hbm_to_vmem [thread:$0]  (!%p6016_p10), %s354_s13, 1024, %s356_s16, [#allocation8], %s8334_s26, %s8334_s26, %s8336_s29  }
  0x1e   : > { %s372_s15 = sshll.u32 %s5878_s30, 4  ;;  %s8359_s6 = sld [smem:[#allocation50_spill]]  ;;  %s373_s15 = int_to_ptr.vmem [resolvable:$true] %s372_s15 }
  0x1f   : > { %s8360_s8 = sld [smem:[#allocation51_spill]]  ;;  %s5879_s19 = smov [#allocation12]  }
  0x20   : > { %s370_s20 = sshll.u32 %s8358_s4, 4  ;;  %s389_s30 = sshll.u32 %s5879_s19, 4  ;;  %s371_s20 = int_to_ptr.hbm [resolvable:$true] %s370_s20  ;;  %s390_s30 = int_to_ptr.vmem [resolvable:$true] %s389_s30 }
  0x21   : > { %5068 = dma.hbm_to_vmem [thread:$0]  (!%p6016_p10), %s371_s20, 1024, %s373_s15, [#allocation11], %s8334_s26, %s8334_s26, %s8336_s29  }
  0x22   : > { %s5880_s2 = smov [#allocation13]   ;;  %s45_s20 = sadd.s32 1, %s5869_s11 }
  0x23   : > { %s406_s28 = sshll.u32 %s5880_s2, 4  ;;  %s54_s15 = sadd.s32 1, %s5861_s23  ;;  %s407_s28 = int_to_ptr.vmem [resolvable:$true] %s406_s28 }
  0x24   : > { %s387_s21 = sshll.u32 %s8359_s6, 4  ;;  %p47_p12 = scmp.ge.s32.totalorder %s45_s20, 2  ;;  %s388_s21 = int_to_ptr.hbm [resolvable:$true] %s387_s21 }
  0x25   : > { %s404_s18 = sshll.u32 %s8360_s8, 4  ;;  %p61_p13 = scmp.ne.s32.totalorder %s5861_s23, %s5857_s22  ;;  %s405_s18 = int_to_ptr.hbm [resolvable:$true] %s404_s18 }
  0x26   : > { %5071 = dma.hbm_to_vmem [thread:$0]  (!%p6016_p10), %s388_s21, 1024, %s390_s30, [#allocation11], %s8334_s26, %s8334_s26, %s8336_s29  }
  0x27   : > { %5074 = dma.hbm_to_vmem [thread:$0]  (!%p6016_p10), %s405_s18, 1024, %s407_s28, [#allocation14], %s8334_s26, %s8334_s26, %s8336_s29  }
  0x28   : > { %p62_p0 = scmp.eq.s32.totalorder %s5873_s24, 0  ;;  %p5090_p3 = scmp.lt.s32.totalorder %s5873_s24, 2 }
  0x29   : > { %s8460_s20 = smov (%p47_p12, %s45_s20), 0  ;;  %p6064_p7 = por %p329_p2, %p61_p13 }
  0x2a   : > { %8361 = sst [smem:[#allocation26_spill]] %s8460_s20  ;;  %p6058_p5 = por %p62_p0, %p61_p13 }
  0x2b   : > { %s8363_s17 = scalar_select %p6064_p7, 1, 0 }
  0x2c   : > { %s49_s13 = ssub.s32 %s5869_s11, %s8460_s20  ;;  %s429_s16 = sand.u32 1, %s5861_s23  }
  0x2d   : > { %8364 = sst [smem:[#allocation27_spill]] %s8363_s17  ;;  %p52_p9 = scmp.eq.s32.totalorder %s49_s13, 0 }
  0x2e   : > { %s4714_s18 = sshll.u32 %s429_s16, 6  ;;  %s5013_s19 = sshll.u32 %s5869_s11, 6 }
  0x2f   : > { %s6073_s30 = scalar_select %p52_p9, %s5861_s23, %s54_s15  }
  0x30   : > { %s440_s26 = scalar_lea.hbm %s8319_s0, %s5013_s19  ;;  %s433_s4 = scalar_lea.vmem [#allocation4], %s4714_s18 }
  0x31   : > { %8365 = sst [smem:[#allocation28_spill]] %s6073_s30  ;;  %s441_s29 = sshll.u32 %s440_s26, 4  ;;  %s442_s29 = int_to_ptr.hbm [resolvable:$true] %s441_s29 }
  0x32   : > { %s443_s6 = sshll.u32 %s433_s4, 4  ;;  %p5076_p2 = pnand %p5090_p3, %p6058_p5  ;;  %s444_s6 = int_to_ptr.vmem [resolvable:$true] %s443_s6 }
  0x33   : > { %s462_s13 = scalar_lea.hbm %s8320_s1, %s5013_s19  ;;  %s457_s11 = scalar_lea.vmem [#allocation7], %s4714_s18 }
  0x34   : > { %s465_s15 = sshll.u32 %s457_s11, 4  ;;  %s463_s30 = sshll.u32 %s462_s13, 4  ;;  %s464_s30 = int_to_ptr.hbm [resolvable:$true] %s463_s30  ;;  %s466_s15 = int_to_ptr.vmem [resolvable:$true] %s465_s15 }
  0x35   : > { %s430_s23 = scalar_lea.sflag [#allocation5], %s429_s16  ;;  %s8366_s17 = smov 8  }
  0x36   : > { %s8367_s2 = smov 128   ;;  %s453_s4 = sand.u32 1, %s5873_s24  }
  0x37   : > { %5078 = dma.hbm_to_vmem [thread:$0]  (!%p5076_p2), %s442_s29, 1024, %s444_s6, %s430_s23, %s8367_s2, %s8367_s2, %s8366_s17  }
  0x38   : > { %s454_s26 = scalar_lea.sflag [#allocation8], %s453_s4  ;;  %477 = sbr.rel (%p6008_p8) target bundleno = 3290 (0xcda), region = 68 }
  0x39   : > { %5081 = dma.hbm_to_vmem [thread:$0]  (!%p5076_p2), %s464_s30, 1024, %s466_s15, %s454_s26, %s8367_s2, %s8367_s2, %s8366_s17  }
  0x3d   : > { %s6095_s8 = sand.u32 1, %s5857_s22  }
  0x3e   : > { %s6098_s11 = sshll.u32 %s6095_s8, 6  ;;  %s480_s6 = scalar_lea.sflag [#allocation5], %s6095_s8 }
  0x3f   : > { %s6102_s23 = scalar_lea.vmem [#allocation4], %s6098_s11 }
  0x40   : > { %5828 = dma.done.wait (%p5995_p4), %s480_s6, 1024  }
  0x41   : > { %5830 = vsyncadd (%p5995_p4), %s480_s6, 4294966272  ;;  %s489_s14 = sand.u32 1, %s5986_s25   ;;  %s6110_s20 = scalar_lea.vmem [#allocation7], %s6098_s11 }
  0x42   : > { %s490_s29 = scalar_lea.sflag [#allocation8], %s489_s14 }
  0x43   : > { %5832 = dma.done.wait (%p5995_p4), %s490_s29, 1024  }
  0x44   : > { %5834 = vsyncadd (%p5995_p4), %s490_s29, 4294966272 }
  0x45   : > { %5836 = dma.done.wait (%p68_p1), [#allocation8], 1024  }
  0x46   : > { %5838 = vsyncadd (%p68_p1), [#allocation8], 4294966272 }
  0x47   : > { %5840 = dma.done.wait (%p68_p1), [#allocation11], 2048  }
  0x48   : > { %5842 = vsyncadd (%p68_p1), [#allocation11], 4294965248 }
  0x49   : > { %5844 = dma.done.wait (%p68_p1), [#allocation14], 1024  }
  0x4a   : > { %5846 = vsyncadd (%p68_p1), [#allocation14], 4294966272  ;;  %v581_v0 = vld [vmem:[#allocation10 + $0x38] sm:$0xff]  ;;  %v580_v1 = vld [vmem:[#allocation10 + $0x30] sm:$0xff]  ;;  %vm586_vm0 = vcmask 523264   ;;  %vm831_vm1 = vcmask 64512  }
  0x4b   : > { %5016 = vmatpush.msra.mxu3 %v581_v0  ;;  %619 = vmatpush.msra.mxu0 %v581_v0  ;;  %v579_v2 = vld [vmem:[#allocation10 + $0x28] sm:$0xff]  ;;  %v578_v3 = vld [vmem:[#allocation10 + $0x20] sm:$0xff]  ;;  %v577_v4 = vld [vmem:[#allocation10 + $0x18] sm:$0xff]  ;;  %s5881_s16 = smov 120   ;;  %s5882_s30 = smov 112  }
  0x4c   : > { %v576_v5 = vld [vmem:[#allocation10 + $0x10] sm:$0xff]  ;;  %v575_v6 = vld [vmem:[#allocation10 + $0x8] sm:$0xff]  ;;  %v574_v7 = vld [vmem:[#allocation10] sm:$0xff]  ;;  %s5883_s28 = smov 104   ;;  %s5884_s13 = smov 96  }
  0x4d   : > { %5017 = vmatpush.msra.mxu3 %v580_v1  ;;  %620 = vmatpush.msra.mxu0 %v580_v1  ;;  %v6129_v8 = vld [vmem:[%s6110_s20 + $0x10] sm:$0xff]  ;;  %v6134_v9 = vld [vmem:[%s6110_s20 + $0x18] sm:$0xff]  ;;  %v6139_v10 = vld [vmem:[%s6110_s20] sm:$0xff]  ;;  %s5885_s15 = smov 88   ;;  %s5886_s2 = smov 80  }
  0x4e   : > { %v736_v11 = vld [vmem:[#allocation9 + $0x38] sm:$0xff]  ;;  %v735_v12 = vld [vmem:[#allocation9 + $0x30] sm:$0xff]  ;;  %v734_v13 = vld [vmem:[#allocation9 + $0x28] sm:$0xff]  ;;  %s5887_s4 = smov 72  }
  0x4f   : > { %5018 = vmatpush.msra.mxu3 %v579_v2  ;;  %621 = vmatpush.msra.mxu0 %v579_v2  ;;  %v733_v14 = vld [vmem:[#allocation9 + $0x20] sm:$0xff]  ;;  %v6147_v16 = vld [vmem:[%s6110_s20 + $0x8] sm:$0xff]  ;;  %v732_v17 = vld [vmem:[#allocation9 + $0x18] sm:$0xff] }
  0x50   : > { %774 = vmatpush.msra.mxu2 %v736_v11  ;;  %v6144_v15 = vld [vmem:[%s6110_s20 + $0x20] sm:$0xff]  ;;  %v731_v18 = vld [vmem:[#allocation9 + $0x10] sm:$0xff]  ;;  %v730_v19 = vld [vmem:[#allocation9 + $0x8] sm:$0xff] }
  0x51   : > { %5019 = vmatpush.msra.mxu3 %v578_v3  ;;  %622 = vmatpush.msra.mxu0 %v578_v3  ;;  %v729_v20 = vld [vmem:[#allocation9] sm:$0xff]  ;;  %v6154_v21 = vld [vmem:[%s6110_s20 + $0x28] sm:$0xff]  ;;  %v6161_v23 = vld [vmem:[%s6110_s20 + $0x30] sm:$0xff] }
  0x52   : > { %775 = vmatpush.msra.mxu2 %v735_v12  ;;  %v721_v22 = vld [vmem:[%s6102_s23] sm:$0xff]  ;;  %v722_v24 = vld [vmem:[%s6102_s23 + $0x8] sm:$0xff]  ;;  %v6168_v25 = vld [vmem:[%s6110_s20 + $0x38] sm:$0xff] }
  0x53   : > { %5020 = vmatpush.msra.mxu3 %v577_v4  ;;  %623 = vmatpush.msra.mxu0 %v577_v4  ;;  %v723_v26 = vld [vmem:[%s6102_s23 + $0x10] sm:$0xff]  ;;  %v724_v27 = vld [vmem:[%s6102_s23 + $0x18] sm:$0xff]  ;;  %v725_v28 = vld [vmem:[%s6102_s23 + $0x20] sm:$0xff] }
  0x54   : > { %776 = vmatpush.msra.mxu2 %v734_v13  ;;  %v726_v29 = vld [vmem:[%s6102_s23 + $0x28] sm:$0xff]  ;;  %v727_v30 = vld [vmem:[%s6102_s23 + $0x30] sm:$0xff]  ;;  %v728_v31 = vld [vmem:[%s6102_s23 + $0x38] sm:$0xff]  ;;  %s8255_s23 = scalar_lea.vmem [#allocation15], %s6098_s11  ;;  %s5015_s11 = sshll.u32 %s5865_s10, 6 }
  0x55   : > { %5021 = vmatpush.msra.mxu3 %v576_v5  ;;  %624 = vmatpush.msra.mxu0 %v576_v5  ;;  %v5299_v32 = vld [vmem:[%s8324_s5] ss:$0 sm:$0xff]  ;;  %s4554_s20 = scalar_lea.hbm %s8331_s12, %s5015_s11  ;;  %s4555_s27 = sshll.u32 %s8255_s23, 4  ;;  %s4556_s27 = int_to_ptr.vmem [resolvable:$true] %s4555_s27 }
  0x56   : > { %777 = vmatpush.msra.mxu2 %v733_v14  ;;  %v5300_v58 = vld [vmem:[%s8322_s3] ss:$0 sm:$0xff]  ;;  %s4557_s21 = sshll.u32 %s4554_s20, 4  ;;  %s4541_s10 = scalar_lea.sflag [#allocation6], %s6095_s8  ;;  %s4558_s21 = int_to_ptr.hbm [resolvable:$true] %s4557_s21 }
  0x57   : > { %5022 = vmatpush.msra.mxu3 %v575_v6  ;;  %625 = vmatpush.msra.mxu0 %v575_v6  ;;  %s5789_s17 = sshra.s32 %s4558_s21, 4  ;;  %s5790_s17 = int_to_ptr.hbm [resolvable:$true] %s5789_s17 }
  0x58   : > { %778 = vmatpush.msra.mxu2 %v732_v17  ;;  %p5796_p10 = scmp.lt.s32.totalorder %s5790_s17, %s8331_s12 }
  0x59   : > { %5023 = vmatpush.msra.mxu3 %v574_v7  ;;  %626 = vmatpush.msra.mxu0 %v574_v7 }
  0x5a   : > { %4730 = vmatmul.msk.f32.vlgmr.msra.gmra.mxu3 %vm586_vm0, %v6129_v8  ;;  %4728 = vmatmul.msk.f32.vlgmr.msra.gmra.mxu0 %vm586_vm0, %v6139_v10 }
  0x5b   : > { %779 = vmatpush.msra.mxu2 %v731_v18 }
  0x5d   : > { %780 = vmatpush.msra.mxu2 %v730_v19 }
  0x5f   : > { %781 = vmatpush.msra.mxu2 %v729_v20 }
  0x60   : > { %4744 = vmatmul.msk.f32.vlgmr.msra.gmra.mxu2 %vm586_vm0, %v721_v22 }
  0x62   : > { %4731 = vmatmul.msk.f32.gmra.mxu3 %vm586_vm0, %v6134_v9  ;;  %4729 = vmatmul.msk.f32.gmra.mxu0 %vm586_vm0, %v6147_v16 }
  0x68   : > { %4745 = vmatmul.msk.f32.gmra.mxu2 %vm586_vm0, %v722_v24 }
  0x6a   : > { %4732 = vmatmul.msk.f32.gmra.mxu3 %vm586_vm0, %v6144_v15 }
  0x70   : > { %4746 = vmatmul.msk.f32.gmra.mxu2 %vm586_vm0, %v723_v26 }
  0x72   : > { %4733 = vmatmul.msk.f32.gmra.mxu3 %vm586_vm0, %v6154_v21 }
  0x78   : > { %4747 = vmatmul.msk.f32.gmra.mxu2 %vm586_vm0, %v724_v27 }
  0x7a   : > { %4734 = vmatmul.msk.f32.gmra.mxu3 %vm586_vm0, %v6161_v23 }
  0x80   : > { %4748 = vmatmul.msk.f32.gmra.mxu2 %vm586_vm0, %v725_v28 }
  0x82   : > { %4735 = vmatmul.msk.f32.gmra.mxu3 %vm586_vm0, %v6168_v25 }
  0x88   : > { %4749 = vmatmul.msk.f32.gmra.mxu2 %vm586_vm0, %v726_v29 }
  0x90   : > { %4750 = vmatmul.msk.f32.gmra.mxu2 %vm586_vm0, %v727_v30  ;;  %v667_v30 = vld [vmem:[#allocation12 + $0x38] sm:$0xff] }
  0x91   : > { %5024 = vmatpush.msra.mxu1 %v667_v30  ;;  %680 = vmatpush.msrb.mxu0 %v667_v30 }
  0x98   : > { %4751 = vmatmul.msk.f32.gmra.mxu2 %vm586_vm0, %v728_v31  ;;  %v666_v31 = vld [vmem:[#allocation12 + $0x30] sm:$0xff] }
  0x99   : > { %5025 = vmatpush.msra.mxu1 %v666_v31  ;;  %681 = vmatpush.msrb.mxu0 %v666_v31 }
  0xd7   : > { %v628_v39 = vpop.f32.mrf.mxu0 }
  0xd8   : > { %v629_v41 = vadd.f32 %v5299_v32, %v628_v39  ;;  %v661_v39 = vld [vmem:[#allocation12 + $0x8] sm:$0xff] }
  0xda   : > { %652 = vst.msk [vmem:[#allocation2] sm:$0xff] %vm586_vm0, %v629_v41  ;;  %v660_v41 = vld [vmem:[#allocation12] sm:$0xff] }
  0xdd   : > { %v634_v33 = vpop.f32.mrf.mxu3 }
  0xde   : > { %v635_v34 = vadd.f32 %v5299_v32, %v634_v33 }
  0xdf   : > { %v631_v43 = vpop.f32.mrf.mxu0 }
  0xe0   : > { %654 = vst.msk [vmem:[#allocation2 + $0x10] sm:$0xff] %vm586_vm0, %v635_v34  ;;  %v632_v45 = vadd.f32 %v5299_v32, %v631_v43  ;;  %v664_v34 = vld [vmem:[#allocation12 + $0x20] sm:$0xff] }
  0xe1   : > { %v6228_v60 = vld [vmem:[#allocation2] sm:$0xff] }
  0xe2   : > { %653 = vst.msk [vmem:[#allocation2 + $0x8] sm:$0xff] %vm586_vm0, %v632_v45 }
  0xe3   : > { %v783_v52 = vpop.f32.mrf.mxu2 }
  0xe4   : > { %v6226_v59 = vadd.f32 %v5300_v58, %v783_v52 }
  0xe5   : > { %v637_v35 = vpop.f32.mrf.mxu3 }
  0xe6   : > { %v638_v36 = vadd.f32 %v5299_v32, %v637_v35 }
  0xe7   : > { %v6215_v55 = vld [vmem:[#allocation2 + $0x10] sm:$0xff] }
  0xe8   : > { %655 = vst.msk [vmem:[#allocation2 + $0x18] sm:$0xff] %vm586_vm0, %v638_v36  ;;  %v663_v36 = vld [vmem:[#allocation12 + $0x18] sm:$0xff] }
  0xe9   : > { %v6219_v57 = vld [vmem:[#allocation2 + $0x8] sm:$0xff] }
  0xeb   : > { %v786_v56 = vpop.f32.mrf.mxu2 }
  0xec   : > { %v6234_v62 = vadd.f32 %v5300_v58, %v786_v56 }
  0xed   : > { %v640_v37 = vpop.f32.mrf.mxu3 }
  0xee   : > { %v641_v38 = vadd.f32 %v5299_v32, %v640_v37 }
  0xef   : > { %v6211_v54 = vld [vmem:[#allocation2 + $0x18] sm:$0xff] }
  0xf0   : > { %656 = vst.msk [vmem:[#allocation2 + $0x20] sm:$0xff] %vm586_vm0, %v641_v38  ;;  %v662_v38 = vld [vmem:[#allocation12 + $0x10] sm:$0xff] }
  0xf3   : > { %v789_v61 = vpop.f32.mrf.mxu2 }
  0xf4   : > { %v6238_v0 = vadd.f32 %v5300_v58, %v789_v61 }
  0xf5   : > { %v643_v40 = vpop.f32.mrf.mxu3 }
  0xf6   : > { %v644_v42 = vadd.f32 %v5299_v32, %v643_v40 }
  0xf7   : > { %v6207_v53 = vld [vmem:[#allocation2 + $0x20] sm:$0xff] }
  0xf8   : > { %657 = vst.msk [vmem:[#allocation2 + $0x28] sm:$0xff] %vm586_vm0, %v644_v42 }
  0xfb   : > { %v792_v63 = vpop.f32.mrf.mxu2 }
  0xfc   : > { %v6242_v2 = vadd.f32 %v5300_v58, %v792_v63 }
  0xfd   : > { %v646_v44 = vpop.f32.mrf.mxu3 }
  0xfe   : > { %v647_v46 = vadd.f32 %v5299_v32, %v646_v44 }
  0xff   : > { %v6203_v51 = vld [vmem:[#allocation2 + $0x28] sm:$0xff] }
 0x100   : > { %658 = vst.msk [vmem:[#allocation2 + $0x30] sm:$0xff] %vm586_vm0, %v647_v46 }
 0x103   : > { %v795_v1 = vpop.f32.mrf.mxu2 }
 0x104   : > { %v6246_v3 = vadd.f32 %v5300_v58, %v795_v1 }
 0x105   : > { %v649_v47 = vpop.f32.mrf.mxu3 }
 0x106   : > { %v650_v48 = vadd.f32 %v5299_v32, %v649_v47  ;;  %v665_v32 = vld [vmem:[#allocation12 + $0x28] sm:$0xff] }
 0x107   : > { %v6199_v50 = vld [vmem:[#allocation2 + $0x30] sm:$0xff]  ;;  %5026 = vmatpush.msra.mxu1 %v665_v32  ;;  %682 = vmatpush.msrb.mxu0 %v665_v32  ;;  %v5301_v32 = vld [vmem:[%s8326_s7] ss:$0 sm:$0xff] }
 0x108   : > { %659 = vst.msk [vmem:[#allocation2 + $0x38] sm:$0xff] %vm586_vm0, %v650_v48 }
 0x109   : > { %5027 = vmatpush.msra.mxu1 %v664_v34  ;;  %683 = vmatpush.msrb.mxu0 %v664_v34 }
 0x10b   : > { %v798_v4 = vpop.f32.mrf.mxu2  ;;  %5028 = vmatpush.msra.mxu1 %v663_v36  ;;  %684 = vmatpush.msrb.mxu0 %v663_v36 }
 0x10c   : > { %v6250_v5 = vadd.f32 %v5300_v58, %v798_v4 }
 0x10d   : > { %5029 = vmatpush.msra.mxu1 %v662_v38  ;;  %685 = vmatpush.msrb.mxu0 %v662_v38 }
 0x10f   : > { %v6195_v49 = vld [vmem:[#allocation2 + $0x38] sm:$0xff]  ;;  %5030 = vmatpush.msra.mxu1 %v661_v39  ;;  %686 = vmatpush.msrb.mxu0 %v661_v39 }
 0x110   : > { %4752 = vmatpush.xpose.msk.msrb.mxu3 %vm831_vm1, %v6195_v49 }
 0x111   : > { %5031 = vmatpush.msra.mxu1 %v660_v41  ;;  %687 = vmatpush.msrb.mxu0 %v660_v41 }
 0x112   : > { %4740 = vmatmul.msk.f32.vlgmr.msra.gmra.mxu1 %vm586_vm0, %v6144_v15  ;;  %4736 = vmatmul.msk.f32.vlgmr.msrb.gmra.mxu0 %vm586_vm0, %v6139_v10 }
 0x113   : > { %v801_v6 = vpop.f32.mrf.mxu2 }
 0x114   : > { %4753 = vmatpush.xpose.msk.msrb.mxu3 %vm831_vm1, %v6199_v50  ;;  %v6254_v7 = vadd.f32 %v5300_v58, %v801_v6 }
 0x118   : > { %4754 = vmatpush.xpose.msk.msrb.mxu3 %vm831_vm1, %v6203_v51 }
 0x11a   : > { %4741 = vmatmul.msk.f32.gmra.mxu1 %vm586_vm0, %v6154_v21  ;;  %4737 = vmatmul.msk.f32.gmra.mxu0 %vm586_vm0, %v6147_v16 }
 0x11b   : > { %v804_v11 = vpop.f32.mrf.mxu2 }
 0x11c   : > { %4755 = vmatpush.xpose.msk.msrb.mxu3 %vm831_vm1, %v6207_v53  ;;  %v6258_v12 = vadd.f32 %v5300_v58, %v804_v11 }
 0x120   : > { %4756 = vmatpush.xpose.msk.msrb.mxu3 %vm831_vm1, %v6211_v54 }
 0x122   : > { %4742 = vmatmul.msk.f32.gmra.mxu1 %vm586_vm0, %v6161_v23  ;;  %4738 = vmatmul.msk.f32.gmra.mxu0 %vm586_vm0, %v6129_v8 }
 0x124   : > { %4757 = vmatpush.xpose.msk.msrb.mxu3 %vm831_vm1, %v6215_v55 }
 0x128   : > { %4758 = vmatpush.xpose.msk.msrb.mxu3 %vm831_vm1, %v6219_v57 }
 0x12a   : > { %4743 = vmatmul.msk.f32.gmra.mxu1 %vm586_vm0, %v6168_v25  ;;  %4739 = vmatmul.msk.f32.gmra.mxu0 %vm586_vm0, %v6134_v9 }
 0x12c   : > { %4759 = vmatpush.xpose.msk.msrb.mxu3 %vm831_vm1, %v6228_v60 }
 0x12f   : > { %4760 = vmatmul.msk.f32.vlgmr.msrb.gmra.mxu3 %vm831_vm1, %v6226_v59 }
 0x137   : > { %4761 = vmatmul.msk.f32.gmra.mxu3 %vm831_vm1, %v6234_v62 }
 0x13f   : > { %4762 = vmatmul.msk.f32.gmra.mxu3 %vm831_vm1, %v6238_v0 }
 0x147   : > { %4763 = vmatmul.msk.f32.gmra.mxu3 %vm831_vm1, %v6242_v2 }
 0x14f   : > { %4764 = vmatmul.msk.f32.gmra.mxu3 %vm831_vm1, %v6246_v3 }
 0x157   : > { %4765 = vmatmul.msk.f32.gmra.mxu3 %vm831_vm1, %v6250_v5 }
 0x15f   : > { %4766 = vmatmul.msk.f32.gmra.mxu3 %vm831_vm1, %v6254_v7 }
 0x167   : > { %4767 = vmatmul.msk.f32.gmra.mxu3 %vm831_vm1, %v6258_v12 }
 0x1b2   : > { %v897_v13 = vpop.f32.mrf.mxu3 }
 0x1b3   : > { %v6262_v14 = vmul.f32 0.35355338, %v897_v13 }
 0x1b5   : > { %v929_v17 = vsel %vm586_vm0, %v6262_v14, -inf }
 0x1b6   : > { %930 = vmax.xlane.f32.xlu0 %v929_v17 }
 0x1ba   : > { %v900_v18 = vpop.f32.mrf.mxu3 }
 0x1bb   : > { %v6266_v19 = vmul.f32 0.35355338, %v900_v18 }
 0x1bd   : > { %v932_v20 = vsel %vm586_vm0, %v6266_v19, -inf }
 0x1be   : > { %933 = vmax.xlane.f32.xlu0 %v932_v20 }
 0x1c2   : > { %v903_v22 = vpop.f32.mrf.mxu3 }
 0x1c3   : > { %v6270_v24 = vmul.f32 0.35355338, %v903_v22 }
 0x1c5   : > { %v935_v26 = vsel %vm586_vm0, %v6270_v24, -inf }
 0x1c6   : > { %936 = vmax.xlane.f32.xlu1 %v935_v26 }
 0x1ca   : > { %v906_v27 = vpop.f32.mrf.mxu3 }
 0x1cb   : > { %v6274_v28 = vmul.f32 0.35355338, %v906_v27 }
 0x1cd   : > { %v938_v29 = vsel %vm586_vm0, %v6274_v28, -inf }
 0x1ce   : > { %939 = vmax.xlane.f32.xlu1 %v938_v29 }
 0x1d2   : > { %v909_v33 = vpop.f32.mrf.mxu3 }
 0x1d3   : > { %v6278_v35 = vmul.f32 0.35355338, %v909_v33  ;;  %v701_v33 = vpop.f32.mrf.mxu1 }
 0x1d4   : > { %v702_v34 = vadd.f32 %v5301_v32, %v701_v33 }
 0x1d5   : > { %v941_v37 = vsel %vm586_vm0, %v6278_v35, -inf }
 0x1d6   : > { %942 = vmax.xlane.f32.xlu2 %v941_v37  ;;  %717 = vst.msk [vmem:[#allocation3 + $0x20] sm:$0xff] %vm586_vm0, %v702_v34 }
 0x1da   : > { %v912_v40 = vpop.f32.mrf.mxu3 }
 0x1db   : > { %v6282_v42 = vmul.f32 0.35355338, %v912_v40  ;;  %v704_v37 = vpop.f32.mrf.mxu1 }
 0x1dc   : > { %v705_v38 = vadd.f32 %v5301_v32, %v704_v37 }
 0x1dd   : > { %v944_v43 = vsel %vm586_vm0, %v6282_v42, -inf }
 0x1de   : > { %945 = vmax.xlane.f32.xlu2 %v944_v43  ;;  %718 = vst.msk [vmem:[#allocation3 + $0x28] sm:$0xff] %vm586_vm0, %v705_v38 }
 0x1e2   : > { %v915_v44 = vpop.f32.mrf.mxu3 }
 0x1e3   : > { %v927_v45 = vmul.f32 0.35355338, %v915_v44  ;;  %v707_v44 = vpop.f32.mrf.mxu1 }
 0x1e5   : > { %v947_v46 = vsel %vm586_vm0, %v927_v45, -inf }
 0x1e6   : > { %948 = vmax.xlane.f32.xlu0 %v947_v46 }
 0x1ea   : > { %v918_v47 = vpop.f32.mrf.mxu3 }
 0x1eb   : > { %v6295_v48 = vmul.f32 0.35355338, %v918_v47 }
 0x1ed   : > { %v950_v15 = vsel %vm586_vm0, %v6295_v48, -inf }
 0x1ee   : > { %951 = vmax.xlane.f32.xlu2 %v950_v15 }
 0x229   : > { %v931_v10 = vpop.xlane.xlu0 %930 }
 0x22a   : > { %v953_v16 = vsub.f32 %v6262_v14, %v931_v10 }
 0x22c   : > { %v961_v21 = vmul.f32 1.442695, %v953_v16  ;;  %v710_v16 = vpop.f32.mrf.mxu1 }
 0x22e   : > { %5303 = vpow2.f32 %v961_v21 }
 0x231   : > { %v934_v52 = vpop.xlane.xlu0 %933 }
 0x232   : > { %v954_v56 = vsub.f32 %v6266_v19, %v934_v52  ;;  %v711_v52 = vadd.f32 %v5301_v32, %v710_v16 }
 0x234   : > { %v6309_v58 = vpop.eup %5303  ;;  %v963_v23 = vmul.f32 1.442695, %v954_v56  ;;  %720 = vst.msk [vmem:[#allocation3 + $0x38] sm:$0xff] %vm586_vm0, %v711_v52 }
 0x235   : > { %v977_v8 = vsel %vm586_vm0, %v6309_v58, 0.0 }
 0x236   : > { %5305 = vpow2.f32 %v963_v23  ;;  %978 = vadd.xlane.f32.xlu1 %v977_v8 }
 0x239   : > { %v937_v25 = vpop.xlane.xlu1 %936 }
 0x23a   : > { %v955_v61 = vsub.f32 %v6270_v24, %v937_v25 }
 0x23b   : > { %v6360_v25 = vld [vmem:[#allocation3 + $0x38] sm:$0xff] }
 0x23c   : > { %v6314_v9 = vpop.eup %5305  ;;  %v965_v63 = vmul.f32 1.442695, %v955_v61  ;;  %1153 = vmatpush.msra.mxu0 %v6360_v25 }
 0x23d   : > { %v980_v1 = vsel %vm586_vm0, %v6314_v9, 0.0 }
 0x23e   : > { %5307 = vpow2.f32 %v965_v63  ;;  %981 = vadd.xlane.f32.xlu0 %v980_v1  ;;  %v6371_v1 = vld [vmem:[#allocation3 + $0x28] sm:$0xff] }
 0x241   : > { %v940_v4 = vpop.xlane.xlu1 %939 }
 0x242   : > { %v956_v6 = vsub.f32 %v6274_v28, %v940_v4 }
 0x244   : > { %v6319_v11 = vpop.eup %5307  ;;  %v967_v13 = vmul.f32 1.442695, %v956_v6  ;;  %v6376_v6 = vld [vmem:[#allocation3 + $0x20] sm:$0xff] }
 0x245   : > { %v983_v14 = vsel %vm586_vm0, %v6319_v11, 0.0 }
 0x246   : > { %5309 = vpow2.f32 %v967_v13  ;;  %984 = vadd.xlane.f32.xlu1 %v983_v14 }
 0x249   : > { %v943_v17 = vpop.xlane.xlu2 %942 }
 0x24a   : > { %v957_v18 = vsub.f32 %v6278_v35, %v943_v17  ;;  %v689_v35 = vpop.f32.mrf.mxu0 }
 0x24b   : > { %v690_v36 = vadd.f32 %v5301_v32, %v689_v35 }
 0x24c   : > { %v6324_v19 = vpop.eup %5309  ;;  %v969_v20 = vmul.f32 1.442695, %v957_v18 }
 0x24d   : > { %v986_v22 = vsel %vm586_vm0, %v6324_v19, 0.0  ;;  %713 = vst.msk [vmem:[#allocation3] sm:$0xff] %vm586_vm0, %v690_v36 }
 0x24e   : > { %5311 = vpow2.f32 %v969_v20  ;;  %987 = vadd.xlane.f32.xlu2 %v986_v22 }
 0x251   : > { %v946_v39 = vpop.xlane.xlu2 %945 }
 0x252   : > { %v692_v40 = vpop.f32.mrf.mxu0  ;;  %v958_v41 = vsub.f32 %v6282_v42, %v946_v39 }
 0x253   : > { %v693_v43 = vadd.f32 %v5301_v32, %v692_v40 }
 0x254   : > { %v6328_v24 = vpop.eup %5311  ;;  %v971_v46 = vmul.f32 1.442695, %v958_v41  ;;  %v6390_v18 = vld [vmem:[#allocation3] sm:$0xff] }
 0x255   : > { %v989_v26 = vsel %vm586_vm0, %v6328_v24, 0.0  ;;  %714 = vst.msk [vmem:[#allocation3 + $0x8] sm:$0xff] %vm586_vm0, %v693_v43 }
 0x256   : > { %990 = vadd.xlane.f32.xlu0 %v989_v26 }
 0x259   : > { %v949_v27 = vpop.xlane.xlu0 %948 }
 0x25a   : > { %v959_v28 = vsub.f32 %v927_v45, %v949_v27  ;;  %v708_v45 = vadd.f32 %v5301_v32, %v707_v44  ;;  %v695_v10 = vpop.f32.mrf.mxu0 }
 0x25b   : > { %v696_v21 = vadd.f32 %v5301_v32, %v695_v10 }
 0x25c   : > { %v973_v29 = vmul.f32 1.442695, %v959_v28  ;;  %719 = vst.msk [vmem:[#allocation3 + $0x30] sm:$0xff] %vm586_vm0, %v708_v45  ;;  %v6387_v17 = vld [vmem:[#allocation3 + $0x8] sm:$0xff] }
 0x25d   : > { %715 = vst.msk [vmem:[#allocation3 + $0x10] sm:$0xff] %vm586_vm0, %v696_v21 }
 0x25e   : > { %5313 = vpow2.f32 %v973_v29 }
 0x25f   : > { %1216 = vrot.lane.b32.xlu1 %v6195_v49, %s5881_s16  ;;  %5315 = vpow2.f32 %v971_v46 }
 0x261   : > { %v952_v47 = vpop.xlane.xlu2 %951 }
 0x262   : > { %v960_v15 = vsub.f32 %v6295_v48, %v952_v47  ;;  %v698_v48 = vpop.f32.mrf.mxu0 }
 0x263   : > { %v699_v8 = vadd.f32 %v5301_v32, %v698_v48  ;;  %v6366_v61 = vld [vmem:[#allocation3 + $0x30] sm:$0xff] }
 0x264   : > { %v6334_v30 = vpop.eup %5313  ;;  %v975_v56 = vmul.f32 1.442695, %v960_v15  ;;  %1154 = vmatpush.msra.mxu0 %v6366_v61  ;;  %v6384_v14 = vld [vmem:[#allocation3 + $0x10] sm:$0xff] }
 0x265   : > { %v995_v31 = vsel %vm586_vm0, %v6334_v30, 0.0  ;;  %v6352_v42 = vpop.eup %5315  ;;  %716 = vst.msk [vmem:[#allocation3 + $0x18] sm:$0xff] %vm586_vm0, %v699_v8 }
 0x266   : > { %996 = vadd.xlane.f32.xlu2 %v995_v31  ;;  %v992_v23 = vsel %vm586_vm0, %v6352_v42, 0.0  ;;  %5317 = vpow2.f32 %v975_v56  ;;  %1155 = vmatpush.msra.mxu0 %v6371_v1 }
 0x268   : > { %1156 = vmatpush.msra.mxu0 %v6376_v6 }
 0x26a   : > { %1212 = vrot.lane.b32.xlu0 %v6203_v51, %s5881_s16 }
 0x26c   : > { %v6368_v63 = vpop.eup %5317  ;;  %v6379_v13 = vld [vmem:[#allocation3 + $0x18] sm:$0xff] }
 0x26d   : > { %v998_v4 = vsel %vm586_vm0, %v6368_v63, 0.0  ;;  %1157 = vmatpush.msra.mxu0 %v6379_v13 }
 0x26f   : > { %1158 = vmatpush.msra.mxu0 %v6384_v14 }
 0x271   : > { %1159 = vmatpush.msra.mxu0 %v6387_v17 }
 0x273   : > { %1160 = vmatpush.msra.mxu0 %v6390_v18 }
 0x27e   : > { %1214 = vrot.lane.b32.xlu2 %v6199_v50, %s5881_s16 }
 0x286   : > { %1210 = vrot.lane.b32.xlu2 %v6207_v53, %s5881_s16 }
 0x289   : > { %993 = vadd.xlane.f32.xlu1 %v992_v23 }
 0x28e   : > { %1204 = vrot.lane.b32.xlu2 %v6219_v57, %s5881_s16 }
 0x294   : > { %999 = vadd.xlane.f32.xlu0 %v998_v4 }
 0x296   : > { %1188 = vrot.lane.b32.xlu2 %v6234_v62, %s5881_s16 }
 0x29e   : > { %1194 = vrot.lane.b32.xlu2 %v6246_v3, %s5881_s16 }
 0x2a2   : > { %1208 = vrot.lane.b32.xlu1 %v6211_v54, %s5881_s16 }
 0x2a6   : > { %1196 = vrot.lane.b32.xlu2 %v6250_v5, %s5881_s16 }
 0x2a8   : > { %1206 = vrot.lane.b32.xlu0 %v6215_v55, %s5881_s16 }
 0x2a9   : > { %v979_v20 = vpop.xlane.xlu1 %978 }
 0x2aa   : > { %5319 = vrcp.f32 %v979_v20  ;;  %1202 = vrot.lane.b32.xlu1 %v6228_v60, %s5881_s16  ;;  %v1012_v29 = vand.u32 2147483648, %v979_v20  ;;  %v1010_v32 = vand.u32 2147483647, %v979_v20  ;;  %vm1006_vm3 = vweird.f32 %v979_v20 }
 0x2ac   : > { %v1013_v35 = vor.u32 1.1754944e-38, %v1012_v29  ;;  %vm1011_vm5 = vcmp.eq.f32.partialorder %v1010_v32, 8.507059e+37 }
 0x2ae   : > { %1198 = vrot.lane.b32.xlu2 %v6254_v7, %s5881_s16 }
 0x2b0   : > { %v5320_v22 = vpop.eup %5319  ;;  %1186 = vrot.lane.b32.xlu0 %v6226_v59, %s5881_s16 }
 0x2b1   : > { %v1002_v26 = vmul.f32 %v5320_v22, %v979_v20  ;;  %v982_v27 = vpop.xlane.xlu0 %981  ;;  %vm1007_vm2 = vweird.f32 %v5320_v22 }
 0x2b2   : > { %5321 = vrcp.f32 %v982_v27  ;;  %1190 = vrot.lane.b32.xlu1 %v6238_v0, %s5881_s16  ;;  %vm1008_vm4 = vmor %vm1006_vm3, %vm1007_vm2  ;;  %v1027_v43 = vand.u32 2147483648, %v982_v27  ;;  %v1025_v45 = vand.u32 2147483647, %v982_v27  ;;  %vm1021_vm7 = vweird.f32 %v982_v27 }
 0x2b3   : > { %v1003_v28 = vsub.f32 1.0, %v1002_v26 }
 0x2b4   : > { %v1028_v15 = vor.u32 1.1754944e-38, %v1027_v43  ;;  %vm1026_vm9 = vcmp.eq.f32.partialorder %v1025_v45, 8.507059e+37 }
 0x2b5   : > { %v1004_v31 = vmul.f32 %v5320_v22, %v1003_v28 }
 0x2b6   : > { %1738 = vrot.lane.b32.xlu2 %v6215_v55, %s5882_s30 }
 0x2b7   : > { %v1005_v33 = vadd.f32 %v5320_v22, %v1004_v31 }
 0x2b8   : > { %v5322_v34 = vpop.eup %5321  ;;  %1192 = vrot.lane.b32.xlu0 %v6242_v2, %s5881_s16 }
 0x2b9   : > { %v1009_v36 = vsel %vm1008_vm4, %v5320_v22, %v1005_v33  ;;  %v1017_v37 = vmul.f32 %v5322_v34, %v982_v27  ;;  %v985_v38 = vpop.xlane.xlu1 %984  ;;  %vm1022_vm6 = vweird.f32 %v5322_v34 }
 0x2ba   : > { %5323 = vrcp.f32 %v985_v38  ;;  %1748 = vrot.lane.b32.xlu1 %v6195_v49, %s5882_s30  ;;  %v1014_v39 = vsel %vm1011_vm5, %v1013_v35, %v1009_v36  ;;  %vm1023_vm8 = vmor %vm1021_vm7, %vm1022_vm6  ;;  %v1042_v23 = vand.u32 2147483648, %v985_v38  ;;  %v1040_v8 = vand.u32 2147483647, %v985_v38 }
 0x2bb   : > { %v1018_v40 = vsub.f32 1.0, %v1017_v37  ;;  %v1015_v41 = vmul.f32 %v6309_v58, %v1014_v39  ;;  %vm1036_vm11 = vweird.f32 %v985_v38 }
 0x2bc   : > { %v1043_v22 = vor.u32 1.1754944e-38, %v1042_v23  ;;  %vm1041_vm13 = vcmp.eq.f32.partialorder %v1040_v8, 8.507059e+37 }
 0x2bd   : > { %4768 = vmatmul.msk.f32.vlgmr.msra.gmra.mxu0 %vm586_vm0, %v1015_v41  ;;  %v1019_v44 = vmul.f32 %v5322_v34, %v1018_v40 }
 0x2be   : > { %1736 = vrot.lane.b32.xlu2 %v6219_v57, %s5882_s30 }
 0x2bf   : > { %v1020_v46 = vadd.f32 %v5322_v34, %v1019_v44 }
 0x2c0   : > { %v5324_v47 = vpop.eup %5323  ;;  %1746 = vrot.lane.b32.xlu0 %v6199_v50, %s5882_s30 }
 0x2c1   : > { %v1032_v10 = vmul.f32 %v5324_v47, %v985_v38  ;;  %v988_v16 = vpop.xlane.xlu2 %987  ;;  %v1024_v58 = vsel %vm1023_vm8, %v5322_v34, %v1020_v46  ;;  %vm1037_vm10 = vweird.f32 %v5324_v47 }
 0x2c2   : > { %5325 = vrcp.f32 %v988_v16  ;;  %1744 = vrot.lane.b32.xlu1 %v6203_v51, %s5882_s30  ;;  %v1029_v21 = vsel %vm1026_vm9, %v1028_v15, %v1024_v58  ;;  %vm1038_vm12 = vmor %vm1036_vm11, %vm1037_vm10  ;;  %v1057_v32 = vand.u32 2147483648, %v988_v16  ;;  %vm1051_vm15 = vweird.f32 %v988_v16 }
 0x2c3   : > { %v1033_v52 = vsub.f32 1.0, %v1032_v10  ;;  %v1030_v56 = vmul.f32 %v6314_v9, %v1029_v21 }
 0x2c4   : > { %v1058_v36 = vor.u32 1.1754944e-38, %v1057_v32 }
 0x2c5   : > { %4769 = vmatmul.msk.f32.gmra.mxu0 %vm586_vm0, %v1030_v56  ;;  %v1034_v48 = vmul.f32 %v5324_v47, %v1033_v52 }
 0x2c6   : > { %2209 = vrot.lane.b32.xlu2 %v6207_v53, %s5883_s28 }
 0x2c7   : > { %v1035_v4 = vadd.f32 %v5324_v47, %v1034_v48 }
 0x2c8   : > { %v5326_v20 = vpop.eup %5325  ;;  %1742 = vrot.lane.b32.xlu0 %v6207_v53, %s5882_s30  ;;  %v1055_v53 = vand.u32 2147483647, %v988_v16 }
 0x2c9   : > { %v1047_v26 = vmul.f32 %v5326_v20, %v988_v16  ;;  %v991_v9 = vpop.xlane.xlu0 %990  ;;  %v1039_v27 = vsel %vm1038_vm12, %v5324_v47, %v1035_v4  ;;  %vm1052_vm14 = vweird.f32 %v5326_v20 }
 0x2ca   : > { %5327 = vrcp.f32 %v991_v9  ;;  %1740 = vrot.lane.b32.xlu1 %v6211_v54, %s5882_s30  ;;  %v1044_v28 = vsel %vm1041_vm13, %v1043_v22, %v1039_v27  ;;  %vm1053_vm2 = vmor %vm1051_vm15, %vm1052_vm14  ;;  %vm1056_vm3 = vcmp.eq.f32.partialorder %v1055_v53, 8.507059e+37  ;;  %v1072_v41 = vand.u32 2147483648, %v991_v9 }
 0x2cb   : > { %v1048_v29 = vsub.f32 1.0, %v1047_v26  ;;  %v1045_v31 = vmul.f32 %v6319_v11, %v1044_v28  ;;  %vm1066_vm5 = vweird.f32 %v991_v9 }
 0x2cd   : > { %4770 = vmatmul.msk.f32.gmra.mxu0 %vm586_vm0, %v1045_v31  ;;  %v1049_v33 = vmul.f32 %v5326_v20, %v1048_v29 }
 0x2ce   : > { %2205 = vrot.lane.b32.xlu2 %v6215_v55, %s5883_s28 }
 0x2cf   : > { %v1050_v34 = vadd.f32 %v5326_v20, %v1049_v33 }
 0x2d0   : > { %v5328_v35 = vpop.eup %5327  ;;  %2215 = vrot.lane.b32.xlu0 %v6195_v49, %s5883_s28  ;;  %v1070_v49 = vand.u32 2147483647, %v991_v9 }
 0x2d1   : > { %v1062_v37 = vmul.f32 %v5328_v35, %v991_v9  ;;  %v1217_v38 = vpop.permute.xlu1 %1216  ;;  %v1054_v11 = vsel %vm1053_vm2, %v5326_v20, %v1050_v34  ;;  %vm1067_vm4 = vweird.f32 %v5328_v35 }
 0x2d2   : > { %4776 = vmatpush.xpose.msk.msrb.mxu1 %vm831_vm1, %v1217_v38  ;;  %2213 = vrot.lane.b32.xlu1 %v6199_v50, %s5883_s28  ;;  %v1059_v39 = vsel %vm1056_vm3, %v1058_v36, %v1054_v11  ;;  %vm1068_vm6 = vmor %vm1066_vm5, %vm1067_vm4  ;;  %v1073_v50 = vor.u32 1.1754944e-38, %v1072_v41  ;;  %vm1071_vm7 = vcmp.eq.f32.partialorder %v1070_v49, 8.507059e+37 }
 0x2d3   : > { %v1063_v40 = vsub.f32 1.0, %v1062_v37  ;;  %v1060_v55 = vmul.f32 %v6324_v19, %v1059_v39 }
 0x2d5   : > { %4771 = vmatmul.msk.f32.gmra.mxu0 %vm586_vm0, %v1060_v55  ;;  %v1064_v43 = vmul.f32 %v5328_v35, %v1063_v40 }
 0x2d6   : > { %2201 = vrot.lane.b32.xlu2 %v6228_v60, %s5883_s28 }
 0x2d7   : > { %v1065_v44 = vadd.f32 %v5328_v35, %v1064_v43 }
 0x2d8   : > { %1200 = vrot.lane.b32.xlu0 %v6258_v12, %s5881_s16 }
 0x2d9   : > { %v6446_v45 = vpop.xlane.xlu2 %996  ;;  %v1069_v46 = vsel %vm1068_vm6, %v5328_v35, %v1065_v44  ;;  %v823_v44 = vld [vmem:[#allocation13] sm:$0xff] }
 0x2da   : > { %2211 = vrot.lane.b32.xlu1 %v6203_v51, %s5883_s28  ;;  %v1074_v19 = vsel %vm1071_vm7, %v1073_v50, %v1069_v46  ;;  %5329 = vrcp.f32 %v6446_v45  ;;  %v1102_v28 = vand.u32 2147483648, %v6446_v45  ;;  %vm1096_vm13 = vweird.f32 %v6446_v45  ;;  %1692 = vmatpush.msrb.mxu0 %v823_v44 }
 0x2db   : > { %v1075_v47 = vmul.f32 %v6328_v24, %v1074_v19  ;;  %v1100_v32 = vand.u32 2147483647, %v6446_v45 }
 0x2dc   : > { %v1213_v10 = vpop.permute.xlu0 %1212  ;;  %v1103_v35 = vor.u32 1.1754944e-38, %v1102_v28 }
 0x2dd   : > { %4772 = vmatmul.msk.f32.gmra.mxu0 %vm586_vm0, %v1075_v47  ;;  %vm1101_vm15 = vcmp.eq.f32.partialorder %v1100_v32, 8.507059e+37 }
 0x2de   : > { %2187 = vrot.lane.b32.xlu2 %v6234_v62, %s5883_s28 }
 0x2e0   : > { %1734 = vrot.lane.b32.xlu0 %v6228_v60, %s5882_s30 }
 0x2e1   : > { %v1215_v15 = vpop.permute.xlu2 %1214 }
 0x2e2   : > { %1718 = vrot.lane.b32.xlu1 %v6226_v59, %s5882_s30  ;;  %4777 = vmatpush.xpose.msk.msrb.mxu1 %vm831_vm1, %v1215_v15 }
 0x2e6   : > { %1726 = vrot.lane.b32.xlu2 %v6246_v3, %s5882_s30  ;;  %4778 = vmatpush.xpose.msk.msrb.mxu1 %vm831_vm1, %v1213_v10 }
 0x2e8   : > { %2207 = vrot.lane.b32.xlu0 %v6211_v54, %s5883_s28  ;;  %v5330_v54 = vpop.eup %5329 }
 0x2e9   : > { %v1211_v51 = vpop.permute.xlu2 %1210  ;;  %v1092_v24 = vmul.f32 %v5330_v54, %v6446_v45  ;;  %vm1097_vm12 = vweird.f32 %v5330_v54 }
 0x2ea   : > { %1720 = vrot.lane.b32.xlu1 %v6234_v62, %s5882_s30  ;;  %4779 = vmatpush.xpose.msk.msrb.mxu1 %vm831_vm1, %v1211_v51  ;;  %vm1098_vm14 = vmor %vm1096_vm13, %vm1097_vm12 }
 0x2eb   : > { %v1093_v16 = vsub.f32 1.0, %v1092_v24 }
 0x2ed   : > { %v1094_v23 = vmul.f32 %v5330_v54, %v1093_v16 }
 0x2ee   : > { %2193 = vrot.lane.b32.xlu2 %v6246_v3, %s5883_s28 }
 0x2ef   : > { %v1095_v9 = vadd.f32 %v5330_v54, %v1094_v23 }
 0x2f0   : > { %2203 = vrot.lane.b32.xlu0 %v6219_v57, %s5883_s28 }
 0x2f1   : > { %v1205_v4 = vpop.permute.xlu2 %1204  ;;  %v1099_v53 = vsel %vm1098_vm14, %v5330_v54, %v1095_v9 }
 0x2f2   : > { %2185 = vrot.lane.b32.xlu1 %v6226_v59, %s5883_s28  ;;  %v1104_v36 = vsel %vm1101_vm15, %v1103_v35, %v1099_v53 }
 0x2f3   : > { %v1105_v40 = vmul.f32 %v6334_v30, %v1104_v36 }
 0x2f6   : > { %1732 = vrot.lane.b32.xlu2 %v6258_v12, %s5882_s30 }
 0x2f8   : > { %1722 = vrot.lane.b32.xlu0 %v6238_v0, %s5882_s30 }
 0x2f9   : > { %v1189_v37 = vpop.permute.xlu2 %1188 }
 0x2fa   : > { %1724 = vrot.lane.b32.xlu1 %v6242_v2, %s5882_s30 }
 0x2fc   : > { %v994_v60 = vpop.xlane.xlu1 %993 }
 0x2fd   : > { %5331 = vrcp.f32 %v994_v60  ;;  %v1087_v56 = vand.u32 2147483648, %v994_v60  ;;  %v1085_v8 = vand.u32 2147483647, %v994_v60  ;;  %vm1081_vm9 = vweird.f32 %v994_v60 }
 0x2ff   : > { %v1088_v22 = vor.u32 1.1754944e-38, %v1087_v56  ;;  %vm1086_vm11 = vcmp.eq.f32.partialorder %v1085_v8, 8.507059e+37 }
 0x300   : > { %2189 = vrot.lane.b32.xlu0 %v6238_v0, %s5883_s28 }
 0x301   : > { %v1195_v46 = vpop.permute.xlu2 %1194 }
 0x302   : > { %2191 = vrot.lane.b32.xlu1 %v6242_v2, %s5883_s28 }
 0x303   : > { %v5332_v57 = vpop.eup %5331 }
 0x304   : > { %v1077_v58 = vmul.f32 %v5332_v57, %v994_v60  ;;  %vm1082_vm8 = vweird.f32 %v5332_v57 }
 0x305   : > { %vm1083_vm10 = vmor %vm1081_vm9, %vm1082_vm8 }
 0x306   : > { %v1078_v21 = vsub.f32 1.0, %v1077_v58 }
 0x307   : > { %v1000_v52 = vpop.xlane.xlu0 %999 }
 0x308   : > { %5333 = vrcp.f32 %v1000_v52  ;;  %1728 = vrot.lane.b32.xlu0 %v6250_v5, %s5882_s30  ;;  %v1079_v48 = vmul.f32 %v5332_v57, %v1078_v21  ;;  %v1117_v39 = vand.u32 2147483648, %v1000_v52  ;;  %vm1111_vm3 = vweird.f32 %v1000_v52 }
 0x309   : > { %v1115_v55 = vand.u32 2147483647, %v1000_v52  ;;  %v1197_v15 = vpop.permute.xlu2 %1196 }
 0x30a   : > { %1730 = vrot.lane.b32.xlu1 %v6254_v7, %s5882_s30  ;;  %v1080_v20 = vadd.f32 %v5332_v57, %v1079_v48  ;;  %v1118_v43 = vor.u32 1.1754944e-38, %v1117_v39 }
 0x30b   : > { %vm1116_vm5 = vcmp.eq.f32.partialorder %v1115_v55, 8.507059e+37 }
 0x30c   : > { %v1084_v26 = vsel %vm1083_vm10, %v5332_v57, %v1080_v20 }
 0x30d   : > { %v1089_v27 = vsel %vm1086_vm11, %v1088_v22, %v1084_v26 }
 0x30e   : > { %v5334_v29 = vpop.eup %5333  ;;  %v1090_v31 = vmul.f32 %v6352_v42, %v1089_v27 }
 0x30f   : > { %v1107_v33 = vmul.f32 %v5334_v29, %v1000_v52  ;;  %vm1112_vm2 = vweird.f32 %v5334_v29 }
 0x310   : > { %2195 = vrot.lane.b32.xlu0 %v6250_v5, %s5883_s28  ;;  %4773 = vmatmul.msk.f32.gmra.mxu0 %vm586_vm0, %v1090_v31  ;;  %vm1113_vm4 = vmor %vm1111_vm3, %vm1112_vm2 }
 0x311   : > { %v1108_v34 = vsub.f32 1.0, %v1107_v33  ;;  %v1199_v54 = vpop.permute.xlu2 %1198 }
 0x312   : > { %2197 = vrot.lane.b32.xlu1 %v6254_v7, %s5883_s28 }
 0x313   : > { %v1109_v42 = vmul.f32 %v5334_v29, %v1108_v34 }
 0x314   : > { %v1209_v38 = vpop.permute.xlu1 %1208 }
 0x315   : > { %4780 = vmatpush.xpose.msk.msrb.mxu1 %vm831_vm1, %v1209_v38  ;;  %v1110_v11 = vadd.f32 %v5334_v29, %v1109_v42 }
 0x317   : > { %v1114_v41 = vsel %vm1113_vm4, %v5334_v29, %v1110_v11 }
 0x318   : > { %2199 = vrot.lane.b32.xlu0 %v6258_v12, %s5883_s28  ;;  %4774 = vmatmul.msk.f32.gmra.mxu0 %vm586_vm0, %v1105_v40  ;;  %v1119_v50 = vsel %vm1116_vm5, %v1118_v43, %v1114_v41 }
 0x319   : > { %v1120_v30 = vmul.f32 %v6368_v63, %v1119_v50  ;;  %v1739_v16 = vpop.permute.xlu2 %1738 }
 0x31a   : > { %v1207_v49 = vpop.permute.xlu0 %1206 }
 0x31b   : > { %4781 = vmatpush.xpose.msk.msrb.mxu1 %vm831_vm1, %v1207_v49 }
 0x31c   : > { %v1203_v45 = vpop.permute.xlu1 %1202 }
 0x31f   : > { %4782 = vmatpush.xpose.msk.msrb.mxu1 %vm831_vm1, %v1205_v4 }
 0x320   : > { %4775 = vmatmul.msk.f32.gmra.mxu0 %vm586_vm0, %v1120_v30 }
 0x321   : > { %v1737_v23 = vpop.permute.xlu2 %1736 }
 0x322   : > { %v1187_v19 = vpop.permute.xlu0 %1186 }
 0x323   : > { %4783 = vmatpush.xpose.msk.msrb.mxu1 %vm831_vm1, %v1203_v45 }
 0x324   : > { %v1191_v47 = vpop.permute.xlu1 %1190 }
 0x326   : > { %4784 = vmatmul.msk.f32.vlgmr.msrb.gmra.mxu1 %vm831_vm1, %v1187_v19 }
 0x329   : > { %v2210_v20 = vpop.permute.xlu2 %2209 }
 0x32a   : > { %v1193_v10 = vpop.permute.xlu0 %1192 }
 0x32c   : > { %v1749_v51 = vpop.permute.xlu1 %1748 }
 0x32d   : > { %4816 = vmatpush.xpose.msk.msra.mxu1 %vm831_vm1, %v1749_v51 }
 0x32e   : > { %4785 = vmatmul.msk.f32.gmra.mxu1 %vm831_vm1, %v1189_v37 }
 0x331   : > { %v2206_v28 = vpop.permute.xlu2 %2205 }
 0x332   : > { %v1747_v60 = vpop.permute.xlu0 %1746 }
 0x333   : > { %4817 = vmatpush.xpose.msk.msra.mxu1 %vm831_vm1, %v1747_v60 }
 0x334   : > { %v1745_v63 = vpop.permute.xlu1 %1744 }
 0x336   : > { %4786 = vmatmul.msk.f32.gmra.mxu1 %vm831_vm1, %v1191_v47 }
 0x337   : > { %4818 = vmatpush.xpose.msk.msra.mxu1 %vm831_vm1, %v1745_v63 }
 0x339   : > { %v2202_v32 = vpop.permute.xlu2 %2201 }
 0x33a   : > { %v1162_v24 = vpop.f32.mrf.mxu0  ;;  %v1743_v57 = vpop.permute.xlu0 %1742 }
 0x33b   : > { %4808 = vmatmul.msk.f32.vlgmr.msrb.gmra.mxu0 %vm831_vm1, %v1162_v24  ;;  %4819 = vmatpush.xpose.msk.msra.mxu1 %vm831_vm1, %v1743_v57 }
 0x33c   : > { %v1741_v58 = vpop.permute.xlu1 %1740 }
 0x33e   : > { %4787 = vmatmul.msk.f32.gmra.mxu1 %vm831_vm1, %v1193_v10 }
 0x33f   : > { %4820 = vmatpush.xpose.msk.msra.mxu1 %vm831_vm1, %v1741_v58 }
 0x341   : > { %v2188_v35 = vpop.permute.xlu2 %2187 }
 0x342   : > { %v1165_v21 = vpop.f32.mrf.mxu0  ;;  %v2216_v52 = vpop.permute.xlu0 %2215 }
 0x343   : > { %4809 = vmatmul.msk.f32.gmra.mxu0 %vm831_vm1, %v1165_v21  ;;  %4821 = vmatpush.xpose.msk.msra.mxu1 %vm831_vm1, %v1739_v16 }
 0x344   : > { %4848 = vmatpush.xpose.msk.msra.mxu0 %vm831_vm1, %v2216_v52  ;;  %v2214_v56 = vpop.permute.xlu1 %2213 }
 0x346   : > { %4788 = vmatmul.msk.f32.gmra.mxu1 %vm831_vm1, %v1195_v46 }
 0x347   : > { %4822 = vmatpush.xpose.msk.msra.mxu1 %vm831_vm1, %v1737_v23 }
 0x348   : > { %4849 = vmatpush.xpose.msk.msra.mxu0 %vm831_vm1, %v2214_v56 }
 0x349   : > { %v1727_v37 = vpop.permute.xlu2 %1726 }
 0x34a   : > { %v1168_v48 = vpop.f32.mrf.mxu0  ;;  %v1201_v8 = vpop.permute.xlu0 %1200 }
 0x34b   : > { %4810 = vmatmul.msk.f32.gmra.mxu0 %vm831_vm1, %v1168_v48 }
 0x34c   : > { %v2212_v4 = vpop.permute.xlu1 %2211 }
 0x34d   : > { %4850 = vmatpush.xpose.msk.msra.mxu0 %vm831_vm1, %v2212_v4 }
 0x34e   : > { %4789 = vmatmul.msk.f32.gmra.mxu1 %vm831_vm1, %v1197_v15 }
 0x351   : > { %4851 = vmatpush.xpose.msk.msra.mxu0 %vm831_vm1, %v2210_v20  ;;  %v2194_v40 = vpop.permute.xlu2 %2193 }
 0x352   : > { %v1735_v22 = vpop.permute.xlu0 %1734  ;;  %v1171_v26 = vpop.f32.mrf.mxu0 }
 0x353   : > { %4811 = vmatmul.msk.f32.gmra.mxu0 %vm831_vm1, %v1171_v26  ;;  %4823 = vmatpush.xpose.msk.msra.mxu1 %vm831_vm1, %v1735_v22 }
 0x354   : > { %v1719_v29 = vpop.permute.xlu1 %1718 }
 0x356   : > { %4790 = vmatmul.msk.f32.gmra.mxu1 %vm831_vm1, %v1199_v54 }
 0x359   : > { %v1733_v43 = vpop.permute.xlu2 %1732 }
 0x35a   : > { %v2208_v9 = vpop.permute.xlu0 %2207  ;;  %v1174_v27 = vpop.f32.mrf.mxu0 }
 0x35b   : > { %4812 = vmatmul.msk.f32.gmra.mxu0 %vm831_vm1, %v1174_v27  ;;  %v5159_v27 = vpack.i.bf16 %v6366_v61, %v6360_v25 }
 0x35c   : > { %4852 = vmatpush.xpose.msk.msra.mxu0 %vm831_vm1, %v2208_v9  ;;  %v1721_v33 = vpop.permute.xlu1 %1720 }
 0x35e   : > { %4791 = vmatmul.msk.f32.gmra.mxu1 %vm831_vm1, %v1201_v8 }
 0x360   : > { %4853 = vmatpush.xpose.msk.msra.mxu0 %vm831_vm1, %v2206_v28 }
 0x362   : > { %v2204_v31 = vpop.permute.xlu0 %2203 }
 0x364   : > { %4854 = vmatpush.xpose.msk.msra.mxu0 %vm831_vm1, %v2204_v31  ;;  %v2186_v53 = vpop.permute.xlu1 %2185 }
 0x366   : > { %4824 = vmatmul.msk.f32.vlgmr.msra.gmra.mxu1 %vm831_vm1, %v1719_v29 }
 0x368   : > { %4855 = vmatpush.xpose.msk.msra.mxu0 %vm831_vm1, %v2202_v32 }
 0x36a   : > { %v1723_v34 = vpop.permute.xlu0 %1722 }
 0x36c   : > { %v1725_v36 = vpop.permute.xlu1 %1724 }
 0x36e   : > { %4825 = vmatmul.msk.f32.gmra.mxu1 %vm831_vm1, %v1721_v33 }
 0x372   : > { %v2190_v42 = vpop.permute.xlu0 %2189 }
 0x374   : > { %v2192_v38 = vpop.permute.xlu1 %2191 }
 0x376   : > { %4826 = vmatmul.msk.f32.gmra.mxu1 %vm831_vm1, %v1723_v34 }
 0x37a   : > { %v1729_v11 = vpop.permute.xlu0 %1728 }
 0x37c   : > { %v1731_v55 = vpop.permute.xlu1 %1730 }
 0x37e   : > { %4827 = vmatmul.msk.f32.gmra.mxu1 %vm831_vm1, %v1725_v36 }
 0x382   : > { %v2196_v21 = vpop.permute.xlu0 %2195 }
 0x384   : > { %v2198_v48 = vpop.permute.xlu1 %2197 }
 0x386   : > { %4828 = vmatmul.msk.f32.gmra.mxu1 %vm831_vm1, %v1727_v37  ;;  %v5169_v37 = vpack.i.bf16 %v6384_v14, %v6379_v13 }
 0x38a   : > { %v2200_v26 = vpop.permute.xlu0 %2199 }
 0x38d   : > { %v1177_v39 = vpop.f32.mrf.mxu0 }
 0x38e   : > { %4813 = vmatmul.msk.f32.gmra.mxu0 %vm831_vm1, %v1177_v39  ;;  %4829 = vmatmul.msk.f32.gmra.mxu1 %vm831_vm1, %v1729_v11  ;;  %v5174_v39 = vpack.i.bf16 %v6390_v18, %v6387_v17 }
 0x395   : > { %v1180_v41 = vpop.f32.mrf.mxu0 }
 0x396   : > { %4814 = vmatmul.msk.f32.gmra.mxu0 %vm831_vm1, %v1180_v41  ;;  %4830 = vmatmul.msk.f32.gmra.mxu1 %vm831_vm1, %v1731_v55 }
 0x39d   : > { %v1183_v49 = vpop.f32.mrf.mxu0 }
 0x39e   : > { %4815 = vmatmul.msk.f32.gmra.mxu0 %vm831_vm1, %v1183_v49  ;;  %4831 = vmatmul.msk.f32.gmra.mxu1 %vm831_vm1, %v1733_v43 }
 0x3a3   : > { %v1267_v44 = vpop.f32.mrf.mxu1 }
 0x3a4   : > { %v6548_v50 = vmul.f32 0.35355338, %v1267_v44 }
 0x3a6   : > { %4856 = vmatmul.msk.f32.vlgmr.msra.gmra.mxu0 %vm831_vm1, %v2186_v53  ;;  %v1299_v45 = vsel %vm586_vm0, %v6548_v50, -inf }
 0x3a7   : > { %1300 = vmax.xlane.f32.xlu2 %v1299_v45 }
 0x3ab   : > { %v1270_v46 = vpop.f32.mrf.mxu1 }
 0x3ac   : > { %v6553_v30 = vmul.f32 0.35355338, %v1270_v46 }
 0x3ae   : > { %4857 = vmatmul.msk.f32.gmra.mxu0 %vm831_vm1, %v2188_v35  ;;  %v1302_v19 = vsel %vm586_vm0, %v6553_v30, -inf }
 0x3af   : > { %1303 = vmax.xlane.f32.xlu1 %v1302_v19 }
 0x3b3   : > { %v1273_v47 = vpop.f32.mrf.mxu1 }
 0x3b4   : > { %v6558_v15 = vmul.f32 0.35355338, %v1273_v47 }
 0x3b6   : > { %4858 = vmatmul.msk.f32.gmra.mxu0 %vm831_vm1, %v2190_v42  ;;  %v1305_v10 = vsel %vm586_vm0, %v6558_v15, -inf  ;;  %v5164_v42 = vpack.i.bf16 %v6376_v6, %v6371_v1 }
 0x3b7   : > { %1306 = vmax.xlane.f32.xlu0 %v1305_v10 }
 0x3b8   : > { %v6583_v4 = vpop.f32.mrf.mxu0 }
 0x3b9   : > { %8368 = vst [vmem:[#allocation29_spill] sm:$0xff] %v6583_v4 }
 0x3bb   : > { %v1276_v51 = vpop.f32.mrf.mxu1 }
 0x3bc   : > { %v6563_v54 = vmul.f32 0.35355338, %v1276_v51 }
 0x3be   : > { %4859 = vmatmul.msk.f32.gmra.mxu0 %vm831_vm1, %v2192_v38  ;;  %v1308_v60 = vsel %vm586_vm0, %v6563_v54, -inf }
 0x3bf   : > { %1309 = vmax.xlane.f32.xlu2 %v1308_v60 }
 0x3c0   : > { %v6595_v31 = vpop.f32.mrf.mxu0 }
 0x3c1   : > { %8369 = vst [vmem:[#allocation30_spill] sm:$0xff] %v6595_v31 }
 0x3c3   : > { %v1279_v63 = vpop.f32.mrf.mxu1 }
 0x3c4   : > { %v6568_v24 = vmul.f32 0.35355338, %v1279_v63 }
 0x3c6   : > { %4860 = vmatmul.msk.f32.gmra.mxu0 %vm831_vm1, %v2194_v40  ;;  %v1311_v57 = vsel %vm586_vm0, %v6568_v24, -inf }
 0x3c7   : > { %1312 = vmax.xlane.f32.xlu1 %v1311_v57 }
 0x3c8   : > { %v6604_v61 = vpop.f32.mrf.mxu0 }
 0x3c9   : > { %8370 = vst [vmem:[#allocation31_spill] sm:$0xff] %v6604_v61 }
 0x3cb   : > { %v1282_v16 = vpop.f32.mrf.mxu1 }
 0x3cc   : > { %v6573_v58 = vmul.f32 0.35355338, %v1282_v16 }
 0x3ce   : > { %4861 = vmatmul.msk.f32.gmra.mxu0 %vm831_vm1, %v2196_v21  ;;  %v1314_v52 = vsel %vm586_vm0, %v6573_v58, -inf }
 0x3cf   : > { %1315 = vmax.xlane.f32.xlu0 %v1314_v52 }
 0x3d0   : > { %v6606_v35 = vpop.f32.mrf.mxu0 }
 0x3d1   : > { %8371 = vst [vmem:[#allocation32_spill] sm:$0xff] %v6606_v35 }
 0x3d3   : > { %v1285_v56 = vpop.f32.mrf.mxu1 }
 0x3d4   : > { %v6578_v23 = vmul.f32 0.35355338, %v1285_v56 }
 0x3d6   : > { %4862 = vmatmul.msk.f32.gmra.mxu0 %vm831_vm1, %v2198_v48  ;;  %v1317_v8 = vsel %vm586_vm0, %v6578_v23, -inf }
 0x3d7   : > { %1318 = vmax.xlane.f32.xlu2 %v1317_v8 }
 0x3d8   : > { %v6613_v38 = vpop.f32.mrf.mxu0 }
 0x3d9   : > { %8372 = vst [vmem:[#allocation33_spill] sm:$0xff] %v6613_v38 }
 0x3db   : > { %v1288_v20 = vpop.f32.mrf.mxu1 }
 0x3dc   : > { %v6585_v22 = vmul.f32 0.35355338, %v1288_v20 }
 0x3de   : > { %4863 = vmatmul.msk.f32.gmra.mxu0 %vm831_vm1, %v2200_v26  ;;  %v1320_v9 = vsel %vm586_vm0, %v6585_v22, -inf }
 0x3df   : > { %1321 = vmax.xlane.f32.xlu0 %v1320_v9 }
 0x3e0   : > { %5160 = vrot.lane.b32.xlu1 %v5159_v27, %s5881_s16 }
 0x3e3   : > { %v1799_v28 = vpop.f32.mrf.mxu1 }
 0x3e4   : > { %v6593_v29 = vmul.f32 0.35355338, %v1799_v28 }
 0x3e6   : > { %v1831_v32 = vsel %vm586_vm0, %v6593_v29, -inf }
 0x3e7   : > { %1832 = vmax.xlane.f32.xlu2 %v1831_v32 }
 0x3e8   : > { %5200 = vrot.lane.b32.xlu1 %v5159_v27, %s5883_s28 }
 0x3eb   : > { %v1802_v33 = vpop.f32.mrf.mxu1 }
 0x3ec   : > { %v6600_v53 = vmul.f32 0.35355338, %v1802_v33 }
 0x3ee   : > { %v1834_v25 = vsel %vm586_vm0, %v6600_v53, -inf }
 0x3ef   : > { %1835 = vmax.xlane.f32.xlu0 %v1834_v25 }
 0x3f3   : > { %v1805_v34 = vpop.f32.mrf.mxu1 }
 0x3f4   : > { %v6622_v6 = vmul.f32 0.35355338, %v1805_v34 }
 0x3f6   : > { %v1837_v13 = vsel %vm586_vm0, %v6622_v6, -inf }
 0x3fb   : > { %v1808_v36 = vpop.f32.mrf.mxu1 }
 0x3fc   : > { %v6658_v26 = vmul.f32 0.35355338, %v1808_v36 }
 0x3fe   : > { %v1840_v28 = vsel %vm586_vm0, %v6658_v26, -inf }
 0x3ff   : > { %5165 = vrot.lane.b32.xlu2 %v5164_v42, %s5881_s16 }
 0x403   : > { %5170 = vrot.lane.b32.xlu0 %v5169_v37, %s5881_s16  ;;  %v1811_v11 = vpop.f32.mrf.mxu1 }
 0x404   : > { %v6669_v34 = vmul.f32 0.35355338, %v1811_v11 }
 0x407   : > { %5175 = vrot.lane.b32.xlu2 %v5174_v39, %s5881_s16  ;;  %s5791_s16 = scalar_lea.hbm %s5790_s17, 64 }
 0x408   : > { %p5792_p1 = scmp.ne.s32.totalorder %s5790_s17, %s5791_s16 }
 0x40a   : > { %p5793_p4 = pnand %p5792_p1, %p6064_p7 }
 0x40b   : > { %v6619_v40 = vpop.f32.mrf.mxu0  ;;  %5180 = vrot.lane.b32.xlu0 %v5159_v27, %s5882_s30  ;;  %v1814_v1 = vpop.f32.mrf.mxu1 }
 0x40c   : > { %8373 = vst [vmem:[#allocation34_spill] sm:$0xff] %v6619_v40  ;;  %v6679_v11 = vmul.f32 0.35355338, %v1814_v1  ;;  %p5794_p8 = pneg %p5793_p4 }
 0x40f   : > { %5185 = vrot.lane.b32.xlu2 %v5164_v42, %s5882_s30 }
 0x412   : > { %1838 = vmax.xlane.f32.xlu1 %v1837_v13 }
 0x413   : > { %5190 = vrot.lane.b32.xlu0 %v5169_v37, %s5882_s30  ;;  %v1817_v14 = vpop.f32.mrf.mxu1  ;;  %v6628_v55 = vpop.f32.mrf.mxu0  ;;  %v1843_v37 = vsel %vm586_vm0, %v6669_v34, -inf }
 0x414   : > { %8374 = vst [vmem:[#allocation35_spill] sm:$0xff] %v6628_v55  ;;  %v6630_v17 = vmul.f32 0.35355338, %v1817_v14 }
 0x416   : > { %v1849_v18 = vsel %vm586_vm0, %v6630_v17, -inf }
 0x41a   : > { %1850 = vmax.xlane.f32.xlu1 %v1849_v18  ;;  %v1301_v41 = vpop.xlane.xlu2 %1300 }
 0x41b   : > { %v1323_v43 = vsub.f32 %v6548_v50, %v1301_v41  ;;  %5195 = vrot.lane.b32.xlu0 %v5174_v39, %s5882_s30  ;;  %v1820_v49 = vpop.f32.mrf.mxu1  ;;  %v6638_v46 = vpop.f32.mrf.mxu0  ;;  %s5795_s30 = scalar_lea.hbm %s8331_s12, 128 }
 0x41c   : > { %v6636_v45 = vmul.f32 0.35355338, %v1820_v49  ;;  %8375 = vst [vmem:[#allocation36_spill] sm:$0xff] %v6638_v46  ;;  %p5797_p12 = scmp.lt.s32.totalorder %s5795_s30, %s5791_s16 }
 0x41d   : > { %v1331_v44 = vmul.f32 1.442695, %v1323_v43 }
 0x41e   : > { %v1852_v19 = vsel %vm586_vm0, %v6636_v45, -inf  ;;  %p5798_p13 = por %p5797_p12, %p5796_p10 }
 0x41f   : > { %5335 = vpow2.f32 %v1331_v44 }
 0x420   : > { %p5799_p0 = pnand %p5798_p13, %p5794_p8 }
 0x422   : > { %1853 = vmax.xlane.f32.xlu1 %v1852_v19  ;;  %v1304_v57 = vpop.xlane.xlu1 %1303  ;;  %v1846_v19 = vsel %vm586_vm0, %v6679_v11, -inf }
 0x423   : > { %v6644_v10 = vpop.f32.mrf.mxu0  ;;  %v1324_v42 = vsub.f32 %v6553_v30, %v1304_v57 }
 0x425   : > { %v6642_v47 = vpop.eup %5335  ;;  %v1333_v18 = vmul.f32 1.442695, %v1324_v42 }
 0x426   : > { %v1347_v50 = vsel %vm586_vm0, %v6642_v47, 0.0 }
 0x42a   : > { %v1307_v51 = vpop.xlane.xlu0 %1306  ;;  %1348 = vadd.xlane.f32.xlu1 %v1347_v50 }
 0x42b   : > { %v1325_v60 = vsub.f32 %v6558_v15, %v1307_v51  ;;  %v6649_v16 = vpop.f32.mrf.mxu0 }
 0x42d   : > { %v1335_v63 = vmul.f32 1.442695, %v1325_v60 }
 0x42f   : > { %5337 = vpow2.f32 %v1335_v63 }
 0x432   : > { %v1310_v15 = vpop.xlane.xlu2 %1309 }
 0x433   : > { %v6656_v8 = vpop.f32.mrf.mxu0 }
 0x435   : > { %v6651_v21 = vpop.eup %5337 }
 0x436   : > { %v1353_v52 = vsel %vm586_vm0, %v6651_v21, 0.0 }
 0x437   : > { %1354 = vadd.xlane.f32.xlu1 %v1353_v52 }
 0x43a   : > { %v1313_v56 = vpop.xlane.xlu1 %1312 }
 0x43b   : > { %v1327_v48 = vsub.f32 %v6568_v24, %v1313_v56  ;;  %v6667_v25 = vpop.f32.mrf.mxu0 }
 0x43d   : > { %v1339_v20 = vmul.f32 1.442695, %v1327_v48 }
 0x43f   : > { %5339 = vpow2.f32 %v1339_v20 }
 0x442   : > { %v1316_v9 = vpop.xlane.xlu0 %1315 }
 0x443   : > { %v1328_v27 = vsub.f32 %v6573_v58, %v1316_v9  ;;  %v6681_v41 = vpop.f32.mrf.mxu0 }
 0x445   : > { %v6663_v32 = vpop.eup %5339  ;;  %v1341_v33 = vmul.f32 1.442695, %v1328_v27  ;;  %1841 = vmax.xlane.f32.xlu0 %v1840_v28  ;;  %v6703_v27 = vmul.f32 0.35355338, %v6644_v10 }
 0x446   : > { %v1359_v24 = vsel %vm586_vm0, %v6663_v32, 0.0 }
 0x447   : > { %5341 = vpow2.f32 %v1341_v33  ;;  %1360 = vadd.xlane.f32.xlu2 %v1359_v24 }
 0x44a   : > { %v1319_v36 = vpop.xlane.xlu2 %1318 }
 0x44b   : > { %v1329_v58 = vsub.f32 %v6578_v23, %v1319_v36  ;;  %v1326_v23 = vsub.f32 %v6563_v54, %v1310_v15  ;;  %v2281_v57 = vpop.f32.mrf.mxu0 }
 0x44d   : > { %v6675_v39 = vpop.eup %5341  ;;  %v1343_v13 = vmul.f32 1.442695, %v1329_v58  ;;  %1844 = vmax.xlane.f32.xlu0 %v1843_v37  ;;  %v1337_v63 = vmul.f32 1.442695, %v1326_v23 }
 0x44e   : > { %v1362_v14 = vsel %vm586_vm0, %v6675_v39, 0.0 }
 0x44f   : > { %5343 = vpow2.f32 %v1343_v13  ;;  %1363 = vadd.xlane.f32.xlu2 %v1362_v14  ;;  %v2298_v13 = vsel %vm586_vm0, %v6703_v27, -inf  ;;  %v6714_v14 = vmul.f32 0.35355338, %v2281_v57  ;;  %v6734_v57 = vmul.f32 0.35355338, %v6656_v8 }
 0x450   : > { %5345 = vpow2.f32 %v1333_v18 }
 0x452   : > { %v5161_v30 = vpop.permute.xlu1 %5160  ;;  %v1322_v43 = vpop.xlane.xlu0 %1321 }
 0x453   : > { %v1330_v49 = vsub.f32 %v6585_v22, %v1322_v43  ;;  %v5162_v44 = vunpack.i.l.bf16 %v5161_v30  ;;  %v5163_v1 = vunpack.i.h.bf16 %v5161_v30  ;;  %v6708_v42 = vpop.f32.mrf.mxu0  ;;  %v2313_v43 = vsel %vm586_vm0, %v6714_v14, -inf }
 0x455   : > { %v6687_v50 = vpop.eup %5343  ;;  %v1345_v51 = vmul.f32 1.442695, %v1330_v49  ;;  %1555 = vmatpush.msrb.mxu2 %v5162_v44  ;;  %1847 = vmax.xlane.f32.xlu0 %v1846_v19  ;;  %v6725_v49 = vmul.f32 0.35355338, %v6649_v16 }
 0x456   : > { %v1365_v60 = vsel %vm586_vm0, %v6687_v50, 0.0  ;;  %v6691_v54 = vpop.eup %5345 }
 0x457   : > { %5347 = vpow2.f32 %v1345_v51  ;;  %1556 = vmatpush.msrb.mxu2 %v5163_v1  ;;  %1366 = vadd.xlane.f32.xlu2 %v1365_v60  ;;  %v1350_v56 = vsel %vm586_vm0, %v6691_v54, 0.0  ;;  %v2301_v1 = vsel %vm586_vm0, %v6725_v49, -inf }
 0x458   : > { %5349 = vpow2.f32 %v1337_v63 }
 0x45a   : > { %v1833_v22 = vpop.xlane.xlu2 %1832 }
 0x45b   : > { %v1855_v52 = vsub.f32 %v6593_v29, %v1833_v22  ;;  %v2287_v23 = vpop.f32.mrf.mxu0 }
 0x45c   : > { %v6727_v44 = vmul.f32 0.35355338, %v2287_v23  ;;  %v6745_v23 = vmul.f32 0.35355338, %v6681_v41 }
 0x45d   : > { %v6696_v48 = vpop.eup %5347  ;;  %1351 = vadd.xlane.f32.xlu0 %v1350_v56  ;;  %v1863_v15 = vmul.f32 1.442695, %v1855_v52  ;;  %v5201_v56 = vpop.permute.xlu1 %5200 }
 0x45e   : > { %v1368_v20 = vsel %vm586_vm0, %v6696_v48, 0.0  ;;  %v6700_v9 = vpop.eup %5349  ;;  %v2319_v60 = vsel %vm586_vm0, %v6727_v44, -inf }
 0x45f   : > { %1369 = vadd.xlane.f32.xlu2 %v1368_v20  ;;  %5351 = vpow2.f32 %v1863_v15  ;;  %v1356_v36 = vsel %vm586_vm0, %v6700_v9, 0.0 }
 0x462   : > { %v1836_v28 = vpop.xlane.xlu0 %1835  ;;  %v5166_v33 = vpop.permute.xlu2 %5165 }
 0x463   : > { %v1856_v29 = vsub.f32 %v6600_v53, %v1836_v28  ;;  %v5167_v24 = vunpack.i.l.bf16 %v5166_v33  ;;  %v5168_v37 = vunpack.i.h.bf16 %v5166_v33  ;;  %v2304_v28 = vsel %vm586_vm0, %v6734_v57, -inf }
 0x465   : > { %v1865_v58 = vmul.f32 1.442695, %v1856_v29  ;;  %1357 = vadd.xlane.f32.xlu0 %v1356_v36  ;;  %1557 = vmatpush.msrb.mxu2 %v5167_v24  ;;  %v6712_v10 = vpop.eup %5351  ;;  %v6739_v24 = vmul.f32 0.35355338, %v6667_v25 }
 0x466   : > { %v1879_v53 = vsel %vm586_vm0, %v6712_v10, 0.0 }
 0x467   : > { %5353 = vpow2.f32 %v1865_v58  ;;  %2299 = vmax.xlane.f32.xlu2 %v2298_v13  ;;  %1558 = vmatpush.msrb.mxu2 %v5168_v37 }
 0x46a   : > { %v5176_v19 = vpop.permute.xlu2 %5175 }
 0x46b   : > { %v5177_v16 = vunpack.i.l.bf16 %v5176_v19  ;;  %v5178_v52 = vunpack.i.h.bf16 %v5176_v19 }
 0x46d   : > { %v6718_v18 = vpop.eup %5353  ;;  %1880 = vadd.xlane.f32.xlu0 %v1879_v53 }
 0x46e   : > { %v1882_v30 = vsel %vm586_vm0, %v6718_v18, 0.0 }
 0x46f   : > { %1883 = vadd.xlane.f32.xlu1 %v1882_v30  ;;  %2314 = vmax.xlane.f32.xlu2 %v2313_v43  ;;  %v2307_v30 = vsel %vm586_vm0, %v6739_v24, -inf }
 0x472   : > { %v5186_v33 = vpop.permute.xlu2 %5185 }
 0x473   : > { %v5187_v8 = vunpack.i.l.bf16 %v5186_v33  ;;  %v5188_v36 = vunpack.i.h.bf16 %v5186_v33 }
 0x475   : > { %v5171_v51 = vpop.permute.xlu0 %5170 }
 0x476   : > { %v5172_v63 = vunpack.i.l.bf16 %v5171_v51  ;;  %v5173_v22 = vunpack.i.h.bf16 %v5171_v51 }
 0x477   : > { %2302 = vmax.xlane.f32.xlu1 %v2301_v1  ;;  %2320 = vmax.xlane.f32.xlu2 %v2319_v60  ;;  %v5560_v1 = vld [vmem:[#allocation3 + $0x20] sm:$0xff] }
 0x478   : > { %1559 = vmatpush.msrb.mxu2 %v5172_v63 }
 0x47a   : > { %1560 = vmatpush.msrb.mxu2 %v5173_v22  ;;  %v2310_v22 = vsel %vm586_vm0, %v6745_v23, -inf }
 0x47c   : > { %1561 = vmatpush.msrb.mxu2 %v5177_v16 }
 0x47d   : > { %v5181_v20 = vpop.permute.xlu0 %5180 }
 0x47e   : > { %v5182_v15 = vunpack.i.l.bf16 %v5181_v20  ;;  %1562 = vmatpush.msrb.mxu2 %v5178_v52  ;;  %v5183_v29 = vunpack.i.h.bf16 %v5181_v20  ;;  %v5202_v52 = vunpack.i.l.bf16 %v5201_v56 }
 0x47f   : > { %2305 = vmax.xlane.f32.xlu1 %v2304_v28  ;;  %v5203_v28 = vunpack.i.h.bf16 %v5201_v56 }
 0x480   : > { %2079 = vmatpush.msrb.mxu1 %v5182_v15  ;;  %5032 = vmatpush.msra.mxu2 %v5182_v15  ;;  %v6760_v15 = vmul.f32 0.35355338, %v6708_v42 }
 0x482   : > { %2080 = vmatpush.msrb.mxu1 %v5183_v29  ;;  %5033 = vmatpush.msra.mxu2 %v5183_v29  ;;  %v2316_v29 = vsel %vm586_vm0, %v6760_v15, -inf }
 0x484   : > { %2081 = vmatpush.msrb.mxu1 %v5187_v8  ;;  %5034 = vmatpush.msra.mxu2 %v5187_v8 }
 0x485   : > { %v5191_v58 = vpop.permute.xlu0 %5190  ;;  %v1839_v37 = vpop.xlane.xlu1 %1838 }
 0x486   : > { %v5192_v13 = vunpack.i.l.bf16 %v5191_v58  ;;  %v1857_v53 = vsub.f32 %v6622_v6, %v1839_v37  ;;  %2082 = vmatpush.msrb.mxu1 %v5188_v36  ;;  %5035 = vmatpush.msra.mxu2 %v5188_v36  ;;  %v5193_v43 = vunpack.i.h.bf16 %v5191_v58  ;;  %v5559_v6 = vld [vmem:[#allocation3 + $0x28] sm:$0xff]  ;;  %v5561_v58 = vld [vmem:[#allocation3 + $0x18] sm:$0xff]  ;;  %v5562_v37 = vld [vmem:[#allocation3 + $0x10] sm:$0xff] }
 0x487   : > { %2308 = vmax.xlane.f32.xlu1 %v2307_v30  ;;  %v6749_v60 = vpack.i.bf16 %v5560_v1, %v5559_v6 }
 0x488   : > { %v1867_v25 = vmul.f32 1.442695, %v1857_v53  ;;  %2083 = vmatpush.msrb.mxu1 %v5192_v13  ;;  %5036 = vmatpush.msra.mxu2 %v5192_v13  ;;  %v5209_v13 = vpack.i.bf16 %v5562_v37, %v5561_v58 }
 0x489   : > { %8376 = vst [vmem:[#allocation37_spill] sm:$0xff] %v6749_v60 }
 0x48a   : > { %5355 = vpow2.f32 %v1867_v25  ;;  %2084 = vmatpush.msrb.mxu1 %v5193_v43  ;;  %5037 = vmatpush.msra.mxu2 %v5193_v43 }
 0x48d   : > { %v5196_v19 = vpop.permute.xlu0 %5195  ;;  %v6747_v51 = vpop.xlane.xlu1 %1850 }
 0x48e   : > { %v5197_v63 = vunpack.i.l.bf16 %v5196_v19  ;;  %v5198_v16 = vunpack.i.h.bf16 %v5196_v19 }
 0x48f   : > { %2311 = vmax.xlane.f32.xlu1 %v2310_v22  ;;  %5205 = vrot.lane.b32.xlu2 %v6749_v60, %s5883_s28 }
 0x490   : > { %v6755_v41 = vpop.eup %5355  ;;  %2085 = vmatpush.msrb.mxu1 %v5197_v63  ;;  %5038 = vmatpush.msra.mxu2 %v5197_v63 }
 0x491   : > { %v1885_v20 = vsel %vm586_vm0, %v6755_v41, 0.0 }
 0x492   : > { %1886 = vadd.xlane.f32.xlu0 %v1885_v20  ;;  %2086 = vmatpush.msrb.mxu1 %v5198_v16 }
 0x493   : > { %5039 = vmatpush.msra.mxu2 %v5198_v16 }
 0x494   : > { %2546 = vmatpush.msra.mxu1 %v5202_v52 }
 0x495   : > { %v6762_v33 = vpop.xlane.xlu1 %1853 }
 0x496   : > { %2547 = vmatpush.msra.mxu1 %v5203_v28 }
 0x497   : > { %2317 = vmax.xlane.f32.xlu1 %v2316_v29 }
 0x49d   : > { %v1349_v8 = vpop.xlane.xlu1 %1348 }
 0x49e   : > { %5357 = vrcp.f32 %v1349_v8  ;;  %v1382_v56 = vand.u32 2147483648, %v1349_v8  ;;  %v1380_v43 = vand.u32 2147483647, %v1349_v8  ;;  %vm1376_vm7 = vweird.f32 %v1349_v8 }
 0x4a0   : > { %v1383_v19 = vor.u32 1.1754944e-38, %v1382_v56  ;;  %vm1381_vm9 = vcmp.eq.f32.partialorder %v1380_v43, 8.507059e+37 }
 0x4a4   : > { %v5358_v36 = vpop.eup %5357 }
 0x4a5   : > { %v1372_v42 = vmul.f32 %v5358_v36, %v1349_v8  ;;  %vm1377_vm6 = vweird.f32 %v5358_v36 }
 0x4a6   : > { %5210 = vrot.lane.b32.xlu0 %v5209_v13, %s5883_s28  ;;  %vm1378_vm8 = vmor %vm1376_vm7, %vm1377_vm6 }
 0x4a7   : > { %v1373_v53 = vsub.f32 1.0, %v1372_v42 }
 0x4a9   : > { %v1374_v30 = vmul.f32 %v5358_v36, %v1373_v53 }
 0x4ab   : > { %v1375_v25 = vadd.f32 %v5358_v36, %v1374_v30 }
 0x4ad   : > { %v1379_v6 = vsel %vm1378_vm8, %v5358_v36, %v1375_v25 }
 0x4ae   : > { %v1384_v1 = vsel %vm1381_vm9, %v1383_v19, %v1379_v6 }
 0x4af   : > { %v1385_v63 = vmul.f32 %v6642_v47, %v1384_v1  ;;  %v1355_v47 = vpop.xlane.xlu1 %1354 }
 0x4b0   : > { %vm1406_vm13 = vweird.f32 %v1355_v47 }
 0x4b1   : > { %4792 = vmatmul.msk.f32.vlgmr.msrb.gmra.mxu2 %vm586_vm0, %v1385_v63 }
 0x4b8   : > { %v1842_v22 = vpop.xlane.xlu0 %1841 }
 0x4b9   : > { %v1858_v16 = vsub.f32 %v6658_v26, %v1842_v22 }
 0x4ba   : > { %v6770_v52 = vpop.xlane.xlu2 %1360 }
 0x4bb   : > { %v1869_v20 = vmul.f32 1.442695, %v1858_v16 }
 0x4bd   : > { %5359 = vpow2.f32 %v1869_v20 }
 0x4be   : > { %5361 = vrcp.f32 %v1355_v47 }
 0x4c0   : > { %v6772_v28 = vpop.xlane.xlu0 %1844 }
 0x4c2   : > { %v6774_v29 = vpop.xlane.xlu2 %1363 }
 0x4c3   : > { %v6776_v8 = vpop.eup %5359 }
 0x4c4   : > { %v1888_v36 = vsel %vm586_vm0, %v6776_v8, 0.0  ;;  %v5362_v26 = vpop.eup %5361 }
 0x4c5   : > { %1889 = vadd.xlane.f32.xlu2 %v1888_v36  ;;  %v1402_v53 = vmul.f32 %v5362_v26, %v1355_v47  ;;  %vm1407_vm14 = vweird.f32 %v5362_v26 }
 0x4c6   : > { %vm1408_vm2 = vmor %vm1406_vm13, %vm1407_vm14  ;;  %vm1436_vm14 = vweird.f32 %v6770_v52 }
 0x4c7   : > { %v1403_v30 = vsub.f32 1.0, %v1402_v53 }
 0x4c8   : > { %v6780_v58 = vpop.xlane.xlu0 %1847 }
 0x4c9   : > { %v1404_v63 = vmul.f32 %v5362_v26, %v1403_v30 }
 0x4ca   : > { %v6782_v37 = vpop.xlane.xlu2 %1366 }
 0x4d0   : > { %v1352_v13 = vpop.xlane.xlu0 %1351 }
 0x4d1   : > { %5363 = vrcp.f32 %v1352_v13  ;;  %v1397_v16 = vand.u32 2147483648, %v1352_v13  ;;  %v1395_v36 = vand.u32 2147483647, %v1352_v13  ;;  %vm1391_vm11 = vweird.f32 %v1352_v13 }
 0x4d2   : > { %v6784_v42 = vpop.xlane.xlu2 %1369  ;;  %5365 = vrcp.f32 %v6770_v52 }
 0x4d3   : > { %vm1396_vm15 = vcmp.eq.f32.partialorder %v1395_v36, 8.507059e+37 }
 0x4d7   : > { %v5364_v56 = vpop.eup %5363 }
 0x4d8   : > { %v1387_v43 = vmul.f32 %v5364_v56, %v1352_v13  ;;  %v6787_v25 = vpop.xlane.xlu0 %1357  ;;  %vm1392_vm10 = vweird.f32 %v5364_v56  ;;  %v6791_v46 = vpop.eup %5365  ;;  %v1412_v13 = vand.u32 2147483648, %v1355_v47 }
 0x4d9   : > { %5367 = vrcp.f32 %v6787_v25  ;;  %vm6795_vm12 = vmor %vm1391_vm11, %vm1392_vm10  ;;  %vm1421_vm4 = vweird.f32 %v6787_v25  ;;  %vm1437_vm5 = vweird.f32 %v6791_v46 }
 0x4da   : > { %v1388_v19 = vsub.f32 1.0, %v1387_v43  ;;  %v2300_v6 = vpop.xlane.xlu2 %2299  ;;  %v1405_v43 = vadd.f32 %v5362_v26, %v1404_v63 }
 0x4db   : > { %v2322_v1 = vsub.f32 %v6703_v27, %v2300_v6  ;;  %v1398_v6 = vor.u32 1.1754944e-38, %v1397_v16  ;;  %v1413_v16 = vor.u32 1.1754944e-38, %v1412_v13 }
 0x4dc   : > { %v1389_v22 = vmul.f32 %v5364_v56, %v1388_v19  ;;  %v1409_v40 = vsel %vm1408_vm2, %v5362_v26, %v1405_v43 }
 0x4dd   : > { %v2330_v20 = vmul.f32 1.442695, %v2322_v1  ;;  %v1432_v1 = vmul.f32 %v6791_v46, %v6770_v52 }
 0x4de   : > { %v1390_v53 = vadd.f32 %v5364_v56, %v1389_v22  ;;  %v1410_v22 = vand.u32 2147483647, %v1355_v47 }
 0x4df   : > { %v6793_v55 = vpop.eup %5367  ;;  %5369 = vpow2.f32 %v2330_v20  ;;  %v1433_v36 = vsub.f32 1.0, %v1432_v1 }
 0x4e0   : > { %v1417_v27 = vmul.f32 %v6793_v55, %v6787_v25  ;;  %v6801_v30 = vpop.xlane.xlu0 %1880  ;;  %v1394_v19 = vsel %vm6795_vm12, %v5364_v56, %v1390_v53  ;;  %vm1411_vm3 = vcmp.eq.f32.partialorder %v1410_v22, 8.507059e+37  ;;  %vm1422_vm6 = vweird.f32 %v6793_v55 }
 0x4e1   : > { %5371 = vrcp.f32 %v6801_v30  ;;  %v1399_v35 = vsel %vm1396_vm15, %v1398_v6, %v1394_v19  ;;  %v1414_v19 = vsel %vm1411_vm3, %v1413_v16, %v1409_v40  ;;  %vm6847_vm8 = vmor %vm1421_vm4, %vm1422_vm6  ;;  %vm1908_vm9 = vweird.f32 %v6801_v30 }
 0x4e2   : > { %v1418_v63 = vsub.f32 1.0, %v1417_v27  ;;  %v6808_v20 = vpop.xlane.xlu1 %1883  ;;  %v6810_v38 = vpop.xlane.xlu2 %2314  ;;  %v1400_v56 = vmul.f32 %v6691_v54, %v1399_v35  ;;  %v1415_v35 = vmul.f32 %v6651_v21, %v1414_v19  ;;  %v1434_v54 = vmul.f32 %v6791_v46, %v1433_v36  ;;  %vm6865_vm15 = vmor %vm1436_vm14, %vm1437_vm5 }
 0x4e3   : > { %5373 = vrcp.f32 %v6808_v20  ;;  %v1914_v21 = vand.u32 2147483648, %v6801_v30  ;;  %v1425_v36 = vand.u32 2147483647, %v6787_v25  ;;  %v1929_v4 = vand.u32 2147483648, %v6808_v20 }
 0x4e4   : > { %5375 = vrcp.f32 %v6774_v29  ;;  %4793 = vmatmul.msk.f32.gmra.mxu2 %vm586_vm0, %v1400_v56  ;;  %v1419_v47 = vmul.f32 %v6793_v55, %v1418_v63  ;;  %vm1923_vm2 = vweird.f32 %v6808_v20 }
 0x4e5   : > { %v6816_v53 = vpop.eup %5369  ;;  %5377 = vrcp.f32 %v6782_v37  ;;  %vm1426_vm11 = vcmp.eq.f32.partialorder %v1425_v36, 8.507059e+37 }
 0x4e6   : > { %v2346_v27 = vsel %vm586_vm0, %v6816_v53, 0.0  ;;  %v1420_v56 = vadd.f32 %v6793_v55, %v1419_v47 }
 0x4e7   : > { %v5372_v6 = vpop.eup %5371  ;;  %2347 = vadd.xlane.f32.xlu1 %v2346_v27  ;;  %v1427_v27 = vand.u32 2147483648, %v6787_v25 }
 0x4e8   : > { %v1904_v26 = vmul.f32 %v5372_v6, %v6801_v30  ;;  %vm1909_vm7 = vweird.f32 %v5372_v6 }
 0x4e9   : > { %v6823_v43 = vpop.eup %5373  ;;  %vm1910_vm10 = vmor %vm1908_vm9, %vm1909_vm7  ;;  %v1428_v25 = vor.u32 1.1754944e-38, %v1427_v27  ;;  %vm1451_vm7 = vweird.f32 %v6774_v29 }
 0x4ea   : > { %v6829_v13 = vpop.eup %5375  ;;  %v1905_v1 = vsub.f32 1.0, %v1904_v26  ;;  %v1919_v22 = vmul.f32 %v6823_v43, %v6808_v20  ;;  %v2303_v63 = vpop.xlane.xlu1 %2302  ;;  %v1912_v26 = vand.u32 2147483647, %v6801_v30  ;;  %vm1924_vm13 = vweird.f32 %v6823_v43 }
 0x4eb   : > { %v6833_v40 = vpop.xlane.xlu2 %2320  ;;  %v2323_v16 = vsub.f32 %v6725_v49, %v2303_v63  ;;  %v1447_v31 = vmul.f32 %v6829_v13, %v6774_v29  ;;  %v1435_v49 = vadd.f32 %v6791_v46, %v1434_v54  ;;  %vm6878_vm3 = vmor %vm1923_vm2, %vm1924_vm13  ;;  %vm1452_vm6 = vweird.f32 %v6829_v13 }
 0x4ec   : > { %v1906_v19 = vmul.f32 %v5372_v6, %v1905_v1  ;;  %v1920_v61 = vsub.f32 1.0, %v1919_v22  ;;  %4794 = vmatmul.msk.f32.gmra.mxu2 %vm586_vm0, %v1415_v35  ;;  %v1424_v1 = vsel %vm6847_vm8, %v6793_v55, %v1420_v56  ;;  %vm1913_vm12 = vcmp.eq.f32.partialorder %v1912_v26, 8.507059e+37  ;;  %vm1453_vm8 = vmor %vm1451_vm7, %vm1452_vm6 }
 0x4ed   : > { %v2332_v47 = vmul.f32 1.442695, %v2323_v16  ;;  %v1915_v16 = vor.u32 1.1754944e-38, %v1914_v21  ;;  %v1429_v30 = vsel %vm1426_vm11, %v1428_v25, %v1424_v1  ;;  %v1448_v55 = vsub.f32 1.0, %v1447_v31 }
 0x4ee   : > { %v1907_v63 = vadd.f32 %v5372_v6, %v1906_v19  ;;  %v1921_v22 = vmul.f32 %v6823_v43, %v1920_v61  ;;  %v1927_v21 = vand.u32 2147483647, %v6808_v20  ;;  %v1440_v31 = vand.u32 2147483647, %v6770_v52 }
 0x4ef   : > { %5379 = vpow2.f32 %v2332_v47  ;;  %v1442_v26 = vand.u32 2147483648, %v6770_v52  ;;  %v1860_v47 = vsub.f32 %v6679_v11, %v6780_v58  ;;  %v1430_v20 = vmul.f32 %v6700_v9, %v1429_v30 }
 0x4f0   : > { %v1911_v60 = vsel %vm1910_vm10, %v5372_v6, %v1907_v63  ;;  %v1922_v54 = vadd.f32 %v6823_v43, %v1921_v22  ;;  %5381 = vrcp.f32 %v6784_v42  ;;  %v1930_v11 = vor.u32 1.1754944e-38, %v1929_v4 }
 0x4f1   : > { %v1916_v19 = vsel %vm1913_vm12, %v1915_v16, %v1911_v60  ;;  %v6871_v60 = vpop.eup %5377  ;;  %vm1928_vm4 = vcmp.eq.f32.partialorder %v1927_v21, 8.507059e+37  ;;  %v1449_v58 = vmul.f32 %v6829_v13, %v1448_v55  ;;  %v1873_v16 = vmul.f32 1.442695, %v1860_v47 }
 0x4f2   : > { %v2306_v35 = vpop.xlane.xlu1 %2305  ;;  %v1917_v56 = vmul.f32 %v6712_v10, %v1916_v19  ;;  %v1926_v52 = vsel %vm6878_vm3, %v6823_v43, %v1922_v54  ;;  %v1462_v9 = vmul.f32 %v6871_v60, %v6782_v37  ;;  %v1443_v43 = vor.u32 1.1754944e-38, %v1442_v26 }
 0x4f3   : > { %v5206_v61 = vpop.permute.xlu2 %5205  ;;  %v2324_v36 = vsub.f32 %v6734_v57, %v2306_v35  ;;  %v1439_v57 = vsel %vm6865_vm15, %v6791_v46, %v1435_v49  ;;  %v1931_v49 = vsel %vm1928_vm4, %v1930_v11, %v1926_v52  ;;  %vm1441_vm5 = vcmp.eq.f32.partialorder %v1440_v31, 8.507059e+37 }
 0x4f4   : > { %v5207_v27 = vunpack.i.l.bf16 %v5206_v61  ;;  %4832 = vmatmul.msk.f32.vlgmr.msrb.gmra.mxu1 %vm586_vm0, %v1917_v56  ;;  %v5208_v22 = vunpack.i.h.bf16 %v5206_v61  ;;  %4795 = vmatmul.msk.f32.gmra.mxu2 %vm586_vm0, %v1430_v20  ;;  %v1444_v25 = vsel %vm1441_vm5, %v1443_v43, %v1439_v57  ;;  %v1463_v54 = vsub.f32 1.0, %v1462_v9 }
 0x4f5   : > { %v6892_v63 = vpop.eup %5379  ;;  %v2334_v1 = vmul.f32 1.442695, %v2324_v36  ;;  %v1932_v19 = vmul.f32 %v6718_v18, %v1931_v49  ;;  %v1450_v4 = vadd.f32 %v6829_v13, %v1449_v58  ;;  %v1861_v55 = vsub.f32 %v6630_v17, %v6747_v51 }
 0x4f6   : > { %2548 = vmatpush.msra.mxu1 %v5207_v27  ;;  %v2349_v46 = vsel %vm586_vm0, %v6892_v63, 0.0  ;;  %v6904_v35 = vpop.eup %5381  ;;  %v1457_v56 = vand.u32 2147483648, %v6774_v29  ;;  %v1445_v6 = vmul.f32 %v6663_v32, %v1444_v25  ;;  %v1455_v18 = vand.u32 2147483647, %v6774_v29 }
 0x4f7   : > { %5383 = vpow2.f32 %v2334_v1  ;;  %2350 = vadd.xlane.f32.xlu1 %v2349_v46  ;;  %v1477_v17 = vmul.f32 %v6904_v35, %v6784_v42  ;;  %v1454_v32 = vsel %vm1453_vm8, %v6829_v13, %v1450_v4  ;;  %v1464_v51 = vmul.f32 %v6871_v60, %v1463_v54  ;;  %v5564_v4 = vld [vmem:[#allocation3] sm:$0xff] }
 0x4f8   : > { %2549 = vmatpush.msra.mxu1 %v5208_v22  ;;  %5385 = vpow2.f32 %v1873_v16  ;;  %v1458_v27 = vor.u32 1.1754944e-38, %v1457_v56  ;;  %v1875_v29 = vmul.f32 1.442695, %v1861_v55  ;;  %vm1456_vm9 = vcmp.eq.f32.partialorder %v1455_v18, 8.507059e+37 }
 0x4f9   : > { %v1478_v10 = vsub.f32 1.0, %v1477_v17  ;;  %v1465_v20 = vadd.f32 %v6871_v60, %v1464_v51  ;;  %vm1467_vm10 = vweird.f32 %v6871_v60  ;;  %v1472_v13 = vand.u32 2147483648, %v6782_v37 }
 0x4fa   : > { %v2309_v30 = vpop.xlane.xlu1 %2308  ;;  %v1459_v31 = vsel %vm1456_vm9, %v1458_v27, %v1454_v32  ;;  %vm1466_vm11 = vweird.f32 %v6782_v37  ;;  %v1470_v1 = vand.u32 2147483647, %v6782_v37  ;;  %v1862_v11 = vsub.f32 %v6636_v45, %v6762_v33 }
 0x4fb   : > { %v2325_v61 = vsub.f32 %v6739_v24, %v2309_v30  ;;  %v1460_v52 = vmul.f32 %v6675_v39, %v1459_v31  ;;  %vm1468_vm12 = vmor %vm1466_vm11, %vm1467_vm10  ;;  %v2327_v58 = vsub.f32 %v6714_v14, %v6810_v38  ;;  %v1479_v37 = vmul.f32 %v6904_v35, %v1478_v10 }
 0x4fc   : > { %4833 = vmatmul.msk.f32.gmra.mxu1 %vm586_vm0, %v1932_v19  ;;  %4796 = vmatmul.msk.f32.gmra.mxu2 %vm586_vm0, %v1445_v6  ;;  %v1469_v39 = vsel %vm1468_vm12, %v6871_v60, %v1465_v20  ;;  %v1473_v33 = vor.u32 1.1754944e-38, %v1472_v13  ;;  %vm1471_vm13 = vcmp.eq.f32.partialorder %v1470_v1, 8.507059e+37  ;;  %v1877_v43 = vmul.f32 1.442695, %v1862_v11  ;;  %v5563_v19 = vld [vmem:[#allocation3 + $0x8] sm:$0xff] }
 0x4fd   : > { %v6914_v21 = vpop.eup %5383  ;;  %v2336_v36 = vmul.f32 1.442695, %v2325_v61  ;;  %v2340_v38 = vmul.f32 1.442695, %v2327_v58  ;;  %v1480_v14 = vadd.f32 %v6904_v35, %v1479_v37  ;;  %vm1482_vm14 = vweird.f32 %v6904_v35  ;;  %v824_v20 = vld [vmem:[#allocation13 + $0x8] sm:$0xff] }
 0x4fe   : > { %v2352_v24 = vsel %vm586_vm0, %v6914_v21, 0.0  ;;  %v6923_v26 = vpop.eup %5385  ;;  %v1474_v49 = vsel %vm1471_vm13, %v1473_v33, %v1469_v39  ;;  %v1487_v25 = vand.u32 2147483648, %v6784_v42  ;;  %v5214_v55 = vpack.i.bf16 %v5564_v4, %v5563_v19  ;;  %1627 = vmatpush.msra.mxu3 %v824_v20  ;;  %v5568_v19 = vld [vmem:[#allocation2 + $0x20] sm:$0xff] }
 0x4ff   : > { %5387 = vpow2.f32 %v2336_v36  ;;  %2353 = vadd.xlane.f32.xlu0 %v2352_v24  ;;  %v1475_v30 = vmul.f32 %v6687_v50, %v1474_v49  ;;  %vm1481_vm15 = vweird.f32 %v6784_v42  ;;  %v1485_v61 = vand.u32 2147483647, %v6784_v42  ;;  %v5565_v49 = vld [vmem:[#allocation2 + $0x30] sm:$0xff] }
 0x500   : > { %5389 = vpow2.f32 %v1875_v29  ;;  %v2329_v6 = vsub.f32 %v6727_v44, %v6833_v40  ;;  %vm1483_vm2 = vmor %vm1481_vm15, %vm1482_vm14  ;;  %v1488_v44 = vor.u32 1.1754944e-38, %v1487_v25  ;;  %v1859_v33 = vsub.f32 %v6669_v34, %v6772_v28 }
 0x501   : > { %v1484_v17 = vsel %vm1483_vm2, %v6904_v35, %v1480_v14  ;;  %vm1486_vm3 = vcmp.eq.f32.partialorder %v1485_v61, 8.507059e+37  ;;  %v5566_v14 = vld [vmem:[#allocation2 + $0x38] sm:$0xff] }
 0x502   : > { %v2312_v47 = vpop.xlane.xlu1 %2311  ;;  %v2344_v40 = vmul.f32 1.442695, %v2329_v6  ;;  %v1489_v51 = vsel %vm1486_vm3, %v1488_v44, %v1484_v17  ;;  %v5569_v17 = vld [vmem:[#allocation2 + $0x18] sm:$0xff]  ;;  %v5571_v44 = vld [vmem:[#allocation2 + $0x8] sm:$0xff] }
 0x503   : > { %v2326_v57 = vsub.f32 %v6745_v23, %v2312_v47  ;;  %v1894_v23 = vsel %vm586_vm0, %v6923_v26, 0.0  ;;  %v1490_v47 = vmul.f32 %v6696_v48, %v1489_v51 }
 0x504   : > { %4797 = vmatmul.msk.f32.gmra.mxu2 %vm586_vm0, %v1460_v52 }
 0x505   : > { %v6932_v22 = vpop.eup %5387  ;;  %v2338_v9 = vmul.f32 1.442695, %v2326_v57  ;;  %v6936_v46 = vpop.xlane.xlu0 %1886 }
 0x506   : > { %5391 = vrcp.f32 %v6936_v46  ;;  %v2355_v45 = vsel %vm586_vm0, %v6932_v22, 0.0  ;;  %v6948_v16 = vpop.eup %5389  ;;  %v1944_v31 = vand.u32 2147483648, %v6936_v46  ;;  %vm1938_vm5 = vweird.f32 %v6936_v46 }
 0x507   : > { %5393 = vpow2.f32 %v2338_v9  ;;  %1895 = vadd.xlane.f32.xlu0 %v1894_v23  ;;  %2356 = vadd.xlane.f32.xlu2 %v2355_v45  ;;  %v1897_v36 = vsel %vm586_vm0, %v6948_v16, 0.0  ;;  %v1942_v35 = vand.u32 2147483647, %v6936_v46 }
 0x508   : > { %5395 = vpow2.f32 %v1877_v43  ;;  %v1945_v52 = vor.u32 1.1754944e-38, %v1944_v31  ;;  %v1871_v43 = vmul.f32 1.442695, %v1859_v33 }
 0x509   : > { %5397 = vpow2.f32 %v2340_v38  ;;  %vm1943_vm7 = vcmp.eq.f32.partialorder %v1942_v35, 8.507059e+37 }
 0x50a   : > { %v2318_v60 = vpop.xlane.xlu1 %2317  ;;  %5399 = vpow2.f32 %v2344_v40  ;;  %v5572_v40 = vld [vmem:[#allocation2] sm:$0xff] }
 0x50b   : > { %v2328_v50 = vsub.f32 %v6760_v15, %v2318_v60 }
 0x50c   : > { %v5392_v54 = vpop.eup %5391  ;;  %4798 = vmatmul.msk.f32.gmra.mxu2 %vm586_vm0, %v1475_v30 }
 0x50d   : > { %v6956_v56 = vpop.eup %5393  ;;  %v1934_v18 = vmul.f32 %v5392_v54, %v6936_v46  ;;  %vm1939_vm4 = vweird.f32 %v5392_v54  ;;  %v2342_v27 = vmul.f32 1.442695, %v2328_v50 }
 0x50e   : > { %v2358_v42 = vsel %vm586_vm0, %v6956_v56, 0.0  ;;  %v6971_v15 = vpop.eup %5395  ;;  %vm1940_vm6 = vmor %vm1938_vm5, %vm1939_vm4 }
 0x50f   : > { %v1935_v24 = vsub.f32 1.0, %v1934_v18  ;;  %1898 = vadd.xlane.f32.xlu0 %v1897_v36  ;;  %2359 = vadd.xlane.f32.xlu2 %v2358_v42  ;;  %v6974_v10 = vpop.eup %5397  ;;  %5401 = vpow2.f32 %v2342_v27  ;;  %v1900_v13 = vsel %vm586_vm0, %v6971_v15, 0.0 }
 0x510   : > { %5215 = vrot.lane.b32.xlu1 %v5214_v55, %s5883_s28  ;;  %v2361_v1 = vsel %vm586_vm0, %v6974_v10, 0.0  ;;  %v6984_v46 = vpop.eup %5399  ;;  %5403 = vpow2.f32 %v1871_v43  ;;  %v825_v43 = vld [vmem:[#allocation13 + $0x10] sm:$0xff] }
 0x511   : > { %v1936_v32 = vmul.f32 %v5392_v54, %v1935_v24  ;;  %v2367_v37 = vsel %vm586_vm0, %v6984_v46, 0.0  ;;  %v5570_v24 = vld [vmem:[#allocation2 + $0x10] sm:$0xff]  ;;  %2151 = vmatpush.msrb.mxu3 %v825_v43 }
 0x513   : > { %v1937_v29 = vadd.f32 %v5392_v54, %v1936_v32 }
 0x514   : > { %4799 = vmatmul.msk.f32.gmra.mxu2 %vm586_vm0, %v1490_v47 }
 0x515   : > { %v1941_v57 = vsel %vm1940_vm6, %v5392_v54, %v1937_v29  ;;  %v6986_v58 = vpop.eup %5401  ;;  %v5567_v54 = vld [vmem:[#allocation2 + $0x28] sm:$0xff] }
 0x516   : > { %v1946_v9 = vsel %vm1943_vm7, %v1945_v52, %v1941_v57  ;;  %v2364_v45 = vsel %vm586_vm0, %v6986_v58, 0.0  ;;  %v6998_v38 = vpop.eup %5403 }
 0x517   : > { %1901 = vadd.xlane.f32.xlu0 %v1900_v13  ;;  %2362 = vadd.xlane.f32.xlu2 %v2361_v1  ;;  %v1947_v39 = vmul.f32 %v6755_v41, %v1946_v9  ;;  %v1891_v34 = vsel %vm586_vm0, %v6998_v38, 0.0 }
 0x518   : > { %v5211_v11 = vpop.permute.xlu0 %5210 }
 0x519   : > { %v5212_v48 = vunpack.i.l.bf16 %v5211_v11  ;;  %v5213_v23 = vunpack.i.h.bf16 %v5211_v11  ;;  %v826_v11 = vld [vmem:[#allocation13 + $0x18] sm:$0xff] }
 0x51a   : > { %2618 = vmatpush.msrb.mxu2 %v826_v11 }
 0x51b   : > { %2550 = vmatpush.msra.mxu1 %v5212_v48 }
 0x51c   : > { %4834 = vmatmul.msk.f32.vlgmr.msra.gmra.mxu2 %vm586_vm0, %v1947_v39 }
 0x51d   : > { %2551 = vmatpush.msra.mxu1 %v5213_v23 }
 0x51f   : > { %2368 = vadd.xlane.f32.xlu0 %v2367_v37  ;;  %2365 = vadd.xlane.f32.xlu2 %v2364_v45 }
 0x533   : > { %2680 = vrot.lane.b32.xlu0 %v5565_v49, %s5884_s13 }
 0x534   : > { %v1564_v41 = vpop.f32.mrf.mxu2 }
 0x535   : > { %4800 = vmatmul.msk.f32.vlgmr.msra.gmra.mxu3 %vm831_vm1, %v1564_v41 }
 0x537   : > { %3149 = vrot.lane.b32.xlu2 %v5566_v14, %s5885_s15 }
 0x538   : > { %v1890_v60 = vpop.xlane.xlu2 %1889 }
 0x539   : > { %5405 = vrcp.f32 %v1890_v60  ;;  %v1959_v4 = vand.u32 2147483648, %v1890_v60  ;;  %v1957_v61 = vand.u32 2147483647, %v1890_v60  ;;  %vm1953_vm9 = vweird.f32 %v1890_v60 }
 0x53a   : > { %1892 = vadd.xlane.f32.xlu1 %v1891_v34 }
 0x53b   : > { %3147 = vrot.lane.b32.xlu0 %v5565_v49, %s5885_s15  ;;  %v1960_v18 = vor.u32 1.1754944e-38, %v1959_v4  ;;  %vm1958_vm11 = vcmp.eq.f32.partialorder %v1957_v61, 8.507059e+37 }
 0x53f   : > { %v5406_v28 = vpop.eup %5405  ;;  %2678 = vrot.lane.b32.xlu2 %v5567_v54, %s5884_s13 }
 0x540   : > { %v1949_v25 = vmul.f32 %v5406_v28, %v1890_v60  ;;  %vm1954_vm8 = vweird.f32 %v5406_v28 }
 0x541   : > { %vm1955_vm10 = vmor %vm1953_vm9, %vm1954_vm8 }
 0x542   : > { %v1950_v30 = vsub.f32 1.0, %v1949_v25 }
 0x543   : > { %2676 = vrot.lane.b32.xlu0 %v5568_v19, %s5884_s13 }
 0x544   : > { %v1951_v55 = vmul.f32 %v5406_v28, %v1950_v30 }
 0x546   : > { %v1952_v6 = vadd.f32 %v5406_v28, %v1951_v55 }
 0x547   : > { %3143 = vrot.lane.b32.xlu2 %v5568_v19, %s5885_s15 }
 0x548   : > { %v1956_v36 = vsel %vm1955_vm10, %v5406_v28, %v1952_v6 }
 0x549   : > { %v1961_v50 = vsel %vm1958_vm11, %v1960_v18, %v1956_v36 }
 0x54a   : > { %v1962_v42 = vmul.f32 %v6776_v8, %v1961_v50 }
 0x54b   : > { %3141 = vrot.lane.b32.xlu0 %v5569_v17, %s5885_s15 }
 0x54c   : > { %4835 = vmatmul.msk.f32.gmra.mxu2 %vm586_vm0, %v1962_v42 }
 0x54f   : > { %2672 = vrot.lane.b32.xlu2 %v5570_v24, %s5884_s13 }
 0x553   : > { %2682 = vrot.lane.b32.xlu1 %v5566_v14, %s5884_s13  ;;  %2670 = vrot.lane.b32.xlu0 %v5571_v44, %s5884_s13 }
 0x557   : > { %3137 = vrot.lane.b32.xlu2 %v5571_v44, %s5885_s15  ;;  %v5573_v44 = vld [vmem:[#allocation3 + $0x38] sm:$0xff] }
 0x55a   : > { %v2348_v8 = vpop.xlane.xlu1 %2347 }
 0x55b   : > { %3145 = vrot.lane.b32.xlu1 %v5567_v54, %s5885_s15  ;;  %3135 = vrot.lane.b32.xlu0 %v5572_v40, %s5885_s15  ;;  %5407 = vrcp.f32 %v2348_v8  ;;  %v2381_v39 = vand.u32 2147483648, %v2348_v8  ;;  %vm2375_vm13 = vweird.f32 %v2348_v8  ;;  %v2379_v37 = vand.u32 2147483647, %v2348_v8 }
 0x55d   : > { %v2382_v34 = vor.u32 1.1754944e-38, %v2381_v39  ;;  %vm2380_vm15 = vcmp.eq.f32.partialorder %v2379_v37, 8.507059e+37 }
 0x55f   : > { %2652 = vrot.lane.b32.xlu2 %v6226_v59, %s5884_s13 }
 0x561   : > { %v5408_v27 = vpop.eup %5407 }
 0x562   : > { %v2371_v29 = vmul.f32 %v5408_v27, %v2348_v8  ;;  %vm2376_vm12 = vweird.f32 %v5408_v27 }
 0x563   : > { %2674 = vrot.lane.b32.xlu1 %v5569_v17, %s5884_s13  ;;  %2654 = vrot.lane.b32.xlu0 %v6234_v62, %s5884_s13  ;;  %vm7056_vm14 = vmor %vm2375_vm13, %vm2376_vm12 }
 0x564   : > { %v2372_v35 = vsub.f32 1.0, %v2371_v29 }
 0x566   : > { %v2373_v57 = vmul.f32 %v5408_v27, %v2372_v35 }
 0x567   : > { %3121 = vrot.lane.b32.xlu2 %v6234_v62, %s5885_s15  ;;  %v1567_v32 = vpop.f32.mrf.mxu2 }
 0x568   : > { %4801 = vmatmul.msk.f32.gmra.mxu3 %vm831_vm1, %v1567_v32  ;;  %v2374_v48 = vadd.f32 %v5408_v27, %v2373_v57 }
 0x56a   : > { %v7027_v51 = vpop.xlane.xlu1 %2350  ;;  %v2378_v49 = vsel %vm7056_vm14, %v5408_v27, %v2374_v48 }
 0x56b   : > { %3139 = vrot.lane.b32.xlu1 %v5570_v24, %s5885_s15  ;;  %3123 = vrot.lane.b32.xlu0 %v6238_v0, %s5885_s15  ;;  %5409 = vrcp.f32 %v7027_v51  ;;  %v2383_v30 = vsel %vm2380_vm15, %v2382_v34, %v2378_v49  ;;  %v2396_v6 = vand.u32 2147483648, %v7027_v51  ;;  %vm2390_vm3 = vweird.f32 %v7027_v51  ;;  %v8389_v34 = vld [vmem:[#allocation37_spill] sm:$0xff] }
 0x56c   : > { %v2384_v18 = vmul.f32 %v6816_v53, %v2383_v30  ;;  %v2394_v36 = vand.u32 2147483647, %v7027_v51 }
 0x56e   : > { %vm2395_vm5 = vcmp.eq.f32.partialorder %v2394_v36, 8.507059e+37 }
 0x56f   : > { %2658 = vrot.lane.b32.xlu2 %v6242_v2, %s5884_s13  ;;  %v1570_v31 = vpop.f32.mrf.mxu2 }
 0x570   : > { %4802 = vmatmul.msk.f32.gmra.mxu3 %vm831_vm1, %v1570_v31 }
 0x571   : > { %v7038_v20 = vpop.eup %5409  ;;  %v2088_v50 = vpop.f32.mrf.mxu1 }
 0x572   : > { %v7036_v47 = vpop.xlane.xlu0 %2353  ;;  %v2386_v13 = vmul.f32 %v7038_v20, %v7027_v51  ;;  %vm2391_vm2 = vweird.f32 %v7038_v20  ;;  %v2397_v51 = vor.u32 1.1754944e-38, %v2396_v6 }
 0x573   : > { %2668 = vrot.lane.b32.xlu1 %v5572_v40, %s5884_s13  ;;  %2660 = vrot.lane.b32.xlu0 %v6246_v3, %s5884_s13  ;;  %5411 = vrcp.f32 %v7036_v47  ;;  %vm7086_vm4 = vmor %vm2390_vm3, %vm2391_vm2  ;;  %v5574_v40 = vld [vmem:[#allocation3 + $0x30] sm:$0xff]  ;;  %vm2405_vm7 = vweird.f32 %v7036_v47 }
 0x574   : > { %v2387_v9 = vsub.f32 1.0, %v2386_v13  ;;  %v5219_v8 = vpack.i.bf16 %v5574_v40, %v5573_v44 }
 0x576   : > { %v2388_v60 = vmul.f32 %v7038_v20, %v2387_v9 }
 0x577   : > { %3127 = vrot.lane.b32.xlu2 %v6246_v3, %s5885_s15  ;;  %v1573_v52 = vpop.f32.mrf.mxu2 }
 0x578   : > { %4803 = vmatmul.msk.f32.gmra.mxu3 %vm831_vm1, %v1573_v52  ;;  %v2389_v4 = vadd.f32 %v7038_v20, %v2388_v60  ;;  %v2409_v52 = vand.u32 2147483647, %v7036_v47 }
 0x579   : > { %v7052_v23 = vpop.eup %5411 }
 0x57a   : > { %v7046_v1 = vpop.xlane.xlu2 %2356  ;;  %v7054_v45 = vpop.xlane.xlu0 %1895  ;;  %v2401_v41 = vmul.f32 %v7052_v23, %v7036_v47  ;;  %v2393_v32 = vsel %vm7086_vm4, %v7038_v20, %v2389_v4  ;;  %vm2406_vm6 = vweird.f32 %v7052_v23  ;;  %v2411_v20 = vand.u32 2147483648, %v7036_v47 }
 0x57b   : > { %3119 = vrot.lane.b32.xlu1 %v6226_v59, %s5885_s15  ;;  %3129 = vrot.lane.b32.xlu0 %v6250_v5, %s5885_s15  ;;  %5413 = vrcp.f32 %v7046_v1  ;;  %v2398_v29 = vsel %vm2395_vm5, %v2397_v51, %v2393_v32  ;;  %vm2407_vm8 = vmor %vm2405_vm7, %vm2406_vm6  ;;  %vm2410_vm9 = vcmp.eq.f32.partialorder %v2409_v52, 8.507059e+37  ;;  %vm2420_vm11 = vweird.f32 %v7046_v1 }
 0x57c   : > { %v2402_v19 = vsub.f32 1.0, %v2401_v41  ;;  %v2399_v13 = vmul.f32 %v6892_v63, %v2398_v29  ;;  %v2412_v37 = vor.u32 1.1754944e-38, %v2411_v20  ;;  %v2424_v60 = vand.u32 2147483647, %v7046_v1 }
 0x57e   : > { %v2403_v42 = vmul.f32 %v7052_v23, %v2402_v19  ;;  %vm2425_vm13 = vcmp.eq.f32.partialorder %v2424_v60, 8.507059e+37 }
 0x57f   : > { %2664 = vrot.lane.b32.xlu2 %v6254_v7, %s5884_s13  ;;  %v1576_v14 = vpop.f32.mrf.mxu2 }
 0x580   : > { %4804 = vmatmul.msk.f32.gmra.mxu3 %vm831_vm1, %v1576_v14  ;;  %v2404_v35 = vadd.f32 %v7052_v23, %v2403_v42 }
 0x581   : > { %v7077_v55 = vpop.eup %5413 }
 0x582   : > { %v5216_v28 = vpop.permute.xlu1 %5215  ;;  %v7069_v25 = vpop.xlane.xlu2 %2359  ;;  %v2416_v17 = vmul.f32 %v7077_v55, %v7046_v1  ;;  %v2408_v39 = vsel %vm2407_vm8, %v7052_v23, %v2404_v35  ;;  %vm2421_vm10 = vweird.f32 %v7077_v55  ;;  %v2426_v23 = vand.u32 2147483648, %v7046_v1 }
 0x583   : > { %2656 = vrot.lane.b32.xlu1 %v6238_v0, %s5884_s13  ;;  %2666 = vrot.lane.b32.xlu0 %v6258_v12, %s5884_s13  ;;  %v5217_v54 = vunpack.i.l.bf16 %v5216_v28  ;;  %v5218_v61 = vunpack.i.h.bf16 %v5216_v28  ;;  %5415 = vrcp.f32 %v7069_v25  ;;  %v7093_v53 = vpop.xlane.xlu0 %1898  ;;  %v2413_v33 = vsel %vm2410_vm9, %v2412_v37, %v2408_v39  ;;  %vm2422_vm12 = vmor %vm2420_vm11, %vm2421_vm10 }
 0x584   : > { %v2417_v31 = vsub.f32 1.0, %v2416_v17  ;;  %v2414_v14 = vmul.f32 %v6914_v21, %v2413_v33  ;;  %v2427_v4 = vor.u32 1.1754944e-38, %v2426_v23  ;;  %vm2435_vm15 = vweird.f32 %v7069_v25 }
 0x585   : > { %2552 = vmatpush.msra.mxu1 %v5217_v54  ;;  %v2439_v17 = vand.u32 2147483647, %v7069_v25 }
 0x586   : > { %v2418_v11 = vmul.f32 %v7077_v55, %v2417_v31 }
 0x587   : > { %3133 = vrot.lane.b32.xlu2 %v6258_v12, %s5885_s15  ;;  %2553 = vmatpush.msra.mxu1 %v5218_v61  ;;  %v1579_v24 = vpop.f32.mrf.mxu2  ;;  %vm2440_vm3 = vcmp.eq.f32.partialorder %v2439_v17, 8.507059e+37 }
 0x588   : > { %4864 = vmatmul.msk.f32.vlgmr.msra.gmra.mxu1 %vm586_vm0, %v2384_v18  ;;  %4805 = vmatmul.msk.f32.gmra.mxu3 %vm831_vm1, %v1579_v24  ;;  %v2419_v49 = vadd.f32 %v7077_v55, %v2418_v11 }
 0x589   : > { %v7107_v57 = vpop.eup %5415 }
 0x58a   : > { %v7100_v27 = vpop.xlane.xlu2 %2362  ;;  %v2431_v48 = vmul.f32 %v7107_v57, %v7069_v25  ;;  %v2423_v19 = vsel %vm2422_vm12, %v7077_v55, %v2419_v49  ;;  %vm2436_vm14 = vweird.f32 %v7107_v57  ;;  %v2441_v55 = vand.u32 2147483648, %v7069_v25 }
 0x58b   : > { %3125 = vrot.lane.b32.xlu1 %v6242_v2, %s5885_s15  ;;  %5220 = vrot.lane.b32.xlu0 %v5219_v8, %s5884_s13  ;;  %5417 = vrcp.f32 %v7100_v27  ;;  %v7121_v63 = vpop.xlane.xlu0 %1901  ;;  %v2428_v1 = vsel %vm2425_vm13, %v2427_v4, %v2423_v19  ;;  %vm2437_vm2 = vmor %vm2435_vm15, %vm2436_vm14  ;;  %v2456_v35 = vand.u32 2147483648, %v7100_v27  ;;  %vm2450_vm5 = vweird.f32 %v7100_v27 }
 0x58c   : > { %v2432_v43 = vsub.f32 1.0, %v2431_v48  ;;  %v2429_v42 = vmul.f32 %v6932_v22, %v2428_v1 }
 0x58e   : > { %v2433_v28 = vmul.f32 %v7107_v57, %v2432_v43 }
 0x58f   : > { %5225 = vrot.lane.b32.xlu2 %v5219_v8, %s5885_s15  ;;  %v1582_v9 = vpop.f32.mrf.mxu2  ;;  %v2442_v8 = vor.u32 1.1754944e-38, %v2441_v55 }
 0x590   : > { %4865 = vmatmul.msk.f32.gmra.mxu1 %vm586_vm0, %v2399_v13  ;;  %4806 = vmatmul.msk.f32.gmra.mxu3 %vm831_vm1, %v1582_v9  ;;  %v2434_v18 = vadd.f32 %v7107_v57, %v2433_v28  ;;  %v2091_v13 = vpop.f32.mrf.mxu1  ;;  %v2457_v9 = vor.u32 1.1754944e-38, %v2456_v35 }
 0x591   : > { %v7129_v41 = vpop.eup %5417 }
 0x592   : > { %v7123_v47 = vpop.xlane.xlu2 %2365  ;;  %v2446_v54 = vmul.f32 %v7129_v41, %v7100_v27  ;;  %v2438_v40 = vsel %vm2437_vm2, %v7107_v57, %v2434_v18  ;;  %vm2451_vm4 = vweird.f32 %v7129_v41  ;;  %v2454_v57 = vand.u32 2147483647, %v7100_v27 }
 0x593   : > { %2662 = vrot.lane.b32.xlu1 %v6250_v5, %s5884_s13  ;;  %5419 = vrcp.f32 %v7123_v47  ;;  %v7148_v6 = vpop.xlane.xlu0 %2368  ;;  %v2443_v22 = vsel %vm2440_vm3, %v2442_v8, %v2438_v40  ;;  %vm2452_vm6 = vmor %vm2450_vm5, %vm2451_vm4  ;;  %v2471_v23 = vand.u32 2147483648, %v7123_v47  ;;  %vm2465_vm9 = vweird.f32 %v7123_v47 }
 0x594   : > { %v2447_v61 = vsub.f32 1.0, %v2446_v54  ;;  %5421 = vrcp.f32 %v7148_v6  ;;  %v2444_v20 = vmul.f32 %v6956_v56, %v2443_v22  ;;  %vm2455_vm7 = vcmp.eq.f32.partialorder %v2454_v57, 8.507059e+37 }
 0x595   : > { %5423 = vrcp.f32 %v7054_v45  ;;  %vm2480_vm13 = vweird.f32 %v7148_v6  ;;  %v2484_v55 = vand.u32 2147483647, %v7148_v6 }
 0x596   : > { %v2448_v24 = vmul.f32 %v7129_v41, %v2447_v61 }
 0x597   : > { %5235 = vrot.lane.b32.xlu2 %v8389_v34, %s5885_s15  ;;  %v1585_v30 = vpop.f32.mrf.mxu2  ;;  %vm2485_vm2 = vcmp.eq.f32.partialorder %v2484_v55, 8.507059e+37 }
 0x598   : > { %4866 = vmatmul.msk.f32.gmra.mxu1 %vm586_vm0, %v2414_v14  ;;  %4807 = vmatmul.msk.f32.gmra.mxu3 %vm831_vm1, %v1585_v30  ;;  %v2449_v25 = vadd.f32 %v7129_v41, %v2448_v24  ;;  %v2472_v30 = vor.u32 1.1754944e-38, %v2471_v23 }
 0x599   : > { %v7151_v36 = vpop.eup %5419 }
 0x59a   : > { %v3150_v21 = vpop.permute.xlu2 %3149  ;;  %v2461_v44 = vmul.f32 %v7151_v36, %v7123_v47  ;;  %v7172_v31 = vpop.eup %5421  ;;  %v2453_v48 = vsel %vm2452_vm6, %v7129_v41, %v2449_v25  ;;  %vm2466_vm8 = vweird.f32 %v7151_v36  ;;  %v2469_v41 = vand.u32 2147483647, %v7123_v47 }
 0x59b   : > { %3131 = vrot.lane.b32.xlu1 %v6254_v7, %s5885_s15  ;;  %4912 = vmatpush.xpose.msk.msra.mxu2 %vm831_vm1, %v3150_v21  ;;  %v2476_v52 = vmul.f32 %v7172_v31, %v7148_v6  ;;  %v2458_v27 = vsel %vm2455_vm7, %v2457_v9, %v2453_v48  ;;  %v7187_v37 = vpop.eup %5423  ;;  %vm2467_vm10 = vmor %vm2465_vm9, %vm2466_vm8  ;;  %vm2481_vm12 = vweird.f32 %v7172_v31  ;;  %v1989_v48 = vand.u32 2147483648, %v7054_v45 }
 0x59c   : > { %v2462_v51 = vsub.f32 1.0, %v2461_v44  ;;  %v2459_v14 = vmul.f32 %v6974_v10, %v2458_v27  ;;  %v1979_v60 = vmul.f32 %v7187_v37, %v7054_v45  ;;  %vm2470_vm11 = vcmp.eq.f32.partialorder %v2469_v41, 8.507059e+37  ;;  %vm2482_vm14 = vmor %vm2480_vm13, %vm2481_vm12 }
 0x59d   : > { %v2477_v56 = vsub.f32 1.0, %v2476_v52  ;;  %vm1984_vm5 = vweird.f32 %v7187_v37  ;;  %vm1983_vm7 = vweird.f32 %v7054_v45  ;;  %v1990_v23 = vor.u32 1.1754944e-38, %v1989_v48 }
 0x59e   : > { %v2463_v11 = vmul.f32 %v7151_v36, %v2462_v51  ;;  %v1980_v4 = vsub.f32 1.0, %v1979_v60  ;;  %vm1985_vm8 = vmor %vm1983_vm7, %vm1984_vm5 }
 0x59f   : > { %v2094_v28 = vpop.f32.mrf.mxu2 }
 0x5a0   : > { %4867 = vmatmul.msk.f32.gmra.mxu1 %vm586_vm0, %v2429_v42  ;;  %4840 = vmatmul.msk.f32.vlgmr.msrb.gmra.mxu3 %vm831_vm1, %v2088_v50  ;;  %v2464_v33 = vadd.f32 %v7151_v36, %v2463_v11  ;;  %v1981_v44 = vmul.f32 %v7187_v37, %v1980_v4 }
 0x5a2   : > { %v7164_v32 = vpop.permute.xlu2 %2678  ;;  %v2468_v54 = vsel %vm2467_vm10, %v7151_v36, %v2464_v33  ;;  %v2486_v36 = vand.u32 2147483648, %v7148_v6 }
 0x5a3   : > { %5230 = vrot.lane.b32.xlu1 %v8389_v34, %s5884_s13  ;;  %v2478_v34 = vmul.f32 %v7172_v31, %v2477_v56  ;;  %v2473_v10 = vsel %vm2470_vm11, %v2472_v30, %v2468_v54  ;;  %v1987_v56 = vand.u32 2147483647, %v7054_v45  ;;  %vm1998_vm11 = vweird.f32 %v7093_v53 }
 0x5a4   : > { %v2474_v42 = vmul.f32 %v6986_v58, %v2473_v10  ;;  %v2487_v6 = vor.u32 1.1754944e-38, %v2486_v36  ;;  %v2017_v36 = vand.u32 2147483647, %v7121_v63 }
 0x5a5   : > { %v7170_v29 = vpop.permute.xlu0 %2680  ;;  %v2479_v1 = vadd.f32 %v7172_v31, %v2478_v34  ;;  %vm1988_vm9 = vcmp.eq.f32.partialorder %v1987_v56, 8.507059e+37  ;;  %v2004_v34 = vand.u32 2147483648, %v7093_v53 }
 0x5a7   : > { %v2483_v40 = vsel %vm2482_vm14, %v7172_v31, %v2479_v1  ;;  %v1982_v31 = vadd.f32 %v7187_v37, %v1981_v44 }
 0x5a8   : > { %4868 = vmatmul.msk.f32.gmra.mxu1 %vm586_vm0, %v2444_v20  ;;  %4841 = vmatmul.msk.f32.gmra.mxu3 %vm831_vm1, %v2091_v13  ;;  %v2488_v51 = vsel %vm2485_vm2, %v2487_v6, %v2483_v40 }
 0x5a9   : > { %v2489_v9 = vmul.f32 %v6984_v46, %v2488_v51 }
 0x5aa   : > { %v7185_v39 = vpop.permute.xlu2 %3143 }
 0x5ad   : > { %v1893_v43 = vpop.xlane.xlu1 %1892  ;;  %v3148_v49 = vpop.permute.xlu0 %3147 }
 0x5ae   : > { %5425 = vrcp.f32 %v1893_v43  ;;  %4913 = vmatpush.xpose.msk.msra.mxu2 %vm831_vm1, %v3148_v49  ;;  %v1974_v24 = vand.u32 2147483648, %v1893_v43  ;;  %v1972_v22 = vand.u32 2147483647, %v1893_v43  ;;  %vm1968_vm3 = vweird.f32 %v1893_v43 }
 0x5af   : > { %5427 = vrcp.f32 %v7093_v53 }
 0x5b0   : > { %4869 = vmatmul.msk.f32.gmra.mxu1 %vm586_vm0, %v2459_v14  ;;  %4842 = vmatmul.msk.f32.gmra.mxu3 %vm831_vm1, %v2094_v28  ;;  %5429 = vrcp.f32 %v7121_v63  ;;  %v1975_v35 = vor.u32 1.1754944e-38, %v1974_v24  ;;  %vm1973_vm6 = vcmp.eq.f32.partialorder %v1972_v22, 8.507059e+37  ;;  %v2002_v28 = vand.u32 2147483647, %v7093_v53 }
 0x5b2   : > { %v7203_v19 = vpop.permute.xlu2 %2672  ;;  %vm2003_vm13 = vcmp.eq.f32.partialorder %v2002_v28, 8.507059e+37 }
 0x5b4   : > { %v5426_v47 = vpop.eup %5425 }
 0x5b5   : > { %v7205_v21 = vpop.eup %5427  ;;  %v1964_v61 = vmul.f32 %v5426_v47, %v1893_v43  ;;  %v7209_v18 = vpop.permute.xlu0 %2676  ;;  %vm1969_vm15 = vweird.f32 %v5426_v47  ;;  %v1986_v43 = vsel %vm1985_vm8, %v7187_v37, %v1982_v31 }
 0x5b6   : > { %v1994_v17 = vmul.f32 %v7205_v21, %v7093_v53  ;;  %vm1970_vm4 = vmor %vm1968_vm3, %vm1969_vm15  ;;  %v5430_v52 = vpop.eup %5429  ;;  %v1991_v46 = vsel %vm1988_vm9, %v1990_v23, %v1986_v43  ;;  %vm1999_vm10 = vweird.f32 %v7205_v21  ;;  %v2019_v53 = vand.u32 2147483648, %v7121_v63 }
 0x5b7   : > { %v1965_v50 = vsub.f32 1.0, %v1964_v61  ;;  %v2009_v33 = vmul.f32 %v5430_v52, %v7121_v63  ;;  %v1992_v37 = vmul.f32 %v6923_v26, %v1991_v46  ;;  %vm2000_vm12 = vmor %vm1998_vm11, %vm1999_vm10  ;;  %vm2014_vm14 = vweird.f32 %v5430_v52 }
 0x5b8   : > { %4870 = vmatmul.msk.f32.gmra.mxu1 %vm586_vm0, %v2474_v42  ;;  %v1995_v57 = vsub.f32 1.0, %v1994_v17  ;;  %vm2013_vm15 = vweird.f32 %v7121_v63  ;;  %vm2018_vm3 = vcmp.eq.f32.partialorder %v2017_v36, 8.507059e+37 }
 0x5b9   : > { %v1966_v8 = vmul.f32 %v5426_v47, %v1965_v50  ;;  %vm2015_vm2 = vmor %vm2013_vm15, %vm2014_vm14  ;;  %v2020_v50 = vor.u32 1.1754944e-38, %v2019_v53 }
 0x5ba   : > { %v7221_v25 = vpop.permute.xlu2 %3137  ;;  %v1996_v49 = vmul.f32 %v7205_v21, %v1995_v57 }
 0x5bb   : > { %v1967_v58 = vadd.f32 %v5426_v47, %v1966_v8 }
 0x5bc   : > { %v1997_v45 = vadd.f32 %v7205_v21, %v1996_v49 }
 0x5bd   : > { %v7224_v20 = vpop.permute.xlu0 %3141  ;;  %v1971_v13 = vsel %vm1970_vm4, %v5426_v47, %v1967_v58  ;;  %v2005_v47 = vor.u32 1.1754944e-38, %v2004_v34 }
 0x5be   : > { %v1976_v11 = vsel %vm1973_vm6, %v1975_v35, %v1971_v13  ;;  %v2001_v30 = vsel %vm2000_vm12, %v7205_v21, %v1997_v45 }
 0x5bf   : > { %v1977_v27 = vmul.f32 %v6998_v38, %v1976_v11  ;;  %v2010_v38 = vsub.f32 1.0, %v2009_v33  ;;  %v2006_v10 = vsel %vm2003_vm13, %v2005_v47, %v2001_v30  ;;  %v7306_v30 = vpop.f32.mrf.mxu3 }
 0x5c0   : > { %4871 = vmatmul.msk.f32.gmra.mxu1 %vm586_vm0, %v2489_v9 }
 0x5c1   : > { %4836 = vmatmul.msk.f32.gmra.mxu2 %vm586_vm0, %v1977_v27  ;;  %v2011_v54 = vmul.f32 %v5430_v52, %v2010_v38 }
 0x5c2   : > { %v7237_v41 = vpop.permute.xlu2 %2652 }
 0x5c3   : > { %v2012_v61 = vadd.f32 %v5430_v52, %v2011_v54 }
 0x5c5   : > { %v2683_v14 = vpop.permute.xlu1 %2682  ;;  %v2671_v60 = vpop.permute.xlu0 %2670  ;;  %v2016_v55 = vsel %vm2015_vm2, %v5430_v52, %v2012_v61 }
 0x5c6   : > { %4880 = vmatpush.xpose.msk.msra.mxu3 %vm831_vm1, %v2683_v14  ;;  %v2021_v42 = vsel %vm2018_vm3, %v2020_v50, %v2016_v55 }
 0x5c7   : > { %v2022_v63 = vmul.f32 %v6971_v15, %v2021_v42 }
 0x5c9   : > { %4837 = vmatmul.msk.f32.gmra.mxu2 %vm586_vm0, %v1992_v37 }
 0x5ca   : > { %4881 = vmatpush.xpose.msk.msra.mxu3 %vm831_vm1, %v7170_v29  ;;  %v7250_v4 = vpop.permute.xlu2 %3121  ;;  %v2007_v29 = vmul.f32 %v6948_v16, %v2006_v10 }
 0x5cd   : > { %v3146_v1 = vpop.permute.xlu1 %3145  ;;  %v3136_v26 = vpop.permute.xlu0 %3135 }
 0x5ce   : > { %4882 = vmatpush.xpose.msk.msra.mxu3 %vm831_vm1, %v7164_v32  ;;  %4914 = vmatpush.xpose.msk.msra.mxu2 %vm831_vm1, %v3146_v1 }
 0x5cf   : > { %v2097_v21 = vpop.f32.mrf.mxu2 }
 0x5d0   : > { %4843 = vmatmul.msk.f32.gmra.mxu3 %vm831_vm1, %v2097_v21 }
 0x5d1   : > { %4838 = vmatmul.msk.f32.gmra.mxu2 %vm586_vm0, %v2007_v29 }
 0x5d2   : > { %4883 = vmatpush.xpose.msk.msra.mxu3 %vm831_vm1, %v7209_v18  ;;  %4915 = vmatpush.xpose.msk.msra.mxu2 %vm831_vm1, %v7185_v39  ;;  %v7265_v32 = vpop.permute.xlu2 %2658 }
 0x5d5   : > { %v2675_v16 = vpop.permute.xlu1 %2674  ;;  %v7267_v17 = vpop.permute.xlu0 %2654 }
 0x5d6   : > { %4884 = vmatpush.xpose.msk.msra.mxu3 %vm831_vm1, %v2675_v16  ;;  %4916 = vmatpush.xpose.msk.msra.mxu2 %vm831_vm1, %v7224_v20 }
 0x5d9   : > { %4839 = vmatmul.msk.f32.gmra.mxu2 %vm586_vm0, %v2022_v63 }
 0x5da   : > { %4885 = vmatpush.xpose.msk.msra.mxu3 %vm831_vm1, %v7203_v19  ;;  %v7276_v39 = vpop.permute.xlu2 %3127 }
 0x5dd   : > { %v3140_v18 = vpop.permute.xlu1 %3139  ;;  %v3124_v24 = vpop.permute.xlu0 %3123 }
 0x5de   : > { %4886 = vmatpush.xpose.msk.msra.mxu3 %vm831_vm1, %v2671_v60  ;;  %4917 = vmatpush.xpose.msk.msra.mxu2 %vm831_vm1, %v3140_v18 }
 0x5e2   : > { %4918 = vmatpush.xpose.msk.msra.mxu2 %vm831_vm1, %v7221_v25  ;;  %v7282_v44 = vpop.permute.xlu2 %2664 }
 0x5e5   : > { %v2669_v40 = vpop.permute.xlu1 %2668  ;;  %v7284_v15 = vpop.permute.xlu0 %2660 }
 0x5e6   : > { %4887 = vmatpush.xpose.msk.msra.mxu3 %vm831_vm1, %v2669_v40  ;;  %4919 = vmatpush.xpose.msk.msra.mxu2 %vm831_vm1, %v3136_v26 }
 0x5ea   : > { %v7288_v19 = vpop.permute.xlu2 %3133 }
 0x5eb   : > { %v7310_v10 = vpop.f32.mrf.mxu3 }
 0x5ed   : > { %v3120_v8 = vpop.permute.xlu1 %3119  ;;  %v3130_v22 = vpop.permute.xlu0 %3129 }
 0x5f2   : > { %v5226_v6 = vpop.permute.xlu2 %5225 }
 0x5f3   : > { %v5227_v58 = vunpack.i.l.bf16 %v5226_v6  ;;  %v5228_v35 = vunpack.i.h.bf16 %v5226_v6 }
 0x5f5   : > { %v2657_v51 = vpop.permute.xlu1 %2656  ;;  %v7290_v57 = vpop.permute.xlu0 %2666  ;;  %3480 = vmatpush.msrb.mxu3 %v5227_v58 }
 0x5f7   : > { %3481 = vmatpush.msrb.mxu3 %v5228_v35 }
 0x5fa   : > { %v5236_v25 = vpop.permute.xlu2 %5235 }
 0x5fb   : > { %v5237_v20 = vunpack.i.l.bf16 %v5236_v25  ;;  %v5238_v31 = vunpack.i.h.bf16 %v5236_v25 }
 0x5fd   : > { %v3126_v13 = vpop.permute.xlu1 %3125  ;;  %v5221_v52 = vpop.permute.xlu0 %5220  ;;  %3482 = vmatpush.msrb.mxu3 %v5237_v20 }
 0x5fe   : > { %v5222_v11 = vunpack.i.l.bf16 %v5221_v52  ;;  %v5223_v48 = vunpack.i.h.bf16 %v5221_v52 }
 0x5ff   : > { %3483 = vmatpush.msrb.mxu3 %v5238_v31 }
 0x600   : > { %3013 = vmatpush.msrb.mxu0 %v5222_v11 }
 0x602   : > { %3014 = vmatpush.msrb.mxu0 %v5223_v48 }
 0x605   : > { %v2663_v9 = vpop.permute.xlu1 %2662  ;;  %v2555_v27 = vpop.f32.mrf.mxu1 }
 0x606   : > { %4872 = vmatmul.msk.f32.vlgmr.msrb.gmra.mxu2 %vm831_vm1, %v2555_v27 }
 0x60d   : > { %v3132_v56 = vpop.permute.xlu1 %3131  ;;  %v2558_v33 = vpop.f32.mrf.mxu1 }
 0x60e   : > { %4873 = vmatmul.msk.f32.gmra.mxu2 %vm831_vm1, %v2558_v33 }
 0x615   : > { %v5231_v43 = vpop.permute.xlu1 %5230  ;;  %v2561_v23 = vpop.f32.mrf.mxu1 }
 0x616   : > { %v5232_v49 = vunpack.i.l.bf16 %v5231_v43  ;;  %4874 = vmatmul.msk.f32.gmra.mxu2 %vm831_vm1, %v2561_v23  ;;  %v5233_v46 = vunpack.i.h.bf16 %v5231_v43 }
 0x618   : > { %3015 = vmatpush.msrb.mxu0 %v5232_v49 }
 0x61a   : > { %3016 = vmatpush.msrb.mxu0 %v5233_v46 }
 0x61d   : > { %v2564_v38 = vpop.f32.mrf.mxu1 }
 0x61e   : > { %4875 = vmatmul.msk.f32.gmra.mxu2 %vm831_vm1, %v2564_v38 }
 0x625   : > { %v2567_v14 = vpop.f32.mrf.mxu1 }
 0x626   : > { %4876 = vmatmul.msk.f32.gmra.mxu2 %vm831_vm1, %v2567_v14 }
 0x62d   : > { %v2570_v60 = vpop.f32.mrf.mxu1 }
 0x62e   : > { %4877 = vmatmul.msk.f32.gmra.mxu2 %vm831_vm1, %v2570_v60 }
 0x635   : > { %v2573_v45 = vpop.f32.mrf.mxu1 }
 0x636   : > { %4878 = vmatmul.msk.f32.gmra.mxu2 %vm831_vm1, %v2573_v45 }
 0x63d   : > { %v2576_v34 = vpop.f32.mrf.mxu1 }
 0x63e   : > { %4879 = vmatmul.msk.f32.gmra.mxu2 %vm831_vm1, %v2576_v34 }
 0x644   : > { %v2100_v37 = vpop.f32.mrf.mxu2 }
 0x645   : > { %4844 = vmatmul.msk.f32.gmra.mxu3 %vm831_vm1, %v2100_v37 }
 0x646   : > { %4920 = vmatmul.msk.f32.vlgmr.msra.gmra.mxu2 %vm831_vm1, %v3120_v8 }
 0x64c   : > { %v2103_v28 = vpop.f32.mrf.mxu2 }
 0x64d   : > { %4845 = vmatmul.msk.f32.gmra.mxu3 %vm831_vm1, %v2103_v28 }
 0x64e   : > { %4921 = vmatmul.msk.f32.gmra.mxu2 %vm831_vm1, %v7250_v4  ;;  %v7317_v4 = vpop.f32.mrf.mxu3 }
 0x654   : > { %v2106_v54 = vpop.f32.mrf.mxu2 }
 0x655   : > { %4846 = vmatmul.msk.f32.gmra.mxu3 %vm831_vm1, %v2106_v54 }
 0x656   : > { %4922 = vmatmul.msk.f32.gmra.mxu2 %vm831_vm1, %v3124_v24  ;;  %v7322_v1 = vpop.f32.mrf.mxu3 }
 0x65c   : > { %v2109_v47 = vpop.f32.mrf.mxu2 }
 0x65d   : > { %4847 = vmatmul.msk.f32.gmra.mxu3 %vm831_vm1, %v2109_v47 }
 0x65e   : > { %4923 = vmatmul.msk.f32.gmra.mxu2 %vm831_vm1, %v3126_v13  ;;  %v7326_v26 = vpop.f32.mrf.mxu3 }
 0x665   : > { %4888 = vmatmul.msk.f32.vlgmr.msra.gmra.mxu3 %vm831_vm1, %v7237_v41 }
 0x666   : > { %4924 = vmatmul.msk.f32.gmra.mxu2 %vm831_vm1, %v7276_v39  ;;  %v7334_v41 = vpop.f32.mrf.mxu3 }
 0x667   : > { %8390 = vst [vmem:[#allocation37_spill] sm:$0xff] %v7334_v41 }
 0x66d   : > { %4889 = vmatmul.msk.f32.gmra.mxu3 %vm831_vm1, %v7267_v17 }
 0x66e   : > { %4925 = vmatmul.msk.f32.gmra.mxu2 %vm831_vm1, %v3130_v22  ;;  %v7337_v61 = vpop.f32.mrf.mxu3 }
 0x66f   : > { %8391 = vst [vmem:[#allocation38_spill] sm:$0xff] %v7337_v61 }
 0x675   : > { %4890 = vmatmul.msk.f32.gmra.mxu3 %vm831_vm1, %v2657_v51 }
 0x676   : > { %4926 = vmatmul.msk.f32.gmra.mxu2 %vm831_vm1, %v3132_v56  ;;  %v7341_v53 = vpop.f32.mrf.mxu3 }
 0x677   : > { %8392 = vst [vmem:[#allocation39_spill] sm:$0xff] %v7341_v53 }
 0x67d   : > { %4891 = vmatmul.msk.f32.gmra.mxu3 %vm831_vm1, %v7265_v32 }
 0x67e   : > { %4927 = vmatmul.msk.f32.gmra.mxu2 %vm831_vm1, %v7288_v19  ;;  %v7347_v29 = vpop.f32.mrf.mxu3 }
 0x685   : > { %4892 = vmatmul.msk.f32.gmra.mxu3 %vm831_vm1, %v7284_v15 }
 0x686   : > { %v7351_v55 = vpop.f32.mrf.mxu3 }
 0x689   : > { %v7345_v21 = vpop.f32.mrf.mxu2 }
 0x68d   : > { %4893 = vmatmul.msk.f32.gmra.mxu3 %vm831_vm1, %v2663_v9 }
 0x68e   : > { %v7355_v32 = vpop.f32.mrf.mxu3 }
 0x691   : > { %v7349_v36 = vpop.f32.mrf.mxu2 }
 0x695   : > { %4894 = vmatmul.msk.f32.gmra.mxu3 %vm831_vm1, %v7282_v44 }
 0x696   : > { %v7359_v16 = vpop.f32.mrf.mxu3 }
 0x699   : > { %v7353_v50 = vpop.f32.mrf.mxu2 }
 0x69d   : > { %4895 = vmatmul.msk.f32.gmra.mxu3 %vm831_vm1, %v7290_v57 }
 0x6a1   : > { %v7357_v42 = vpop.f32.mrf.mxu2 }
 0x6a9   : > { %v7361_v17 = vpop.f32.mrf.mxu2 }
 0x6aa   : > { %8393 = vst [vmem:[#allocation40_spill] sm:$0xff] %v7361_v17 }
 0x6b1   : > { %v7367_v18 = vpop.f32.mrf.mxu2 }
 0x6b2   : > { %8396 = vst [vmem:[#allocation43_spill] sm:$0xff] %v7367_v18 }
 0x6b9   : > { %v7371_v44 = vpop.f32.mrf.mxu2 }
 0x6ba   : > { %8398 = vst [vmem:[#allocation45_spill] sm:$0xff] %v7371_v44 }
 0x6c1   : > { %v7375_v15 = vpop.f32.mrf.mxu2 }
 0x6c2   : > { %8400 = vst [vmem:[#allocation47_spill] sm:$0xff] %v7375_v15 }
 0x6c8   : > { %v7363_v63 = vpop.f32.mrf.mxu3 }
 0x6c9   : > { %8394 = vst [vmem:[#allocation41_spill] sm:$0xff] %v7363_v63  ;;  %v3200_v6 = vpop.f32.mrf.mxu2 }
 0x6d0   : > { %v7365_v39 = vpop.f32.mrf.mxu3 }
 0x6d1   : > { %8395 = vst [vmem:[#allocation42_spill] sm:$0xff] %v7365_v39  ;;  %v3203_v20 = vpop.f32.mrf.mxu2 }
 0x6d8   : > { %v7369_v24 = vpop.f32.mrf.mxu3 }
 0x6d9   : > { %8397 = vst [vmem:[#allocation44_spill] sm:$0xff] %v7369_v24  ;;  %v3206_v48 = vpop.f32.mrf.mxu2 }
 0x6e0   : > { %v7373_v40 = vpop.f32.mrf.mxu3 }
 0x6e1   : > { %8399 = vst [vmem:[#allocation46_spill] sm:$0xff] %v7373_v40  ;;  %v3209_v33 = vpop.f32.mrf.mxu2 }
 0x6e2   : > { %v3227_v54 = vmul.f32 0.35355338, %v3209_v33 }
 0x6e4   : > { %v3241_v47 = vsel %vm586_vm0, %v3227_v54, -inf }
 0x6e8   : > { %v2733_v19 = vpop.f32.mrf.mxu3 }
 0x6e9   : > { %v2757_v8 = vmul.f32 0.35355338, %v2733_v19  ;;  %v3212_v46 = vpop.f32.mrf.mxu2 }
 0x6eb   : > { %v2765_v22 = vsel %vm586_vm0, %v2757_v8, -inf }
 0x6ec   : > { %2766 = vmax.xlane.f32.xlu1 %v2765_v22 }
 0x6f0   : > { %v2736_v58 = vpop.f32.mrf.mxu3 }
 0x6f1   : > { %v2758_v51 = vmul.f32 0.35355338, %v2736_v58  ;;  %v3215_v37 = vpop.f32.mrf.mxu2 }
 0x6f3   : > { %v2768_v35 = vsel %vm586_vm0, %v2758_v51, -inf }
 0x6f4   : > { %2769 = vmax.xlane.f32.xlu2 %v2768_v35  ;;  %v5575_v35 = vld [vmem:[#allocation3 + $0x18] sm:$0xff] }
 0x6f8   : > { %v2739_v57 = vpop.f32.mrf.mxu3 }
 0x6f9   : > { %v2759_v25 = vmul.f32 0.35355338, %v2739_v57  ;;  %v3218_v19 = vpop.f32.mrf.mxu2  ;;  %v5576_v57 = vld [vmem:[#allocation3 + $0x10] sm:$0xff] }
 0x6fa   : > { %v7401_v22 = vmul.f32 0.35355338, %v3218_v19 }
 0x6fb   : > { %v2771_v13 = vsel %vm586_vm0, %v2759_v25, -inf }
 0x6fc   : > { %2772 = vmax.xlane.f32.xlu2 %v2771_v13  ;;  %v3250_v58 = vsel %vm586_vm0, %v7401_v22, -inf  ;;  %v7405_v13 = vpack.i.bf16 %v5576_v57, %v5575_v35  ;;  %v7423_v35 = vmul.f32 0.35355338, %v3206_v48 }
 0x700   : > { %v2742_v31 = vpop.f32.mrf.mxu3 }
 0x701   : > { %v7380_v52 = vmul.f32 0.35355338, %v2742_v31 }
 0x703   : > { %v2774_v11 = vsel %vm586_vm0, %v7380_v52, -inf }
 0x704   : > { %2775 = vmax.xlane.f32.xlu1 %v2774_v11 }
 0x708   : > { %v2745_v9 = vpop.f32.mrf.mxu3 }
 0x709   : > { %v7384_v27 = vmul.f32 0.35355338, %v2745_v9 }
 0x70b   : > { %v2777_v56 = vsel %vm586_vm0, %v7384_v27, -inf }
 0x70c   : > { %2778 = vmax.xlane.f32.xlu0 %v2777_v56 }
 0x710   : > { %v2748_v43 = vpop.f32.mrf.mxu3 }
 0x711   : > { %v7388_v49 = vmul.f32 0.35355338, %v2748_v43 }
 0x713   : > { %v2780_v23 = vsel %vm586_vm0, %v7388_v49, -inf }
 0x714   : > { %2781 = vmax.xlane.f32.xlu2 %v2780_v23 }
 0x718   : > { %v2751_v38 = vpop.f32.mrf.mxu3 }
 0x719   : > { %v7392_v14 = vmul.f32 0.35355338, %v2751_v38 }
 0x71b   : > { %v2783_v60 = vsel %vm586_vm0, %v7392_v14, -inf }
 0x71c   : > { %2784 = vmax.xlane.f32.xlu1 %v2783_v60  ;;  %v7413_v60 = vmul.f32 0.35355338, %v3200_v6 }
 0x720   : > { %v2754_v45 = vpop.f32.mrf.mxu3 }
 0x721   : > { %v7396_v34 = vmul.f32 0.35355338, %v2754_v45 }
 0x723   : > { %v2786_v28 = vsel %vm586_vm0, %v7396_v34, -inf }
 0x724   : > { %2787 = vmax.xlane.f32.xlu2 %v2786_v28 }
 0x72c   : > { %3242 = vmax.xlane.f32.xlu2 %v3241_v47 }
 0x734   : > { %3251 = vmax.xlane.f32.xlu2 %v3250_v58  ;;  %v7421_v58 = vmul.f32 0.35355338, %v3203_v20  ;;  %v7435_v20 = vmul.f32 0.35355338, %v3215_v37 }
 0x736   : > { %v3235_v57 = vsel %vm586_vm0, %v7421_v58, -inf  ;;  %v3247_v48 = vsel %vm586_vm0, %v7435_v20, -inf }
 0x74c   : > { %5240 = vrot.lane.b32.xlu2 %v7405_v13, %s5884_s13 }
 0x75f   : > { %v2767_v31 = vpop.xlane.xlu1 %2766 }
 0x760   : > { %v2789_v11 = vsub.f32 %v2757_v8, %v2767_v31  ;;  %v3232_v8 = vsel %vm586_vm0, %v7413_v60, -inf }
 0x762   : > { %v2797_v9 = vmul.f32 1.442695, %v2789_v11  ;;  %v7433_v11 = vmul.f32 0.35355338, %v3212_v46 }
 0x764   : > { %5431 = vpow2.f32 %v2797_v9  ;;  %v3244_v9 = vsel %vm586_vm0, %v7433_v11, -inf }
 0x767   : > { %v2770_v56 = vpop.xlane.xlu2 %2769 }
 0x768   : > { %v2790_v33 = vsub.f32 %v2758_v51, %v2770_v56 }
 0x76a   : > { %v7409_v43 = vpop.eup %5431  ;;  %v2799_v23 = vmul.f32 1.442695, %v2790_v33 }
 0x76b   : > { %v2813_v38 = vsel %vm586_vm0, %v7409_v43, 0.0 }
 0x76c   : > { %5433 = vpow2.f32 %v2799_v23  ;;  %2814 = vadd.xlane.f32.xlu0 %v2813_v38 }
 0x76f   : > { %v2773_v45 = vpop.xlane.xlu2 %2772 }
 0x770   : > { %v2791_v28 = vsub.f32 %v2759_v25, %v2773_v45  ;;  %v3238_v25 = vsel %vm586_vm0, %v7423_v35, -inf }
 0x772   : > { %v7415_v47 = vpop.eup %5433  ;;  %v2801_v19 = vmul.f32 1.442695, %v2791_v28 }
 0x773   : > { %v2816_v51 = vsel %vm586_vm0, %v7415_v47, 0.0 }
 0x774   : > { %5435 = vpow2.f32 %v2801_v19  ;;  %3233 = vmax.xlane.f32.xlu0 %v3232_v8  ;;  %2817 = vadd.xlane.f32.xlu1 %v2816_v51 }
 0x777   : > { %v7444_v19 = vpop.xlane.xlu1 %2775 }
 0x77a   : > { %v7425_v6 = vpop.eup %5435 }
 0x77b   : > { %v2819_v31 = vsel %vm586_vm0, %v7425_v6, 0.0 }
 0x77c   : > { %3239 = vmax.xlane.f32.xlu0 %v3238_v25  ;;  %3236 = vmax.xlane.f32.xlu1 %v3235_v57 }
 0x77d   : > { %2820 = vadd.xlane.f32.xlu2 %v2819_v31 }
 0x77f   : > { %v2779_v23 = vpop.xlane.xlu0 %2778 }
 0x780   : > { %v2793_v46 = vsub.f32 %v7384_v27, %v2779_v23 }
 0x782   : > { %v2805_v28 = vmul.f32 1.442695, %v2793_v46 }
 0x784   : > { %3248 = vmax.xlane.f32.xlu0 %v3247_v48  ;;  %3245 = vmax.xlane.f32.xlu1 %v3244_v9 }
 0x787   : > { %v2782_v56 = vpop.xlane.xlu2 %2781 }
 0x788   : > { %v2794_v25 = vsub.f32 %v7388_v49, %v2782_v56 }
 0x78a   : > { %v2807_v31 = vmul.f32 1.442695, %v2794_v25  ;;  %v3221_v25 = vpop.f32.mrf.mxu2 }
 0x797   : > { %v2788_v33 = vpop.xlane.xlu2 %2787 }
 0x798   : > { %v2796_v46 = vsub.f32 %v7396_v34, %v2788_v33 }
 0x79d   : > { %5245 = vrot.lane.b32.xlu1 %v7405_v13, %s5885_s15 }
 0x79f   : > { %v3243_v38 = vpop.xlane.xlu2 %3242 }
 0x7a0   : > { %v3259_v45 = vsub.f32 %v3227_v54, %v3243_v38  ;;  %v2785_v54 = vpop.xlane.xlu1 %2784 }
 0x7a1   : > { %v2795_v23 = vsub.f32 %v7392_v14, %v2785_v54 }
 0x7a2   : > { %v3270_v37 = vmul.f32 1.442695, %v3259_v45 }
 0x7a3   : > { %v2809_v49 = vmul.f32 1.442695, %v2795_v23 }
 0x7a4   : > { %5437 = vpow2.f32 %v3270_v37 }
 0x7a5   : > { %5439 = vpow2.f32 %v2805_v28  ;;  %v2811_v28 = vmul.f32 1.442695, %v2796_v46 }
 0x7a6   : > { %5441 = vpow2.f32 %v2807_v31 }
 0x7a7   : > { %v7446_v8 = vpop.xlane.xlu2 %3251  ;;  %5443 = vpow2.f32 %v2809_v49 }
 0x7a8   : > { %5445 = vpow2.f32 %v2811_v28 }
 0x7aa   : > { %v7448_v51 = vpop.eup %5437 }
 0x7ab   : > { %v3289_v57 = vsel %vm586_vm0, %v7448_v51, 0.0  ;;  %v7453_v27 = vpop.eup %5439 }
 0x7ac   : > { %3290 = vadd.xlane.f32.xlu2 %v3289_v57  ;;  %v2825_v45 = vsel %vm586_vm0, %v7453_v27, 0.0  ;;  %v7458_v56 = vpop.eup %5441  ;;  %v7465_v57 = vmul.f32 0.35355338, %v3221_v25 }
 0x7ad   : > { %v2828_v37 = vsel %vm586_vm0, %v7458_v56, 0.0  ;;  %v7463_v14 = vpop.eup %5443 }
 0x7ae   : > { %v2831_v31 = vsel %vm586_vm0, %v7463_v14, 0.0  ;;  %v3253_v54 = vsel %vm586_vm0, %v7465_v57, -inf  ;;  %v7471_v34 = vpop.eup %5445 }
 0x7af   : > { %v5241_v48 = vpop.permute.xlu2 %5240  ;;  %v2834_v33 = vsel %vm586_vm0, %v7471_v34, 0.0 }
 0x7b0   : > { %v5242_v9 = vunpack.i.l.bf16 %v5241_v48  ;;  %v5243_v38 = vunpack.i.h.bf16 %v5241_v48 }
 0x7b2   : > { %3017 = vmatpush.msrb.mxu0 %v5242_v9  ;;  %v5577_v9 = vld [vmem:[#allocation2 + $0x30] sm:$0xff] }
 0x7b4   : > { %2826 = vadd.xlane.f32.xlu2 %v2825_v45  ;;  %3018 = vmatpush.msrb.mxu0 %v5243_v38 }
 0x7bc   : > { %2829 = vadd.xlane.f32.xlu2 %v2828_v37 }
 0x7c4   : > { %2832 = vadd.xlane.f32.xlu2 %v2831_v31 }
 0x7c7   : > { %3254 = vmax.xlane.f32.xlu1 %v3253_v54  ;;  %v7487_v54 = vld [vmem:[#allocation2 + $0x10] sm:$0xff] }
 0x7cc   : > { %2835 = vadd.xlane.f32.xlu2 %v2834_v33 }
 0x7df   : > { %v7475_v48 = vpop.xlane.xlu0 %2814 }
 0x7e0   : > { %vm2842_vm5 = vweird.f32 %v7475_v48 }
 0x7e4   : > { %3614 = vrot.lane.b32.xlu2 %v5577_v9, %s5886_s2 }
 0x7e7   : > { %v3234_v23 = vpop.xlane.xlu0 %3233  ;;  %v7478_v38 = vpop.xlane.xlu1 %2817 }
 0x7e8   : > { %v3256_v45 = vsub.f32 %v7413_v60, %v3234_v23  ;;  %v5580_v23 = vld [vmem:[#allocation3 + $0x8] sm:$0xff]  ;;  %vm2857_vm12 = vweird.f32 %v7478_v38 }
 0x7ea   : > { %v3264_v49 = vmul.f32 1.442695, %v3256_v45  ;;  %v5581_v45 = vld [vmem:[#allocation3] sm:$0xff] }
 0x7ec   : > { %5447 = vpow2.f32 %v3264_v49  ;;  %4081 = vrot.lane.b32.xlu2 %v5577_v9, %s5887_s4  ;;  %v7495_v9 = vld [vmem:[#allocation2 + $0x18] sm:$0xff]  ;;  %v5249_v49 = vpack.i.bf16 %v5581_v45, %v5580_v23  ;;  %v2792_v23 = vsub.f32 %v7380_v52, %v7444_v19 }
 0x7ef   : > { %v3237_v46 = vpop.xlane.xlu1 %3236 }
 0x7f0   : > { %v3257_v37 = vsub.f32 %v7421_v58, %v3237_v46 }
 0x7f2   : > { %v7483_v28 = vpop.eup %5447  ;;  %v3266_v25 = vmul.f32 1.442695, %v3257_v37 }
 0x7f3   : > { %v3280_v31 = vsel %vm586_vm0, %v7483_v28, 0.0 }
 0x7f4   : > { %3281 = vadd.xlane.f32.xlu1 %v3280_v31  ;;  %3606 = vrot.lane.b32.xlu2 %v7487_v54, %s5886_s2  ;;  %5449 = vpow2.f32 %v3266_v25  ;;  %v3240_v31 = vpop.xlane.xlu0 %3239 }
 0x7f7   : > { %v3246_v58 = vpop.xlane.xlu1 %3245 }
 0x7fa   : > { %v7491_v60 = vpop.eup %5449 }
 0x7fb   : > { %v3283_v33 = vsel %vm586_vm0, %v7491_v60, 0.0 }
 0x7fc   : > { %4075 = vrot.lane.b32.xlu2 %v7495_v9, %s5887_s4  ;;  %3284 = vadd.xlane.f32.xlu0 %v3283_v33  ;;  %v3258_v33 = vsub.f32 %v7423_v35, %v3240_v31 }
 0x7fe   : > { %v3268_v45 = vmul.f32 1.442695, %v3258_v33 }
 0x800   : > { %5451 = vpow2.f32 %v3268_v45 }
 0x804   : > { %3586 = vrot.lane.b32.xlu2 %v6226_v59, %s5886_s2 }
 0x80c   : > { %3588 = vrot.lane.b32.xlu2 %v6234_v62, %s5886_s2 }
 0x80d   : > { %5250 = vrot.lane.b32.xlu1 %v5249_v49, %s5884_s13 }
 0x80f   : > { %v5246_v46 = vpop.permute.xlu1 %5245 }
 0x810   : > { %v5247_v37 = vunpack.i.l.bf16 %v5246_v46  ;;  %5255 = vrot.lane.b32.xlu0 %v5249_v49, %s5885_s15  ;;  %v5248_v25 = vunpack.i.h.bf16 %v5246_v46  ;;  %v2803_v49 = vmul.f32 1.442695, %v2792_v23 }
 0x812   : > { %3484 = vmatpush.msrb.mxu3 %v5247_v37  ;;  %5453 = vpow2.f32 %v2803_v49  ;;  %v3249_v37 = vpop.xlane.xlu0 %3248 }
 0x814   : > { %3485 = vmatpush.msrb.mxu3 %v5248_v25  ;;  %4055 = vrot.lane.b32.xlu2 %v6234_v62, %s5887_s4  ;;  %v3260_v62 = vsub.f32 %v7433_v11, %v3246_v58  ;;  %v7517_v25 = vpop.eup %5451 }
 0x815   : > { %v3286_v35 = vsel %vm586_vm0, %v7517_v25, 0.0 }
 0x816   : > { %v3272_v46 = vmul.f32 1.442695, %v3260_v62 }
 0x818   : > { %5455 = vpow2.f32 %v3272_v46  ;;  %v7522_v52 = vpop.eup %5453 }
 0x819   : > { %v2822_v31 = vsel %vm586_vm0, %v7522_v52, 0.0 }
 0x81c   : > { %3594 = vrot.lane.b32.xlu2 %v6246_v3, %s5886_s2 }
 0x81e   : > { %v7526_v11 = vpop.eup %5455 }
 0x81f   : > { %v3292_v45 = vsel %vm586_vm0, %v7526_v11, 0.0 }
 0x824   : > { %4061 = vrot.lane.b32.xlu2 %v6246_v3, %s5887_s4  ;;  %v3261_v3 = vsub.f32 %v7435_v20, %v3249_v37  ;;  %v3262_v20 = vsub.f32 %v7401_v22, %v7446_v8 }
 0x826   : > { %v3274_v19 = vmul.f32 1.442695, %v3261_v3  ;;  %v3276_v49 = vmul.f32 1.442695, %v3262_v20  ;;  %v5582_v3 = vld [vmem:[#allocation2 + $0x28] sm:$0xff] }
 0x828   : > { %5457 = vpow2.f32 %v3274_v19 }
 0x82c   : > { %3600 = vrot.lane.b32.xlu2 %v6258_v12, %s5886_s2 }
 0x82e   : > { %v7533_v62 = vpop.eup %5457 }
 0x82f   : > { %v3295_v37 = vsel %vm586_vm0, %v7533_v62, 0.0 }
 0x837   : > { %3287 = vadd.xlane.f32.xlu1 %v3286_v35  ;;  %v5583_v35 = vld [vmem:[#allocation2 + $0x20] sm:$0xff] }
 0x83a   : > { %v3255_v33 = vpop.xlane.xlu1 %3254  ;;  %2823 = vadd.xlane.f32.xlu0 %v2822_v31  ;;  %v5584_v31 = vld [vmem:[#allocation2 + $0x38] sm:$0xff] }
 0x83b   : > { %v3263_v58 = vsub.f32 %v7465_v57, %v3255_v33 }
 0x83d   : > { %v3278_v23 = vmul.f32 1.442695, %v3263_v58 }
 0x83f   : > { %5459 = vpow2.f32 %v3278_v23  ;;  %3293 = vadd.xlane.f32.xlu1 %v3292_v45 }
 0x840   : > { %5461 = vpow2.f32 %v3276_v49 }
 0x841   : > { %5463 = vrcp.f32 %v7475_v48 }
 0x845   : > { %v7535_v46 = vpop.eup %5459 }
 0x846   : > { %v3301_v57 = vsel %vm586_vm0, %v7535_v46, 0.0  ;;  %v7541_v22 = vpop.eup %5461 }
 0x847   : > { %3296 = vadd.xlane.f32.xlu1 %v3295_v37  ;;  %3302 = vadd.xlane.f32.xlu0 %v3301_v57  ;;  %v3298_v8 = vsel %vm586_vm0, %v7541_v22, 0.0  ;;  %v5464_v33 = vpop.eup %5463  ;;  %v7560_v37 = vpop.xlane.xlu2 %2820 }
 0x848   : > { %v2838_v58 = vmul.f32 %v5464_v33, %v7475_v48  ;;  %vm2843_vm4 = vweird.f32 %v5464_v33 }
 0x849   : > { %vm7581_vm6 = vmor %vm2842_vm5, %vm2843_vm4 }
 0x84a   : > { %v2839_v23 = vsub.f32 1.0, %v2838_v58 }
 0x84f   : > { %3299 = vadd.xlane.f32.xlu1 %v3298_v8  ;;  %v7564_v8 = vld [vmem:[#allocation2 + $0x8] sm:$0xff] }
 0x85b   : > { %3612 = vrot.lane.b32.xlu0 %v5582_v3, %s5886_s2 }
 0x863   : > { %3610 = vrot.lane.b32.xlu0 %v5583_v35, %s5886_s2 }
 0x867   : > { %v7548_v19 = vpop.xlane.xlu1 %3281 }
 0x868   : > { %5465 = vrcp.f32 %v7548_v19  ;;  %3616 = vrot.lane.b32.xlu1 %v5584_v31, %s5886_s2  ;;  %v3315_v17 = vand.u32 2147483648, %v7548_v19  ;;  %vm3309_vm9 = vweird.f32 %v7548_v19 }
 0x869   : > { %5467 = vrcp.f32 %v7478_v38 }
 0x86b   : > { %4079 = vrot.lane.b32.xlu0 %v5582_v3, %s5887_s4  ;;  %v2840_v3 = vmul.f32 %v5464_v33, %v2839_v23  ;;  %v2848_v23 = vand.u32 2147483648, %v7475_v48 }
 0x86d   : > { %v2841_v40 = vadd.f32 %v5464_v33, %v2840_v3  ;;  %v2846_v3 = vand.u32 2147483647, %v7475_v48  ;;  %v2849_v41 = vor.u32 1.1754944e-38, %v2848_v23  ;;  %v3313_v48 = vand.u32 2147483647, %v7548_v19 }
 0x86e   : > { %v5466_v20 = vpop.eup %5465 }
 0x86f   : > { %v7555_v45 = vpop.xlane.xlu0 %3284  ;;  %v7558_v49 = vpop.eup %5467  ;;  %v3305_v57 = vmul.f32 %v5466_v20, %v7548_v19  ;;  %vm3310_vm7 = vweird.f32 %v5466_v20  ;;  %vm2847_vm8 = vcmp.eq.f32.partialorder %v2846_v3, 8.507059e+37  ;;  %v2863_v19 = vand.u32 2147483648, %v7478_v38 }
 0x870   : > { %4083 = vrot.lane.b32.xlu1 %v5584_v31, %s5887_s4  ;;  %5469 = vrcp.f32 %v7555_v45  ;;  %v2853_v58 = vmul.f32 %v7558_v49, %v7478_v38  ;;  %vm2858_vm10 = vweird.f32 %v7558_v49  ;;  %vm7597_vm11 = vmor %vm3309_vm9, %vm3310_vm7  ;;  %vm3314_vm13 = vcmp.eq.f32.partialorder %v3313_v48, 8.507059e+37 }
 0x871   : > { %5471 = vrcp.f32 %v7560_v37  ;;  %v3306_v31 = vsub.f32 1.0, %v3305_v57  ;;  %vm7613_vm14 = vmor %vm2857_vm12, %vm2858_vm10  ;;  %vm3324_vm3 = vweird.f32 %v7555_v45 }
 0x872   : > { %v2854_v53 = vsub.f32 1.0, %v2853_v58 }
 0x873   : > { %3604 = vrot.lane.b32.xlu0 %v7564_v8, %s5886_s2  ;;  %v3307_v44 = vmul.f32 %v5466_v20, %v3306_v31 }
 0x874   : > { %v2855_v58 = vmul.f32 %v7558_v49, %v2854_v53  ;;  %v3328_v53 = vand.u32 2147483647, %v7555_v45 }
 0x875   : > { %v3308_v18 = vadd.f32 %v5466_v20, %v3307_v44 }
 0x876   : > { %v7571_v15 = vpop.eup %5469  ;;  %vm3329_vm7 = vcmp.eq.f32.partialorder %v3328_v53, 8.507059e+37 }
 0x877   : > { %v3320_v24 = vmul.f32 %v7571_v15, %v7555_v45  ;;  %v7577_v61 = vpop.eup %5471  ;;  %vm3325_vm15 = vweird.f32 %v7571_v15 }
 0x878   : > { %3608 = vrot.lane.b32.xlu1 %v7495_v9, %s5886_s2  ;;  %v2845_v9 = vsel %vm7581_vm6, %v5464_v33, %v2841_v40  ;;  %v2868_v31 = vmul.f32 %v7577_v61, %v7560_v37  ;;  %v3312_v33 = vsel %vm7597_vm11, %v5466_v20, %v3308_v18  ;;  %v2864_v20 = vor.u32 1.1754944e-38, %v2863_v19  ;;  %vm7628_vm4 = vmor %vm3324_vm3, %vm3325_vm15 }
 0x879   : > { %v3321_v39 = vsub.f32 1.0, %v3320_v24  ;;  %v2850_v63 = vsel %vm2847_vm8, %v2849_v41, %v2845_v9  ;;  %v2856_v24 = vadd.f32 %v7558_v49, %v2855_v58  ;;  %v3316_v41 = vor.u32 1.1754944e-38, %v3315_v17  ;;  %v5586_v58 = vld [vmem:[#allocation2] sm:$0xff] }
 0x87a   : > { %v2869_v44 = vsub.f32 1.0, %v2868_v31  ;;  %v2851_v3 = vmul.f32 %v7409_v43, %v2850_v63  ;;  %v2861_v9 = vand.u32 2147483647, %v7478_v38  ;;  %v3330_v31 = vand.u32 2147483648, %v7555_v45 }
 0x87b   : > { %4073 = vrot.lane.b32.xlu0 %v7487_v54, %s5887_s4  ;;  %v3322_v23 = vmul.f32 %v7571_v15, %v3321_v39  ;;  %v3317_v17 = vsel %vm3314_vm13, %v3316_v41, %v3312_v33  ;;  %v2860_v38 = vsel %vm7613_vm14, %v7558_v49, %v2856_v24  ;;  %vm2873_vm5 = vweird.f32 %v7577_v61 }
 0x87c   : > { %v2870_v63 = vmul.f32 %v7577_v61, %v2869_v44  ;;  %vm2862_vm2 = vcmp.eq.f32.partialorder %v2861_v9, 8.507059e+37  ;;  %v2878_v45 = vand.u32 2147483648, %v7560_v37  ;;  %v3331_v44 = vor.u32 1.1754944e-38, %v3330_v31 }
 0x87d   : > { %v3323_v43 = vadd.f32 %v7571_v15, %v3322_v23  ;;  %v2865_v49 = vsel %vm2862_vm2, %v2864_v20, %v2860_v38  ;;  %vm2872_vm6 = vweird.f32 %v7560_v37  ;;  %v2876_v33 = vand.u32 2147483647, %v7560_v37  ;;  %v5587_v38 = vld [vmem:[#allocation3 + $0x38] sm:$0xff]  ;;  %v5588_v20 = vld [vmem:[#allocation3 + $0x30] sm:$0xff] }
 0x87e   : > { %v2871_v24 = vadd.f32 %v7577_v61, %v2870_v63  ;;  %v2866_v23 = vmul.f32 %v7415_v47, %v2865_v49  ;;  %vm2874_vm8 = vmor %vm2872_vm6, %vm2873_vm5  ;;  %v7695_v31 = vpack.i.bf16 %v5588_v20, %v5587_v38 }
 0x87f   : > { %v5251_v54 = vpop.permute.xlu1 %5250  ;;  %vm2877_vm9 = vcmp.eq.f32.partialorder %v2876_v33, 8.507059e+37 }
 0x880   : > { %v5252_v40 = vunpack.i.l.bf16 %v5251_v54  ;;  %4077 = vrot.lane.b32.xlu1 %v5583_v35, %s5887_s4  ;;  %v5253_v57 = vunpack.i.h.bf16 %v5251_v54  ;;  %v3318_v54 = vmul.f32 %v7483_v28, %v3317_v17  ;;  %v3327_v28 = vsel %vm7628_vm4, %v7571_v15, %v3323_v43 }
 0x881   : > { %v3332_v19 = vsel %vm3329_vm7, %v3331_v44, %v3327_v28  ;;  %v2875_v41 = vsel %vm2874_vm8, %v7577_v61, %v2871_v24  ;;  %v2879_v15 = vor.u32 1.1754944e-38, %v2878_v45 }
 0x882   : > { %3019 = vmatpush.msrb.mxu0 %v5252_v40  ;;  %v5256_v35 = vpop.permute.xlu0 %5255 }
 0x883   : > { %4069 = vrot.lane.b32.xlu0 %v5586_v58, %s5887_s4  ;;  %v5257_v18 = vunpack.i.l.bf16 %v5256_v35  ;;  %v5258_v48 = vunpack.i.h.bf16 %v5256_v35  ;;  %v2880_v37 = vsel %vm2877_vm9, %v2879_v15, %v2875_v41 }
 0x884   : > { %3020 = vmatpush.msrb.mxu0 %v5253_v57  ;;  %v3333_v57 = vmul.f32 %v7491_v60, %v3332_v19  ;;  %v2881_v47 = vmul.f32 %v7425_v6, %v2880_v37 }
 0x885   : > { %4896 = vmatmul.msk.f32.vlgmr.msrb.gmra.mxu0 %vm586_vm0, %v2851_v3  ;;  %3486 = vmatpush.msrb.mxu3 %v5257_v18  ;;  %v7655_v3 = vpop.xlane.xlu2 %3290 }
 0x886   : > { %5473 = vrcp.f32 %v7655_v3  ;;  %vm3354_vm10 = vweird.f32 %v7655_v3 }
 0x887   : > { %3487 = vmatpush.msrb.mxu3 %v5258_v48  ;;  %v3358_v48 = vand.u32 2147483647, %v7655_v3 }
 0x888   : > { %3602 = vrot.lane.b32.xlu1 %v5586_v58, %s5886_s2  ;;  %4928 = vmatmul.msk.f32.vlgmr.msrb.gmra.mxu3 %vm586_vm0, %v3318_v54  ;;  %v3360_v54 = vand.u32 2147483648, %v7655_v3 }
 0x88a   : > { %v3361_v41 = vor.u32 1.1754944e-38, %v3360_v54 }
 0x88b   : > { %3590 = vrot.lane.b32.xlu0 %v6238_v0, %s5886_s2 }
 0x88c   : > { %v7673_v6 = vpop.eup %5473 }
 0x88d   : > { %4897 = vmatmul.msk.f32.gmra.mxu0 %vm586_vm0, %v2866_v23  ;;  %v7661_v61 = vpop.xlane.xlu2 %2826  ;;  %vm3355_vm11 = vweird.f32 %v7673_v6 }
 0x88e   : > { %5475 = vrcp.f32 %v7661_v61  ;;  %v2908_v20 = vand.u32 2147483648, %v7661_v61  ;;  %vm7734_vm7 = vmor %vm3354_vm10, %vm3355_vm11  ;;  %vm2902_vm8 = vweird.f32 %v7661_v61  ;;  %vm3359_vm10 = vcmp.eq.f32.partialorder %v3358_v48, 8.507059e+37 }
 0x890   : > { %4071 = vrot.lane.b32.xlu1 %v7564_v8, %s5887_s4  ;;  %4929 = vmatmul.msk.f32.gmra.mxu3 %vm586_vm0, %v3333_v57  ;;  %v3350_v8 = vmul.f32 %v7673_v6, %v7655_v3 }
 0x893   : > { %4057 = vrot.lane.b32.xlu0 %v6238_v0, %s5887_s4 }
 0x894   : > { %v7677_v60 = vpop.eup %5475 }
 0x895   : > { %4898 = vmatmul.msk.f32.gmra.mxu0 %vm586_vm0, %v2881_v47  ;;  %v7671_v0 = vpop.xlane.xlu2 %2829  ;;  %vm2903_vm2 = vweird.f32 %v7677_v60 }
 0x896   : > { %vm7743_vm9 = vmor %vm2902_vm8, %vm2903_vm2 }
 0x898   : > { %4053 = vrot.lane.b32.xlu1 %v6226_v59, %s5887_s4 }
 0x89b   : > { %3596 = vrot.lane.b32.xlu0 %v6250_v5, %s5886_s2 }
 0x89d   : > { %v7693_v18 = vpop.xlane.xlu2 %2832 }
 0x8a0   : > { %3592 = vrot.lane.b32.xlu1 %v6242_v2, %s5886_s2 }
 0x8a3   : > { %4063 = vrot.lane.b32.xlu0 %v6250_v5, %s5887_s4 }
 0x8a8   : > { %4059 = vrot.lane.b32.xlu1 %v6242_v2, %s5887_s4  ;;  %v2898_v2 = vmul.f32 %v7677_v60, %v7661_v61 }
 0x8aa   : > { %v3288_v59 = vpop.xlane.xlu1 %3287  ;;  %v2899_v39 = vsub.f32 1.0, %v2898_v2 }
 0x8ab   : > { %5477 = vrcp.f32 %v3288_v59  ;;  %4067 = vrot.lane.b32.xlu0 %v6258_v12, %s5887_s4  ;;  %v3351_v12 = vsub.f32 1.0, %v3350_v8  ;;  %v3345_v45 = vand.u32 2147483648, %v3288_v59  ;;  %vm3339_vm13 = vweird.f32 %v3288_v59 }
 0x8ac   : > { %5479 = vrcp.f32 %v7671_v0  ;;  %v2900_v49 = vmul.f32 %v7677_v60, %v2899_v39  ;;  %v3343_v23 = vand.u32 2147483647, %v3288_v59 }
 0x8ad   : > { %v2824_v5 = vpop.xlane.xlu0 %2823 }
 0x8ae   : > { %5481 = vrcp.f32 %v2824_v5  ;;  %v2893_v19 = vand.u32 2147483648, %v2824_v5  ;;  %v2891_v57 = vand.u32 2147483647, %v2824_v5  ;;  %v2901_v2 = vadd.f32 %v7677_v60, %v2900_v49 }
 0x8af   : > { %vm2887_vm3 = vweird.f32 %v2824_v5  ;;  %vm3344_vm4 = vcmp.eq.f32.partialorder %v3343_v23, 8.507059e+37  ;;  %v2906_v49 = vand.u32 2147483647, %v7661_v61 }
 0x8b0   : > { %3598 = vrot.lane.b32.xlu1 %v6254_v7, %s5886_s2  ;;  %vm2892_vm6 = vcmp.eq.f32.partialorder %v2891_v57, 8.507059e+37  ;;  %v2905_v23 = vsel %vm7743_vm9, %v7677_v60, %v2901_v2  ;;  %v828_v57 = vld [vmem:[#allocation13 + $0x28] sm:$0xff]  ;;  %vm2932_vm9 = vweird.f32 %v7693_v18 }
 0x8b1   : > { %v5478_v9 = vpop.eup %5477  ;;  %vm2907_vm11 = vcmp.eq.f32.partialorder %v2906_v49, 8.507059e+37  ;;  %3552 = vmatpush.msra.mxu0 %v828_v57 }
 0x8b2   : > { %v3335_v35 = vmul.f32 %v5478_v9, %v3288_v59  ;;  %v7686_v58 = vpop.xlane.xlu1 %3293  ;;  %v7691_v17 = vpop.eup %5479  ;;  %vm3340_vm12 = vweird.f32 %v5478_v9 }
 0x8b3   : > { %5483 = vrcp.f32 %v7686_v58  ;;  %5270 = vrot.lane.b32.xlu0 %v7405_v13, %s5886_s2  ;;  %v3352_v13 = vmul.f32 %v7673_v6, %v3351_v12  ;;  %v2913_v24 = vmul.f32 %v7691_v17, %v7671_v0  ;;  %vm7710_vm14 = vmor %vm3339_vm13, %vm3340_vm12  ;;  %vm2918_vm12 = vweird.f32 %v7691_v17 }
 0x8b4   : > { %v3336_v63 = vsub.f32 1.0, %v3335_v35  ;;  %v5482_v43 = vpop.eup %5481  ;;  %5485 = vrcp.f32 %v7693_v18  ;;  %v3346_v35 = vor.u32 1.1754944e-38, %v3345_v45  ;;  %vm3369_vm2 = vweird.f32 %v7686_v58 }
 0x8b5   : > { %v2883_v40 = vmul.f32 %v5482_v43, %v2824_v5  ;;  %vm2888_vm15 = vweird.f32 %v5482_v43  ;;  %v3353_v8 = vadd.f32 %v7673_v6, %v3352_v13  ;;  %v2914_v39 = vsub.f32 1.0, %v2913_v24 }
 0x8b6   : > { %v3337_v53 = vmul.f32 %v5478_v9, %v3336_v63  ;;  %vm2889_vm5 = vmor %vm2887_vm3, %vm2888_vm15  ;;  %v2894_v63 = vor.u32 1.1754944e-38, %v2893_v19 }
 0x8b7   : > { %v2884_v44 = vsub.f32 1.0, %v2883_v40  ;;  %v2915_v61 = vmul.f32 %v7691_v17, %v2914_v39  ;;  %v2923_v39 = vand.u32 2147483648, %v7671_v0 }
 0x8b8   : > { %v3338_v28 = vadd.f32 %v5478_v9, %v3337_v53  ;;  %4065 = vrot.lane.b32.xlu1 %v6254_v7, %s5887_s4  ;;  %v827_v7 = vld [vmem:[#allocation13 + $0x20] sm:$0xff]  ;;  %v7726_v53 = vpop.xlane.xlu2 %2835 }
 0x8b9   : > { %v7707_v33 = vpop.eup %5483  ;;  %v2885_v15 = vmul.f32 %v5482_v43, %v2884_v44  ;;  %3085 = vmatpush.msrb.mxu1 %v827_v7  ;;  %v3357_v44 = vsel %vm7734_vm7, %v7673_v6, %v3353_v8  ;;  %v2916_v7 = vadd.f32 %v7691_v17, %v2915_v61 }
 0x8ba   : > { %v3365_v37 = vmul.f32 %v7707_v33, %v7686_v58  ;;  %v7716_v47 = vpop.xlane.xlu1 %3296  ;;  %v3342_v59 = vsel %vm7710_vm14, %v5478_v9, %v3338_v28  ;;  %v7728_v9 = vpop.eup %5485  ;;  %v3362_v60 = vsel %vm3359_vm10, %v3361_v41, %v3357_v44  ;;  %vm3370_vm13 = vweird.f32 %v7707_v33 }
 0x8bb   : > { %v2886_v12 = vadd.f32 %v5482_v43, %v2885_v15  ;;  %5487 = vrcp.f32 %v7716_v47  ;;  %v3347_v40 = vsel %vm3344_vm4, %v3346_v35, %v3342_v59  ;;  %v2928_v15 = vmul.f32 %v7728_v9, %v7693_v18  ;;  %v7776_v2 = vpop.xlane.xlu0 %3302  ;;  %vm7791_vm3 = vmor %vm3369_vm2, %vm3370_vm13 }
 0x8bc   : > { %v3366_v38 = vsub.f32 1.0, %v3365_v37  ;;  %v3348_v24 = vmul.f32 %v7517_v25, %v3347_v40  ;;  %5489 = vrcp.f32 %v7726_v53  ;;  %vm2917_vm14 = vweird.f32 %v7671_v0 }
 0x8bd   : > { %v2890_v13 = vsel %vm2889_vm5, %v5482_v43, %v2886_v12  ;;  %v2929_v48 = vsub.f32 1.0, %v2928_v15  ;;  %v3375_v59 = vand.u32 2147483648, %v7686_v58  ;;  %vm7782_vm15 = vmor %vm2917_vm14, %vm2918_vm12  ;;  %v2924_v43 = vor.u32 1.1754944e-38, %v2923_v39 }
 0x8be   : > { %v2895_v28 = vsel %vm2892_vm6, %v2894_v63, %v2890_v13  ;;  %v3367_v25 = vmul.f32 %v7707_v33, %v3366_v38  ;;  %4930 = vmatmul.msk.f32.gmra.mxu3 %vm586_vm0, %v3348_v24  ;;  %v3373_v63 = vand.u32 2147483647, %v7686_v58  ;;  %v3363_v38 = vmul.f32 %v7448_v51, %v3362_v60 }
 0x8bf   : > { %v2896_v45 = vmul.f32 %v7522_v52, %v2895_v28  ;;  %v2909_v52 = vor.u32 1.1754944e-38, %v2908_v20  ;;  %v2921_v20 = vand.u32 2147483647, %v7671_v0  ;;  %v2920_v0 = vsel %vm7782_vm15, %v7691_v17, %v2916_v7 }
 0x8c0   : > { %5260 = vrot.lane.b32.xlu1 %v7695_v31, %s5886_s2  ;;  %v3368_v8 = vadd.f32 %v7707_v33, %v3367_v25  ;;  %v2930_v58 = vmul.f32 %v7728_v9, %v2929_v48  ;;  %vm3374_vm4 = vcmp.eq.f32.partialorder %v3373_v63, 8.507059e+37  ;;  %vm2933_vm7 = vweird.f32 %v7728_v9 }
 0x8c1   : > { %v7760_v19 = vpop.eup %5487  ;;  %4899 = vmatmul.msk.f32.gmra.mxu0 %vm586_vm0, %v2896_v45  ;;  %v2910_v54 = vsel %vm2907_vm11, %v2909_v52, %v2905_v23  ;;  %vm2922_vm5 = vcmp.eq.f32.partialorder %v2921_v20, 8.507059e+37  ;;  %v3390_v41 = vand.u32 2147483648, %v7716_v47  ;;  %v2938_v52 = vand.u32 2147483648, %v7693_v18  ;;  %vm7831_vm11 = vmor %vm2932_vm9, %vm2933_vm7 }
 0x8c2   : > { %v7765_v6 = vpop.xlane.xlu1 %3299  ;;  %v3380_v37 = vmul.f32 %v7760_v19, %v7716_v47  ;;  %v7780_v35 = vpop.eup %5489  ;;  %v2911_v13 = vmul.f32 %v7453_v27, %v2910_v54  ;;  %v3372_v51 = vsel %vm7791_vm3, %v7707_v33, %v3368_v8  ;;  %v3376_v27 = vor.u32 1.1754944e-38, %v3375_v59 }
 0x8c3   : > { %5491 = vrcp.f32 %v7765_v6  ;;  %v2943_v24 = vmul.f32 %v7780_v35, %v7726_v53  ;;  %vm3385_vm6 = vweird.f32 %v7760_v19  ;;  %v2925_v44 = vsel %vm2922_vm5, %v2924_v43, %v2920_v0 }
 0x8c4   : > { %v3381_v3 = vsub.f32 1.0, %v3380_v37  ;;  %5493 = vrcp.f32 %v7776_v2  ;;  %v3377_v45 = vsel %vm3374_vm4, %v3376_v27, %v3372_v51  ;;  %v2931_v25 = vadd.f32 %v7728_v9, %v2930_v58  ;;  %v3615_v51 = vpop.permute.xlu2 %3614 }
 0x8c5   : > { %v2944_v23 = vsub.f32 1.0, %v2943_v24  ;;  %vm3384_vm8 = vweird.f32 %v7716_v47  ;;  %v3388_v15 = vand.u32 2147483647, %v7716_v47  ;;  %v3378_v57 = vmul.f32 %v7526_v11, %v3377_v45 }
 0x8c6   : > { %v3382_v49 = vmul.f32 %v7760_v19, %v3381_v3  ;;  %4931 = vmatmul.msk.f32.gmra.mxu3 %vm586_vm0, %v3363_v38  ;;  %v2936_v37 = vand.u32 2147483647, %v7693_v18  ;;  %vm7826_vm10 = vmor %vm3384_vm8, %vm3385_vm6  ;;  %v2926_v54 = vmul.f32 %v7458_v56, %v2925_v44  ;;  %v3391_v3 = vor.u32 1.1754944e-38, %v3390_v41 }
 0x8c7   : > { %v2945_v18 = vmul.f32 %v7780_v35, %v2944_v23  ;;  %v2935_v56 = vsel %vm7831_vm11, %v7728_v9, %v2931_v25  ;;  %v2939_v59 = vor.u32 1.1754944e-38, %v2938_v52  ;;  %vm3389_vm12 = vcmp.eq.f32.partialorder %v3388_v15, 8.507059e+37 }
 0x8c8   : > { %v3383_v33 = vadd.f32 %v7760_v19, %v3382_v49  ;;  %vm2937_vm13 = vcmp.eq.f32.partialorder %v2936_v37, 8.507059e+37  ;;  %vm2948_vm15 = vweird.f32 %v7780_v35  ;;  %v3405_v20 = vand.u32 2147483648, %v7765_v6 }
 0x8c9   : > { %v7797_v5 = vpop.eup %5491  ;;  %4900 = vmatmul.msk.f32.gmra.mxu0 %vm586_vm0, %v2911_v13  ;;  %v2946_v38 = vadd.f32 %v7780_v35, %v2945_v18  ;;  %v2953_v40 = vand.u32 2147483648, %v7726_v53  ;;  %vm3399_vm2 = vweird.f32 %v7765_v6  ;;  %v3403_v9 = vand.u32 2147483647, %v7765_v6 }
 0x8ca   : > { %v3395_v28 = vmul.f32 %v7797_v5, %v7765_v6  ;;  %v7815_v61 = vpop.eup %5493  ;;  %v3387_v11 = vsel %vm7826_vm10, %v7760_v19, %v3383_v33  ;;  %vm3400_vm14 = vweird.f32 %v7797_v5  ;;  %v2940_v19 = vsel %vm2937_vm13, %v2939_v59, %v2935_v56 }
 0x8cb   : > { %v3410_v8 = vmul.f32 %v7815_v61, %v7776_v2  ;;  %v3392_v12 = vsel %vm3389_vm12, %v3391_v3, %v3387_v11  ;;  %vm2947_vm3 = vweird.f32 %v7726_v53  ;;  %v2951_v49 = vand.u32 2147483647, %v7726_v53  ;;  %vm7858_vm4 = vmor %vm3399_vm2, %vm3400_vm14 }
 0x8cc   : > { %v3396_v17 = vsub.f32 1.0, %v3395_v28  ;;  %v3393_v13 = vmul.f32 %v7533_v62, %v3392_v12  ;;  %v2941_v58 = vmul.f32 %v7463_v14, %v2940_v19  ;;  %vm7863_vm5 = vmor %vm2947_vm3, %vm2948_vm15  ;;  %v3406_v53 = vor.u32 1.1754944e-38, %v3405_v20  ;;  %v4082_v41 = vpop.permute.xlu2 %4081 }
 0x8cd   : > { %v3613_v48 = vpop.permute.xlu0 %3612  ;;  %v3411_v39 = vsub.f32 1.0, %v3410_v8  ;;  %v2950_v14 = vsel %vm7863_vm5, %v7780_v35, %v2946_v38  ;;  %v2954_v28 = vor.u32 1.1754944e-38, %v2953_v40  ;;  %vm3404_vm6 = vcmp.eq.f32.partialorder %v3403_v9, 8.507059e+37 }
 0x8ce   : > { %v3397_v47 = vmul.f32 %v7797_v5, %v3396_v17  ;;  %4932 = vmatmul.msk.f32.gmra.mxu3 %vm586_vm0, %v3378_v57  ;;  %vm2952_vm7 = vcmp.eq.f32.partialorder %v2951_v49, 8.507059e+37  ;;  %vm3415_vm8 = vweird.f32 %v7815_v61  ;;  %v3420_v17 = vand.u32 2147483648, %v7776_v2 }
 0x8cf   : > { %v3412_v27 = vmul.f32 %v7815_v61, %v3411_v39  ;;  %vm3414_vm9 = vweird.f32 %v7776_v2  ;;  %v3418_v44 = vand.u32 2147483647, %v7776_v2 }
 0x8d0   : > { %v3398_v63 = vadd.f32 %v7797_v5, %v3397_v47  ;;  %vm3416_vm10 = vmor %vm3414_vm9, %vm3415_vm8  ;;  %v3421_v52 = vor.u32 1.1754944e-38, %v3420_v17 }
 0x8d1   : > { %4901 = vmatmul.msk.f32.gmra.mxu0 %vm586_vm0, %v2926_v54  ;;  %v3413_v33 = vadd.f32 %v7815_v61, %v3412_v27  ;;  %vm3419_vm11 = vcmp.eq.f32.partialorder %v3418_v44, 8.507059e+37 }
 0x8d2   : > { %v3402_v62 = vsel %vm7858_vm4, %v7797_v5, %v3398_v63  ;;  %v2955_v5 = vsel %vm2952_vm7, %v2954_v28, %v2950_v14 }
 0x8d3   : > { %v3407_v45 = vsel %vm3404_vm6, %v3406_v53, %v3402_v62  ;;  %v2956_v25 = vmul.f32 %v7471_v34, %v2955_v5  ;;  %v3417_v23 = vsel %vm3416_vm10, %v7815_v61, %v3413_v33  ;;  %v8427_v33 = vld [vmem:[#allocation29_spill] sm:$0xff] }
 0x8d4   : > { %v3408_v35 = vmul.f32 %v7541_v22, %v3407_v45  ;;  %v3422_v22 = vsel %vm3419_vm11, %v3421_v52, %v3417_v23  ;;  %v3607_v61 = vpop.permute.xlu2 %3606  ;;  %v1695_v5 = vadd.f32 %v8427_v33, %v7306_v30  ;;  %v8440_v33 = vld [vmem:[#allocation44_spill] sm:$0xff] }
 0x8d5   : > { %v3611_v43 = vpop.permute.xlu0 %3610  ;;  %v3423_v57 = vmul.f32 %v7535_v46, %v3422_v22 }
 0x8d6   : > { %4933 = vmatmul.msk.f32.gmra.mxu3 %vm586_vm0, %v3393_v13 }
 0x8d9   : > { %4902 = vmatmul.msk.f32.gmra.mxu0 %vm586_vm0, %v2941_v58 }
 0x8da   : > { %v3617_v6 = vpop.permute.xlu1 %3616 }
 0x8db   : > { %4944 = vmatpush.xpose.msk.msra.mxu1 %vm831_vm1, %v3617_v6 }
 0x8dc   : > { %v4076_v46 = vpop.permute.xlu2 %4075 }
 0x8dd   : > { %v4080_v2 = vpop.permute.xlu0 %4079 }
 0x8de   : > { %4934 = vmatmul.msk.f32.gmra.mxu3 %vm586_vm0, %v3408_v35  ;;  %v2177_v35 = vadd.f32 %v7347_v29, %v1695_v5 }
 0x8df   : > { %4945 = vmatpush.xpose.msk.msra.mxu1 %vm831_vm1, %v3615_v51 }
 0x8e1   : > { %4903 = vmatmul.msk.f32.gmra.mxu0 %vm586_vm0, %v2956_v25  ;;  %v2644_v25 = vadd.f32 %v7345_v21, %v2177_v35  ;;  %v8441_v35 = vld [vmem:[#allocation45_spill] sm:$0xff] }
 0x8e2   : > { %v4084_v15 = vpop.permute.xlu1 %4083 }
 0x8e3   : > { %4946 = vmatpush.xpose.msk.msra.mxu1 %vm831_vm1, %v3613_v48  ;;  %4976 = vmatpush.xpose.msk.msrb.mxu0 %vm831_vm1, %v4084_v15  ;;  %v8428_v15 = vld [vmem:[#allocation30_spill] sm:$0xff] }
 0x8e4   : > { %v3587_v6 = vpop.permute.xlu2 %3586  ;;  %v1698_v22 = vadd.f32 %v8428_v15, %v7310_v10 }
 0x8e5   : > { %v3605_v37 = vpop.permute.xlu0 %3604 }
 0x8e6   : > { %4935 = vmatmul.msk.f32.gmra.mxu3 %vm586_vm0, %v3423_v57  ;;  %v2178_v30 = vadd.f32 %v7351_v55, %v1698_v22 }
 0x8e7   : > { %4947 = vmatpush.xpose.msk.msra.mxu1 %vm831_vm1, %v3611_v43  ;;  %4977 = vmatpush.xpose.msk.msrb.mxu0 %vm831_vm1, %v4082_v41 }
 0x8e8   : > { %v2645_v29 = vadd.f32 %v7349_v36, %v2178_v30  ;;  %v8444_v30 = vld [vmem:[#allocation46_spill] sm:$0xff] }
 0x8ea   : > { %v3609_v34 = vpop.permute.xlu1 %3608 }
 0x8eb   : > { %4948 = vmatpush.xpose.msk.msra.mxu1 %vm831_vm1, %v3609_v34  ;;  %4978 = vmatpush.xpose.msk.msrb.mxu0 %vm831_vm1, %v4080_v2 }
 0x8ec   : > { %v3589_v28 = vpop.permute.xlu2 %3588 }
 0x8ed   : > { %v4074_v54 = vpop.permute.xlu0 %4073 }
 0x8ef   : > { %4949 = vmatpush.xpose.msk.msra.mxu1 %vm831_vm1, %v3607_v61 }
 0x8f2   : > { %v4078_v60 = vpop.permute.xlu1 %4077 }
 0x8f3   : > { %4950 = vmatpush.xpose.msk.msra.mxu1 %vm831_vm1, %v3605_v37  ;;  %4979 = vmatpush.xpose.msk.msrb.mxu0 %vm831_vm1, %v4078_v60 }
 0x8f4   : > { %v4056_v45 = vpop.permute.xlu2 %4055 }
 0x8f5   : > { %v4070_v11 = vpop.permute.xlu0 %4069 }
 0x8f7   : > { %4980 = vmatpush.xpose.msk.msrb.mxu0 %vm831_vm1, %v4076_v46 }
 0x8fa   : > { %v3603_v7 = vpop.permute.xlu1 %3602 }
 0x8fb   : > { %4951 = vmatpush.xpose.msk.msra.mxu1 %vm831_vm1, %v3603_v7  ;;  %4981 = vmatpush.xpose.msk.msrb.mxu0 %vm831_vm1, %v4074_v54  ;;  %v8429_v54 = vld [vmem:[#allocation31_spill] sm:$0xff] }
 0x8fc   : > { %v3595_v23 = vpop.permute.xlu2 %3594  ;;  %v1701_v7 = vadd.f32 %v8429_v54, %v7317_v4 }
 0x8fd   : > { %v3591_v43 = vpop.permute.xlu0 %3590 }
 0x902   : > { %v4072_v8 = vpop.permute.xlu1 %4071  ;;  %v3022_v47 = vpop.f32.mrf.mxu0 }
 0x903   : > { %4904 = vmatmul.msk.f32.vlgmr.msrb.gmra.mxu1 %vm831_vm1, %v3022_v47  ;;  %4982 = vmatpush.xpose.msk.msrb.mxu0 %vm831_vm1, %v4072_v8  ;;  %v2179_v8 = vadd.f32 %v7355_v32, %v1701_v7 }
 0x904   : > { %v4062_v60 = vpop.permute.xlu2 %4061 }
 0x905   : > { %v4058_v17 = vpop.permute.xlu0 %4057 }
 0x907   : > { %4983 = vmatpush.xpose.msk.msrb.mxu0 %vm831_vm1, %v4070_v11  ;;  %v2646_v11 = vadd.f32 %v7353_v50, %v2179_v8 }
 0x90a   : > { %v4054_v18 = vpop.permute.xlu1 %4053  ;;  %v3025_v3 = vpop.f32.mrf.mxu0 }
 0x90b   : > { %4905 = vmatmul.msk.f32.gmra.mxu1 %vm831_vm1, %v3025_v3  ;;  %v3489_v48 = vpop.f32.mrf.mxu3 }
 0x90c   : > { %4936 = vmatmul.msk.f32.vlgmr.msra.gmra.mxu0 %vm831_vm1, %v3489_v48  ;;  %v3601_v55 = vpop.permute.xlu2 %3600  ;;  %v8430_v48 = vld [vmem:[#allocation32_spill] sm:$0xff] }
 0x90d   : > { %v3597_v34 = vpop.permute.xlu0 %3596 }
 0x912   : > { %v3593_v56 = vpop.permute.xlu1 %3592  ;;  %v3028_v59 = vpop.f32.mrf.mxu0 }
 0x913   : > { %4906 = vmatmul.msk.f32.gmra.mxu1 %vm831_vm1, %v3028_v59  ;;  %v3492_v12 = vpop.f32.mrf.mxu3 }
 0x914   : > { %4937 = vmatmul.msk.f32.gmra.mxu0 %vm831_vm1, %v3492_v12 }
 0x915   : > { %v4064_v10 = vpop.permute.xlu0 %4063 }
 0x91a   : > { %v4060_v39 = vpop.permute.xlu1 %4059 }
 0x91d   : > { %v4068_v36 = vpop.permute.xlu0 %4067 }
 0x922   : > { %v3599_v63 = vpop.permute.xlu1 %3598 }
 0x92a   : > { %v7909_v19 = vpop.permute.xlu1 %4065 }
 0x932   : > { %v5261_v38 = vpop.permute.xlu1 %5260 }
 0x933   : > { %v5262_v20 = vunpack.i.l.bf16 %v5261_v38  ;;  %v5263_v40 = vunpack.i.h.bf16 %v5261_v38 }
 0x935   : > { %3947 = vmatpush.msrb.mxu2 %v5262_v20  ;;  %v8432_v20 = vld [vmem:[#allocation41_spill] sm:$0xff] }
 0x937   : > { %3948 = vmatpush.msrb.mxu2 %v5263_v40 }
 0x93e   : > { %v3031_v9 = vpop.f32.mrf.mxu0 }
 0x93f   : > { %4907 = vmatmul.msk.f32.gmra.mxu1 %vm831_vm1, %v3031_v9 }
 0x941   : > { %v3495_v13 = vpop.f32.mrf.mxu3 }
 0x942   : > { %4938 = vmatmul.msk.f32.gmra.mxu0 %vm831_vm1, %v3495_v13  ;;  %v8433_v13 = vld [vmem:[#allocation40_spill] sm:$0xff] }
 0x946   : > { %v3034_v49 = vpop.f32.mrf.mxu0 }
 0x947   : > { %4908 = vmatmul.msk.f32.gmra.mxu1 %vm831_vm1, %v3034_v49 }
 0x949   : > { %v3498_v51 = vpop.f32.mrf.mxu3 }
 0x94a   : > { %4939 = vmatmul.msk.f32.gmra.mxu0 %vm831_vm1, %v3498_v51  ;;  %v8435_v51 = vld [vmem:[#allocation34_spill] sm:$0xff] }
 0x94e   : > { %v3037_v0 = vpop.f32.mrf.mxu0 }
 0x94f   : > { %4909 = vmatmul.msk.f32.gmra.mxu1 %vm831_vm1, %v3037_v0 }
 0x951   : > { %v3501_v58 = vpop.f32.mrf.mxu3 }
 0x952   : > { %4940 = vmatmul.msk.f32.gmra.mxu0 %vm831_vm1, %v3501_v58 }
 0x956   : > { %v3040_v24 = vpop.f32.mrf.mxu0 }
 0x957   : > { %4910 = vmatmul.msk.f32.gmra.mxu1 %vm831_vm1, %v3040_v24  ;;  %v8436_v24 = vld [vmem:[#allocation42_spill] sm:$0xff] }
 0x959   : > { %v3504_v27 = vpop.f32.mrf.mxu3 }
 0x95a   : > { %4941 = vmatmul.msk.f32.gmra.mxu0 %vm831_vm1, %v3504_v27 }
 0x95e   : > { %v3043_v62 = vpop.f32.mrf.mxu0 }
 0x95f   : > { %4911 = vmatmul.msk.f32.gmra.mxu1 %vm831_vm1, %v3043_v62 }
 0x961   : > { %v3507_v53 = vpop.f32.mrf.mxu3 }
 0x962   : > { %4942 = vmatmul.msk.f32.gmra.mxu0 %vm831_vm1, %v3507_v53 }
 0x967   : > { %4952 = vmatmul.msk.f32.vlgmr.msra.gmra.mxu1 %vm831_vm1, %v3587_v6  ;;  %v8438_v6 = vld [vmem:[#allocation38_spill] sm:$0xff] }
 0x969   : > { %v3510_v14 = vpop.f32.mrf.mxu3 }
 0x96a   : > { %4943 = vmatmul.msk.f32.gmra.mxu0 %vm831_vm1, %v3510_v14  ;;  %v8439_v14 = vld [vmem:[#allocation35_spill] sm:$0xff] }
 0x96f   : > { %4953 = vmatmul.msk.f32.gmra.mxu1 %vm831_vm1, %v3589_v28  ;;  %v1713_v28 = vadd.f32 %v8439_v14, %v8438_v6 }
 0x971   : > { %v2183_v5 = vadd.f32 %v8440_v33, %v1713_v28 }
 0x972   : > { %4984 = vmatmul.msk.f32.vlgmr.msrb.gmra.mxu0 %vm831_vm1, %v4054_v18 }
 0x977   : > { %4954 = vmatmul.msk.f32.gmra.mxu1 %vm831_vm1, %v3591_v43 }
 0x97a   : > { %4985 = vmatmul.msk.f32.gmra.mxu0 %vm831_vm1, %v4056_v45 }
 0x97f   : > { %4955 = vmatmul.msk.f32.gmra.mxu1 %vm831_vm1, %v3593_v56  ;;  %v1704_v56 = vadd.f32 %v8430_v48, %v7322_v1  ;;  %v8434_v1 = vld [vmem:[#allocation37_spill] sm:$0xff] }
 0x980   : > { %v3087_v44 = vpop.f32.mrf.mxu1  ;;  %v1710_v0 = vadd.f32 %v8435_v51, %v8434_v1 }
 0x981   : > { %v3111_v41 = vadd.f32 %v3087_v44, %v2644_v25  ;;  %v2180_v12 = vadd.f32 %v7359_v16, %v1704_v56  ;;  %v2650_v25 = vadd.f32 %v8441_v35, %v2183_v5 }
 0x982   : > { %4986 = vmatmul.msk.f32.gmra.mxu0 %vm831_vm1, %v4058_v17  ;;  %v2182_v27 = vadd.f32 %v8436_v24, %v1710_v0  ;;  %v5591_v24 = vld [vmem:[#allocation3 + $0x8] sm:$0xff] }
 0x987   : > { %4956 = vmatmul.msk.f32.gmra.mxu1 %vm831_vm1, %v3595_v23  ;;  %v8442_v23 = vld [vmem:[#allocation39_spill] sm:$0xff] }
 0x988   : > { %v3090_v57 = vpop.f32.mrf.mxu1 }
 0x989   : > { %v3554_v52 = vpop.f32.mrf.mxu0  ;;  %v3112_v21 = vadd.f32 %v3090_v57, %v2645_v29 }
 0x98a   : > { %v7936_v2 = vadd.f32 %v3554_v52, %v3111_v41  ;;  %4987 = vmatmul.msk.f32.gmra.mxu0 %vm831_vm1, %v4060_v39  ;;  %v8443_v41 = vld [vmem:[#allocation36_spill] sm:$0xff] }
 0x98b   : > { %v1716_v52 = vadd.f32 %v8443_v41, %v8442_v23 }
 0x98d   : > { %v2184_v57 = vadd.f32 %v8444_v30, %v1716_v52  ;;  %v5271_v30 = vpop.permute.xlu0 %5270 }
 0x98f   : > { %4957 = vmatmul.msk.f32.gmra.mxu1 %vm831_vm1, %v3597_v34 }
 0x990   : > { %v3093_v46 = vpop.f32.mrf.mxu1 }
 0x991   : > { %v3557_v61 = vpop.f32.mrf.mxu0  ;;  %v3113_v18 = vadd.f32 %v3093_v46, %v2646_v11 }
 0x992   : > { %v7942_v37 = vadd.f32 %v3557_v61, %v3112_v21  ;;  %4988 = vmatmul.msk.f32.gmra.mxu0 %vm831_vm1, %v4062_v60  ;;  %v8445_v61 = vld [vmem:[#allocation47_spill] sm:$0xff] }
 0x993   : > { %v2651_v60 = vadd.f32 %v8445_v61, %v2184_v57 }
 0x997   : > { %4958 = vmatmul.msk.f32.gmra.mxu1 %vm831_vm1, %v3599_v63  ;;  %v2647_v63 = vadd.f32 %v7357_v42, %v2180_v12 }
 0x99a   : > { %4989 = vmatmul.msk.f32.gmra.mxu0 %vm831_vm1, %v4064_v10 }
 0x99f   : > { %4959 = vmatmul.msk.f32.gmra.mxu1 %vm831_vm1, %v3601_v55 }
 0x9a2   : > { %4990 = vmatmul.msk.f32.gmra.mxu0 %vm831_vm1, %v7909_v19  ;;  %v8431_v19 = vld [vmem:[#allocation33_spill] sm:$0xff] }
 0x9a3   : > { %v1707_v4 = vadd.f32 %v8431_v19, %v7326_v26  ;;  %v8437_v26 = vld [vmem:[#allocation43_spill] sm:$0xff] }
 0x9a4   : > { %v2649_v53 = vadd.f32 %v8437_v26, %v2182_v27  ;;  %v5592_v27 = vld [vmem:[#allocation3] sm:$0xff] }
 0x9a5   : > { %v2181_v40 = vadd.f32 %v8432_v20, %v1707_v4 }
 0x9a7   : > { %v2648_v49 = vadd.f32 %v8433_v13, %v2181_v40 }
 0x9aa   : > { %4991 = vmatmul.msk.f32.gmra.mxu0 %vm831_vm1, %v4068_v36 }
 0x9bc   : > { %v3096_v47 = vpop.f32.mrf.mxu1 }
 0x9bd   : > { %v3114_v38 = vadd.f32 %v3096_v47, %v2647_v63 }
 0x9bf   : > { %v3560_v3 = vpop.f32.mrf.mxu0 }
 0x9c0   : > { %v7957_v59 = vadd.f32 %v3560_v3, %v3113_v18  ;;  %v5589_v18 = vld [vmem:[#allocation3 + $0x28] sm:$0xff]  ;;  %v5590_v3 = vld [vmem:[#allocation3 + $0x20] sm:$0xff] }
 0x9c1   : > { %v5264_v48 = vpack.i.bf16 %v5590_v3, %v5589_v18 }
 0x9c4   : > { %v3099_v39 = vpop.f32.mrf.mxu1 }
 0x9c5   : > { %v3115_v58 = vadd.f32 %v3099_v39, %v2648_v49 }
 0x9c7   : > { %v3563_v32 = vpop.f32.mrf.mxu0 }
 0x9c8   : > { %v7964_v50 = vadd.f32 %v3563_v32, %v3114_v38 }
 0x9cc   : > { %v3102_v9 = vpop.f32.mrf.mxu1 }
 0x9cd   : > { %v3116_v43 = vadd.f32 %v3102_v9, %v2649_v53 }
 0x9cf   : > { %v3566_v16 = vpop.f32.mrf.mxu0 }
 0x9d0   : > { %v7970_v42 = vadd.f32 %v3566_v16, %v3115_v58 }
 0x9d4   : > { %v3105_v62 = vpop.f32.mrf.mxu1 }
 0x9d5   : > { %v3117_v15 = vadd.f32 %v3105_v62, %v2650_v25  ;;  %v8014_v62 = vpack.i.bf16 %v5592_v27, %v5591_v24 }
 0x9d7   : > { %v3569_v45 = vpop.f32.mrf.mxu0 }
 0x9d8   : > { %v7976_v17 = vadd.f32 %v3569_v45, %v3116_v43 }
 0x9dc   : > { %v3108_v44 = vpop.f32.mrf.mxu1 }
 0x9dd   : > { %v3118_v55 = vadd.f32 %v3108_v44, %v2651_v60 }
 0x9df   : > { %v3572_v22 = vpop.f32.mrf.mxu0 }
 0x9e0   : > { %v7982_v29 = vadd.f32 %v3572_v22, %v3117_v15 }
 0x9e4   : > { %v3667_v34 = vpop.f32.mrf.mxu1 }
 0x9e5   : > { %v3691_v21 = vmul.f32 0.35355338, %v3667_v34 }
 0x9e7   : > { %v3699_v10 = vsel %vm586_vm0, %v3691_v21, -inf  ;;  %v3575_v36 = vpop.f32.mrf.mxu0 }
 0x9e8   : > { %3700 = vmax.xlane.f32.xlu2 %v3699_v10  ;;  %v7986_v46 = vadd.f32 %v3575_v36, %v3118_v55  ;;  %v5272_v10 = vunpack.i.l.bf16 %v5271_v30  ;;  %v5273_v36 = vunpack.i.h.bf16 %v5271_v30 }
 0x9ec   : > { %v3670_v54 = vpop.f32.mrf.mxu1 }
 0x9ed   : > { %v3692_v7 = vmul.f32 0.35355338, %v3670_v54 }
 0x9ef   : > { %v3702_v8 = vsel %vm586_vm0, %v3692_v7, -inf  ;;  %v4134_v56 = vpop.f32.mrf.mxu0 }
 0x9f0   : > { %3703 = vmax.xlane.f32.xlu1 %v3702_v8  ;;  %v7998_v20 = vmul.f32 0.35355338, %v4134_v56 }
 0x9f2   : > { %v4166_v40 = vsel %vm586_vm0, %v7998_v20, -inf }
 0x9f4   : > { %v3673_v47 = vpop.f32.mrf.mxu1 }
 0x9f5   : > { %v8006_v1 = vmul.f32 0.35355338, %v3673_v47 }
 0x9f7   : > { %v4137_v38 = vpop.f32.mrf.mxu0  ;;  %v3705_v51 = vsel %vm586_vm0, %v8006_v1, -inf }
 0x9f8   : > { %v8037_v54 = vmul.f32 0.35355338, %v4137_v38 }
 0x9fc   : > { %v3676_v11 = vpop.f32.mrf.mxu1 }
 0x9fd   : > { %v8010_v0 = vmul.f32 0.35355338, %v3676_v11  ;;  %v4169_v11 = vsel %vm586_vm0, %v8037_v54, -inf }
 0x9ff   : > { %v4140_v9 = vpop.f32.mrf.mxu0  ;;  %v3708_v16 = vsel %vm586_vm0, %v8010_v0, -inf }
 0xa00   : > { %5265 = vrot.lane.b32.xlu2 %v5264_v48, %s5886_s2  ;;  %v8002_v13 = vmul.f32 0.35355338, %v4140_v9 }
 0xa02   : > { %v4172_v49 = vsel %vm586_vm0, %v8002_v13, -inf }
 0xa04   : > { %v3679_v12 = vpop.f32.mrf.mxu1 }
 0xa05   : > { %v7990_v39 = vmul.f32 0.35355338, %v3679_v12 }
 0xa07   : > { %v3711_v63 = vsel %vm586_vm0, %v7990_v39, -inf  ;;  %v4143_v43 = vpop.f32.mrf.mxu0 }
 0xa08   : > { %3712 = vmax.xlane.f32.xlu1 %v3711_v63 }
 0xa0c   : > { %v3682_v19 = vpop.f32.mrf.mxu1 }
 0xa0d   : > { %v7994_v4 = vmul.f32 0.35355338, %v3682_v19 }
 0xa0f   : > { %v3714_v32 = vsel %vm586_vm0, %v7994_v4, -inf  ;;  %v4146_v45 = vpop.f32.mrf.mxu0 }
 0xa10   : > { %3715 = vmax.xlane.f32.xlu0 %v3714_v32  ;;  %v8051_v56 = vmul.f32 0.35355338, %v4146_v45 }
 0xa12   : > { %v4178_v63 = vsel %vm586_vm0, %v8051_v56, -inf }
 0xa14   : > { %v3685_v58 = vpop.f32.mrf.mxu1 }
 0xa15   : > { %v8016_v26 = vmul.f32 0.35355338, %v3685_v58 }
 0xa17   : > { %v3717_v53 = vsel %vm586_vm0, %v8016_v26, -inf  ;;  %v4149_v33 = vpop.f32.mrf.mxu0 }
 0xa18   : > { %4167 = vmax.xlane.f32.xlu0 %v4166_v40  ;;  %v8027_v25 = vmul.f32 0.35355338, %v4149_v33 }
 0xa1a   : > { %v4181_v57 = vsel %vm586_vm0, %v8027_v25, -inf }
 0xa1c   : > { %v3688_v6 = vpop.f32.mrf.mxu1 }
 0xa1d   : > { %v8022_v14 = vmul.f32 0.35355338, %v3688_v6 }
 0xa1f   : > { %v3720_v28 = vsel %vm586_vm0, %v8022_v14, -inf  ;;  %v4152_v52 = vpop.f32.mrf.mxu0 }
 0xa20   : > { %4173 = vmax.xlane.f32.xlu0 %v4172_v49  ;;  %v8035_v55 = vmul.f32 0.35355338, %v4152_v52 }
 0xa27   : > { %v4155_v47 = vpop.f32.mrf.mxu0 }
 0xa28   : > { %v8047_v3 = vmul.f32 0.35355338, %v4155_v47 }
 0xa29   : > { %3706 = vmax.xlane.f32.xlu2 %v3705_v51 }
 0xa2a   : > { %v4187_v12 = vsel %vm586_vm0, %v8047_v3, -inf }
 0xa31   : > { %3709 = vmax.xlane.f32.xlu2 %v3708_v16 }
 0xa34   : > { %5280 = vrot.lane.b32.xlu0 %v8014_v62, %s5886_s2 }
 0xa39   : > { %3718 = vmax.xlane.f32.xlu2 %v3717_v53 }
 0xa3c   : > { %5285 = vrot.lane.b32.xlu0 %v5264_v48, %s5887_s4  ;;  %v8049_v48 = vmul.f32 0.35355338, %v4143_v43 }
 0xa3e   : > { %v4175_v19 = vsel %vm586_vm0, %v8049_v48, -inf }
 0xa41   : > { %3721 = vmax.xlane.f32.xlu2 %v3720_v28  ;;  %v5594_v28 = vld [vmem:[#allocation3 + $0x10] sm:$0xff] }
 0xa5b   : > { %v3701_v5 = vpop.xlane.xlu2 %3700 }
 0xa5c   : > { %v3723_v44 = vsub.f32 %v3691_v21, %v3701_v5 }
 0xa5e   : > { %v3731_v35 = vmul.f32 1.442695, %v3723_v44 }
 0xa60   : > { %5495 = vpow2.f32 %v3731_v35 }
 0xa63   : > { %v5266_v23 = vpop.permute.xlu2 %5265  ;;  %v3704_v41 = vpop.xlane.xlu1 %3703 }
 0xa64   : > { %v5267_v15 = vunpack.i.l.bf16 %v5266_v23  ;;  %v3724_v22 = vsub.f32 %v3692_v7, %v3704_v41  ;;  %v5268_v61 = vunpack.i.h.bf16 %v5266_v23  ;;  %v4184_v7 = vsel %vm586_vm0, %v8035_v55, -inf }
 0xa66   : > { %v8031_v34 = vpop.eup %5495  ;;  %v3733_v60 = vmul.f32 1.442695, %v3724_v22  ;;  %3949 = vmatpush.msrb.mxu2 %v5267_v15  ;;  %4182 = vmax.xlane.f32.xlu0 %v4181_v57 }
 0xa67   : > { %v3747_v21 = vsel %vm586_vm0, %v8031_v34, 0.0 }
 0xa68   : > { %5497 = vpow2.f32 %v3733_v60  ;;  %3950 = vmatpush.msrb.mxu2 %v5268_v61  ;;  %3748 = vadd.xlane.f32.xlu1 %v3747_v21 }
 0xa6a   : > { %3951 = vmatpush.msrb.mxu2 %v5272_v10 }
 0xa6c   : > { %3952 = vmatpush.msrb.mxu2 %v5273_v36 }
 0xa6e   : > { %v8041_v8 = vpop.eup %5497  ;;  %4185 = vmax.xlane.f32.xlu0 %v4184_v7 }
 0xa6f   : > { %v3750_v18 = vsel %vm586_vm0, %v8041_v8, 0.0 }
 0xa70   : > { %4170 = vmax.xlane.f32.xlu1 %v4169_v11  ;;  %3751 = vadd.xlane.f32.xlu2 %v3750_v18 }
 0xa76   : > { %4188 = vmax.xlane.f32.xlu0 %v4187_v12 }
 0xa78   : > { %4179 = vmax.xlane.f32.xlu1 %v4178_v63  ;;  %4176 = vmax.xlane.f32.xlu2 %v4175_v19 }
 0xa7b   : > { %v3713_v45 = vpop.xlane.xlu1 %3712 }
 0xa7c   : > { %v3727_v33 = vsub.f32 %v7990_v39, %v3713_v45 }
 0xa7e   : > { %v3739_v5 = vmul.f32 1.442695, %v3727_v33 }
 0xa83   : > { %v8059_v38 = vpop.xlane.xlu0 %3715 }
 0xa8b   : > { %v4168_v32 = vpop.xlane.xlu0 %4167 }
 0xa8c   : > { %v4190_v40 = vsub.f32 %v7998_v20, %v4168_v32  ;;  %v5593_v20 = vld [vmem:[#allocation3 + $0x18] sm:$0xff] }
 0xa8d   : > { %v5289_v43 = vpack.i.bf16 %v5594_v28, %v5593_v20 }
 0xa8e   : > { %v4198_v9 = vmul.f32 1.442695, %v4190_v40 }
 0xa90   : > { %5499 = vpow2.f32 %v4198_v9 }
 0xa91   : > { %5275 = vrot.lane.b32.xlu1 %v7695_v31, %s5887_s4 }
 0xa93   : > { %v4174_v58 = vpop.xlane.xlu0 %4173 }
 0xa94   : > { %v4192_v35 = vsub.f32 %v8002_v13, %v4174_v58 }
 0xa96   : > { %v8064_v49 = vpop.eup %5499  ;;  %v4202_v41 = vmul.f32 1.442695, %v4192_v35 }
 0xa97   : > { %v4214_v51 = vsel %vm586_vm0, %v8064_v49, 0.0 }
 0xa98   : > { %4215 = vadd.xlane.f32.xlu0 %v4214_v51 }
 0xa9c   : > { %v3707_v16 = vpop.xlane.xlu2 %3706 }
 0xa9d   : > { %v3725_v53 = vsub.f32 %v8006_v1, %v3707_v16 }
 0xa9f   : > { %v3735_v31 = vmul.f32 1.442695, %v3725_v53 }
 0xaa1   : > { %5501 = vpow2.f32 %v3735_v31 }
 0xaa2   : > { %5503 = vpow2.f32 %v3739_v5 }
 0xaa3   : > { %5505 = vpow2.f32 %v4202_v41 }
 0xaa4   : > { %v3710_v23 = vpop.xlane.xlu2 %3709 }
 0xaa5   : > { %v3726_v39 = vsub.f32 %v8010_v0, %v3710_v23 }
 0xaa6   : > { %v5281_v24 = vpop.permute.xlu0 %5280 }
 0xaa7   : > { %v5282_v27 = vunpack.i.l.bf16 %v5281_v24  ;;  %v5283_v6 = vunpack.i.h.bf16 %v5281_v24  ;;  %v8071_v44 = vpop.eup %5501  ;;  %v3737_v57 = vmul.f32 1.442695, %v3726_v39 }
 0xaa8   : > { %v3753_v1 = vsel %vm586_vm0, %v8071_v44, 0.0  ;;  %v8076_v52 = vpop.eup %5503 }
 0xaa9   : > { %3953 = vmatpush.msrb.mxu2 %v5282_v27  ;;  %v3759_v15 = vsel %vm586_vm0, %v8076_v52, 0.0  ;;  %v8081_v30 = vpop.eup %5505  ;;  %5507 = vpow2.f32 %v3737_v57 }
 0xaaa   : > { %v4220_v13 = vsel %vm586_vm0, %v8081_v30, 0.0 }
 0xaab   : > { %3954 = vmatpush.msrb.mxu2 %v5283_v6 }
 0xaac   : > { %5290 = vrot.lane.b32.xlu0 %v5289_v43, %s5887_s4  ;;  %v3719_v22 = vpop.xlane.xlu2 %3718 }
 0xaad   : > { %v3729_v61 = vsub.f32 %v8016_v26, %v3719_v22  ;;  %v3728_v22 = vsub.f32 %v7994_v4, %v8059_v38 }
 0xaae   : > { %v8086_v10 = vpop.permute.xlu0 %5285 }
 0xaaf   : > { %v3743_v60 = vmul.f32 1.442695, %v3729_v61  ;;  %v8088_v36 = vpop.eup %5507 }
 0xab0   : > { %v3756_v0 = vsel %vm586_vm0, %v8088_v36, 0.0 }
 0xab1   : > { %5509 = vpow2.f32 %v3743_v60 }
 0xab4   : > { %v3722_v21 = vpop.xlane.xlu2 %3721 }
 0xab5   : > { %v3730_v7 = vsub.f32 %v8022_v14, %v3722_v21  ;;  %v3741_v21 = vmul.f32 1.442695, %v3728_v22 }
 0xab7   : > { %v3745_v47 = vmul.f32 1.442695, %v3730_v7  ;;  %v8095_v18 = vpop.eup %5509 }
 0xab8   : > { %v3765_v12 = vsel %vm586_vm0, %v8095_v18, 0.0 }
 0xab9   : > { %5511 = vpow2.f32 %v3745_v47 }
 0xabb   : > { %3754 = vadd.xlane.f32.xlu1 %v3753_v1 }
 0xabf   : > { %v8099_v63 = vpop.eup %5511 }
 0xac0   : > { %v3768_v16 = vsel %vm586_vm0, %v8099_v63, 0.0 }
 0xac3   : > { %3760 = vadd.xlane.f32.xlu1 %v3759_v15 }
 0xacb   : > { %4221 = vadd.xlane.f32.xlu1 %v4220_v13 }
 0xad6   : > { %3757 = vadd.xlane.f32.xlu0 %v3756_v0 }
 0xad9   : > { %v8093_v11 = vpop.xlane.xlu0 %4182 }
 0xadb   : > { %v3749_v26 = vpop.xlane.xlu1 %3748 }
 0xadc   : > { %5513 = vrcp.f32 %v3749_v26  ;;  %v3782_v24 = vand.u32 2147483648, %v3749_v26  ;;  %v3780_v6 = vand.u32 2147483647, %v3749_v26  ;;  %vm3776_vm13 = vweird.f32 %v3749_v26 }
 0xade   : > { %3766 = vadd.xlane.f32.xlu0 %v3765_v12  ;;  %v3783_v31 = vor.u32 1.1754944e-38, %v3782_v24  ;;  %vm3781_vm15 = vcmp.eq.f32.partialorder %v3780_v6, 8.507059e+37  ;;  %v4195_v12 = vsub.f32 %v8027_v25, %v8093_v11 }
 0xae1   : > { %v8101_v14 = vpop.xlane.xlu0 %4185 }
 0xae2   : > { %v5514_v19 = vpop.eup %5513 }
 0xae3   : > { %v3772_v32 = vmul.f32 %v5514_v19, %v3749_v26  ;;  %v4171_v40 = vpop.xlane.xlu1 %4170  ;;  %v3752_v9 = vpop.xlane.xlu2 %3751  ;;  %vm3777_vm12 = vweird.f32 %v5514_v19 }
 0xae4   : > { %v4191_v51 = vsub.f32 %v8037_v54, %v4171_v40  ;;  %5515 = vrcp.f32 %v3752_v9  ;;  %vm3778_vm14 = vmor %vm3776_vm13, %vm3777_vm12  ;;  %v3797_v57 = vand.u32 2147483648, %v3752_v9  ;;  %v3795_v61 = vand.u32 2147483647, %v3752_v9 }
 0xae5   : > { %v3773_v58 = vsub.f32 1.0, %v3772_v32  ;;  %vm3791_vm3 = vweird.f32 %v3752_v9  ;;  %v4208_v32 = vmul.f32 1.442695, %v4195_v12 }
 0xae6   : > { %v4200_v27 = vmul.f32 1.442695, %v4191_v51  ;;  %3769 = vadd.xlane.f32.xlu0 %v3768_v16  ;;  %vm3796_vm5 = vcmp.eq.f32.partialorder %v3795_v61, 8.507059e+37 }
 0xae7   : > { %v3774_v53 = vmul.f32 %v5514_v19, %v3773_v58 }
 0xae8   : > { %5517 = vpow2.f32 %v4200_v27  ;;  %v5287_v27 = vunpack.i.l.bf16 %v8086_v10 }
 0xae9   : > { %v3775_v20 = vadd.f32 %v5514_v19, %v3774_v53  ;;  %v4189_v28 = vpop.xlane.xlu0 %4188 }
 0xaea   : > { %v5516_v43 = vpop.eup %5515  ;;  %v4197_v54 = vsub.f32 %v8047_v3, %v4189_v28 }
 0xaeb   : > { %v3779_v45 = vsel %vm3778_vm14, %v5514_v19, %v3775_v20  ;;  %v3787_v33 = vmul.f32 %v5516_v43, %v3752_v9  ;;  %v4177_v5 = vpop.xlane.xlu2 %4176  ;;  %vm3792_vm2 = vweird.f32 %v5516_v43  ;;  %v4180_v40 = vpop.xlane.xlu1 %4179 }
 0xaec   : > { %v3784_v35 = vsel %vm3781_vm15, %v3783_v31, %v3779_v45  ;;  %v4212_v1 = vmul.f32 1.442695, %v4197_v54  ;;  %v4193_v23 = vsub.f32 %v8049_v48, %v4177_v5  ;;  %vm3793_vm4 = vmor %vm3791_vm3, %vm3792_vm2 }
 0xaed   : > { %v3785_v41 = vmul.f32 %v8031_v34, %v3784_v35  ;;  %v3788_v15 = vsub.f32 1.0, %v3787_v33  ;;  %v3798_v34 = vor.u32 1.1754944e-38, %v3797_v57 }
 0xaee   : > { %v8109_v39 = vpop.eup %5517  ;;  %5519 = vpow2.f32 %v4212_v1  ;;  %v4204_v13 = vmul.f32 1.442695, %v4193_v23 }
 0xaef   : > { %v3789_v3 = vmul.f32 %v5516_v43, %v3788_v15  ;;  %4960 = vmatmul.msk.f32.vlgmr.msrb.gmra.mxu2 %vm586_vm0, %v3785_v41  ;;  %v4217_v60 = vsel %vm586_vm0, %v8109_v39, 0.0 }
 0xaf0   : > { %4218 = vadd.xlane.f32.xlu2 %v4217_v60  ;;  %5521 = vpow2.f32 %v4204_v13 }
 0xaf1   : > { %v3790_v48 = vadd.f32 %v5516_v43, %v3789_v3  ;;  %5523 = vpow2.f32 %v3741_v21 }
 0xaf2   : > { %5525 = vpow2.f32 %v4208_v32 }
 0xaf3   : > { %v3794_v4 = vsel %vm3793_vm4, %v5516_v43, %v3790_v48  ;;  %v4194_v43 = vsub.f32 %v8051_v56, %v4180_v40 }
 0xaf4   : > { %v8116_v38 = vpop.eup %5519  ;;  %v3799_v7 = vsel %vm3796_vm5, %v3798_v34, %v3794_v4 }
 0xaf5   : > { %v4235_v0 = vsel %vm586_vm0, %v8116_v38, 0.0  ;;  %v3800_v47 = vmul.f32 %v8041_v8, %v3799_v7  ;;  %v4196_v8 = vsub.f32 %v8035_v55, %v8101_v14  ;;  %v5288_v14 = vunpack.i.h.bf16 %v8086_v10 }
 0xaf6   : > { %4236 = vadd.xlane.f32.xlu0 %v4235_v0  ;;  %v8121_v26 = vpop.eup %5521  ;;  %v4206_v54 = vmul.f32 1.442695, %v4194_v43 }
 0xaf7   : > { %4961 = vmatmul.msk.f32.gmra.mxu2 %vm586_vm0, %v3800_v47  ;;  %v4223_v19 = vsel %vm586_vm0, %v8121_v26, 0.0  ;;  %v8128_v9 = vpop.eup %5523  ;;  %v4210_v58 = vmul.f32 1.442695, %v4196_v8 }
 0xaf8   : > { %4224 = vadd.xlane.f32.xlu1 %v4223_v19  ;;  %v3762_v51 = vsel %vm586_vm0, %v8128_v9, 0.0  ;;  %v8134_v16 = vpop.eup %5525  ;;  %v829_v19 = vld [vmem:[#allocation13 + $0x30] sm:$0xff] }
 0xaf9   : > { %5527 = vpow2.f32 %v4210_v58  ;;  %v4229_v55 = vsel %vm586_vm0, %v8134_v16, 0.0  ;;  %4019 = vmatpush.msra.mxu3 %v829_v19 }
 0xafa   : > { %5529 = vpow2.f32 %v4206_v54 }
 0xaff   : > { %v8142_v53 = vpop.eup %5527 }
 0xb00   : > { %3763 = vadd.xlane.f32.xlu1 %v3762_v51  ;;  %v4232_v6 = vsel %vm586_vm0, %v8142_v53, 0.0  ;;  %v8149_v10 = vpop.eup %5529 }
 0xb01   : > { %v4226_v33 = vsel %vm586_vm0, %v8149_v10, 0.0 }
 0xb03   : > { %v5276_v25 = vpop.permute.xlu1 %5275 }
 0xb04   : > { %v5277_v11 = vunpack.i.l.bf16 %v5276_v25  ;;  %v5278_v24 = vunpack.i.h.bf16 %v5276_v25 }
 0xb06   : > { %4414 = vmatpush.msrb.mxu1 %v5277_v11 }
 0xb08   : > { %4415 = vmatpush.msrb.mxu1 %v5278_v24  ;;  %5295 = vrot.lane.b32.xlu2 %v8014_v62, %s5887_s4 }
 0xb09   : > { %4230 = vadd.xlane.f32.xlu1 %v4229_v55 }
 0xb0a   : > { %4416 = vmatpush.msrb.mxu1 %v5287_v27 }
 0xb0b   : > { %v8146_v20 = vpop.xlane.xlu0 %4215 }
 0xb0c   : > { %4417 = vmatpush.msrb.mxu1 %v5288_v14  ;;  %vm4243_vm5 = vweird.f32 %v8146_v20 }
 0xb11   : > { %4233 = vadd.xlane.f32.xlu1 %v4232_v6 }
 0xb1e   : > { %v5291_v28 = vpop.permute.xlu0 %5290 }
 0xb1f   : > { %v5292_v62 = vunpack.i.l.bf16 %v5291_v28  ;;  %v5293_v31 = vunpack.i.h.bf16 %v5291_v28 }
 0xb21   : > { %4418 = vmatpush.msrb.mxu1 %v5292_v62 }
 0xb23   : > { %4419 = vmatpush.msrb.mxu1 %v5293_v31 }
 0xb2e   : > { %v3755_v45 = vpop.xlane.xlu1 %3754 }
 0xb2f   : > { %5531 = vrcp.f32 %v3755_v45  ;;  %v3812_v56 = vand.u32 2147483648, %v3755_v45  ;;  %v3810_v41 = vand.u32 2147483647, %v3755_v45  ;;  %vm3806_vm7 = vweird.f32 %v3755_v45 }
 0xb31   : > { %4227 = vadd.xlane.f32.xlu2 %v4226_v33  ;;  %v3813_v22 = vor.u32 1.1754944e-38, %v3812_v56  ;;  %vm3811_vm9 = vcmp.eq.f32.partialorder %v3810_v41, 8.507059e+37 }
 0xb35   : > { %v5532_v5 = vpop.eup %5531 }
 0xb36   : > { %v3802_v35 = vmul.f32 %v5532_v5, %v3755_v45  ;;  %vm3807_vm6 = vweird.f32 %v5532_v5  ;;  %v3761_v61 = vpop.xlane.xlu1 %3760 }
 0xb37   : > { %vm3808_vm8 = vmor %vm3806_vm7, %vm3807_vm6  ;;  %5533 = vrcp.f32 %v3761_v61  ;;  %v3842_v24 = vand.u32 2147483648, %v3761_v61  ;;  %vm3836_vm15 = vweird.f32 %v3761_v61  ;;  %v3840_v55 = vand.u32 2147483647, %v3761_v61 }
 0xb38   : > { %v3803_v1 = vsub.f32 1.0, %v3802_v35  ;;  %v4249_v35 = vand.u32 2147483648, %v8146_v20 }
 0xb39   : > { %v3843_v62 = vor.u32 1.1754944e-38, %v3842_v24  ;;  %vm3841_vm3 = vcmp.eq.f32.partialorder %v3840_v55, 8.507059e+37 }
 0xb3a   : > { %v3804_v23 = vmul.f32 %v5532_v5, %v3803_v1  ;;  %v4247_v1 = vand.u32 2147483647, %v8146_v20 }
 0xb3c   : > { %v3805_v15 = vadd.f32 %v5532_v5, %v3804_v23  ;;  %vm4248_vm7 = vcmp.eq.f32.partialorder %v4247_v1, 8.507059e+37 }
 0xb3d   : > { %v5534_v48 = vpop.eup %5533 }
 0xb3e   : > { %v3809_v57 = vsel %vm3808_vm8, %v5532_v5, %v3805_v15  ;;  %v3832_v34 = vmul.f32 %v5534_v48, %v3761_v61  ;;  %vm3837_vm13 = vweird.f32 %v5534_v48  ;;  %v8158_v28 = vpop.xlane.xlu1 %4221  ;;  %v4250_v15 = vor.u32 1.1754944e-38, %v4249_v35 }
 0xb3f   : > { %v3814_v13 = vsel %vm3811_vm9, %v3813_v22, %v3809_v57  ;;  %vm3838_vm2 = vmor %vm3836_vm15, %vm3837_vm13  ;;  %vm4273_vm13 = vweird.f32 %v8158_v28 }
 0xb40   : > { %v3815_v3 = vmul.f32 %v8071_v44, %v3814_v13  ;;  %v3833_v7 = vsub.f32 1.0, %v3832_v34 }
 0xb42   : > { %4962 = vmatmul.msk.f32.gmra.mxu2 %vm586_vm0, %v3815_v3  ;;  %v3834_v44 = vmul.f32 %v5534_v48, %v3833_v7 }
 0xb44   : > { %v3835_v11 = vadd.f32 %v5534_v48, %v3834_v44 }
 0xb46   : > { %v3839_v43 = vsel %vm3838_vm2, %v5534_v48, %v3835_v11  ;;  %v4279_v11 = vand.u32 2147483648, %v8158_v28 }
 0xb47   : > { %v3844_v54 = vsel %vm3841_vm3, %v3843_v62, %v3839_v43 }
 0xb48   : > { %v3845_v33 = vmul.f32 %v8076_v52, %v3844_v54  ;;  %v4280_v62 = vor.u32 1.1754944e-38, %v4279_v11 }
 0xb49   : > { %v3758_v60 = vpop.xlane.xlu0 %3757 }
 0xb4a   : > { %5535 = vrcp.f32 %v3758_v60  ;;  %v3827_v12 = vand.u32 2147483648, %v3758_v60  ;;  %v3825_v40 = vand.u32 2147483647, %v3758_v60  ;;  %vm3821_vm11 = vweird.f32 %v3758_v60 }
 0xb4b   : > { %5537 = vrcp.f32 %v8146_v20 }
 0xb4c   : > { %v3828_v58 = vor.u32 1.1754944e-38, %v3827_v12  ;;  %vm3826_vm14 = vcmp.eq.f32.partialorder %v3825_v40, 8.507059e+37  ;;  %5539 = vrcp.f32 %v8158_v28 }
 0xb50   : > { %v5536_v21 = vpop.eup %5535 }
 0xb51   : > { %v3817_v4 = vmul.f32 %v5536_v21, %v3758_v60  ;;  %vm3822_vm10 = vweird.f32 %v5536_v21  ;;  %v5538_v32 = vpop.eup %5537  ;;  %v8171_v52 = vpop.xlane.xlu0 %3766 }
 0xb52   : > { %vm3823_vm12 = vmor %vm3821_vm11, %vm3822_vm10  ;;  %v4239_v51 = vmul.f32 %v5538_v32, %v8146_v20  ;;  %vm4244_vm4 = vweird.f32 %v5538_v32 }
 0xb53   : > { %v3818_v0 = vsub.f32 1.0, %v3817_v4  ;;  %vm4245_vm6 = vmor %vm4243_vm5, %vm4244_vm4 }
 0xb54   : > { %v4240_v6 = vsub.f32 1.0, %v4239_v51 }
 0xb55   : > { %v3819_v47 = vmul.f32 %v5536_v21, %v3818_v0 }
 0xb56   : > { %v4241_v31 = vmul.f32 %v5538_v32, %v4240_v6 }
 0xb57   : > { %v3820_v8 = vadd.f32 %v5536_v21, %v3819_v47 }
 0xb58   : > { %v4242_v5 = vadd.f32 %v5538_v32, %v4241_v31 }
 0xb59   : > { %v3824_v25 = vsel %vm3823_vm12, %v5536_v21, %v3820_v8 }
 0xb5a   : > { %v3829_v27 = vsel %vm3826_vm14, %v3828_v58, %v3824_v25  ;;  %v4246_v23 = vsel %vm4245_vm6, %v5538_v32, %v4242_v5  ;;  %v8184_v58 = vpop.xlane.xlu0 %3769 }
 0xb5b   : > { %v3830_v14 = vmul.f32 %v8088_v36, %v3829_v27  ;;  %v8163_v36 = vpop.eup %5539  ;;  %v4251_v13 = vsel %vm4248_vm7, %v4250_v15, %v4246_v23  ;;  %v4277_v27 = vand.u32 2147483647, %v8158_v28 }
 0xb5c   : > { %v4269_v56 = vmul.f32 %v8163_v36, %v8158_v28  ;;  %v4252_v21 = vmul.f32 %v8064_v49, %v4251_v13  ;;  %vm4274_vm12 = vweird.f32 %v8163_v36 }
 0xb5d   : > { %4963 = vmatmul.msk.f32.gmra.mxu2 %vm586_vm0, %v3830_v14  ;;  %vm4275_vm14 = vmor %vm4273_vm13, %vm4274_vm12  ;;  %vm4278_vm15 = vcmp.eq.f32.partialorder %v4277_v27, 8.507059e+37 }
 0xb5e   : > { %v4270_v60 = vsub.f32 1.0, %v4269_v56 }
 0xb60   : > { %v4271_v0 = vmul.f32 %v8163_v36, %v4270_v60 }
 0xb62   : > { %v4272_v51 = vadd.f32 %v8163_v36, %v4271_v0  ;;  %v3870_v0 = vand.u32 2147483647, %v8171_v52 }
 0xb63   : > { %v4219_v45 = vpop.xlane.xlu2 %4218 }
 0xb64   : > { %5541 = vrcp.f32 %v4219_v45  ;;  %v4264_v20 = vand.u32 2147483648, %v4219_v45  ;;  %v4262_v7 = vand.u32 2147483647, %v4219_v45  ;;  %vm4258_vm9 = vweird.f32 %v4219_v45 }
 0xb65   : > { %4964 = vmatmul.msk.f32.gmra.mxu2 %vm586_vm0, %v3845_v33  ;;  %v4276_v43 = vsel %vm4275_vm14, %v8163_v36, %v4272_v51  ;;  %vm3871_vm13 = vcmp.eq.f32.partialorder %v3870_v0, 8.507059e+37 }
 0xb66   : > { %v4265_v12 = vor.u32 1.1754944e-38, %v4264_v20  ;;  %vm4263_vm11 = vcmp.eq.f32.partialorder %v4262_v7, 8.507059e+37 }
 0xb6a   : > { %v5542_v41 = vpop.eup %5541 }
 0xb6b   : > { %v4254_v22 = vmul.f32 %v5542_v41, %v4219_v45  ;;  %v5296_v57 = vpop.permute.xlu2 %5295  ;;  %v8173_v3 = vpop.xlane.xlu1 %4224  ;;  %vm4259_vm8 = vweird.f32 %v5542_v41  ;;  %v4281_v45 = vsel %vm4278_vm15, %v4280_v62, %v4276_v43  ;;  %vm3881_vm15 = vweird.f32 %v8184_v58 }
 0xb6c   : > { %v5297_v61 = vunpack.i.l.bf16 %v5296_v57  ;;  %5543 = vrcp.f32 %v8173_v3  ;;  %v5298_v34 = vunpack.i.h.bf16 %v5296_v57  ;;  %vm4260_vm10 = vmor %vm4258_vm9, %vm4259_vm8  ;;  %v4294_v35 = vand.u32 2147483648, %v8173_v3  ;;  %v4237_v43 = vpop.xlane.xlu0 %4236 }
 0xb6d   : > { %v4255_v48 = vsub.f32 1.0, %v4254_v22  ;;  %5545 = vrcp.f32 %v8171_v52  ;;  %vm4288_vm3 = vweird.f32 %v8173_v3  ;;  %v4292_v23 = vand.u32 2147483647, %v8173_v3 }
 0xb6e   : > { %4420 = vmatpush.msrb.mxu1 %v5297_v61  ;;  %v4282_v36 = vmul.f32 %v8081_v30, %v4281_v45 }
 0xb6f   : > { %v4256_v4 = vmul.f32 %v5542_v41, %v4255_v48  ;;  %vm4293_vm7 = vcmp.eq.f32.partialorder %v4292_v23, 8.507059e+37 }
 0xb70   : > { %4421 = vmatpush.msrb.mxu1 %v5298_v34 }
 0xb71   : > { %v4257_v47 = vadd.f32 %v5542_v41, %v4256_v4  ;;  %4992 = vmatmul.msk.f32.vlgmr.msrb.gmra.mxu1 %vm586_vm0, %v4252_v21  ;;  %v3872_v4 = vand.u32 2147483648, %v8171_v52 }
 0xb72   : > { %v3956_v19 = vpop.f32.mrf.mxu2  ;;  %v5544_v32 = vpop.eup %5543 }
 0xb73   : > { %4968 = vmatmul.msk.f32.vlgmr.msra.gmra.mxu3 %vm831_vm1, %v3956_v19  ;;  %v4261_v49 = vsel %vm4260_vm10, %v5542_v41, %v4257_v47  ;;  %v4284_v44 = vmul.f32 %v5544_v32, %v8173_v3  ;;  %v3764_v40 = vpop.xlane.xlu1 %3763  ;;  %v8186_v25 = vpop.eup %5545  ;;  %vm4289_vm2 = vweird.f32 %v5544_v32  ;;  %v4295_v3 = vor.u32 1.1754944e-38, %v4294_v35 }
 0xb74   : > { %v4266_v8 = vsel %vm4263_vm11, %v4265_v12, %v4261_v49  ;;  %5547 = vrcp.f32 %v3764_v40  ;;  %v3862_v14 = vmul.f32 %v8186_v25, %v8171_v52  ;;  %vm8202_vm4 = vmor %vm4288_vm3, %vm4289_vm2  ;;  %v3857_v15 = vand.u32 2147483648, %v3764_v40 }
 0xb75   : > { %v4285_v24 = vsub.f32 1.0, %v4284_v44  ;;  %v4267_v55 = vmul.f32 %v8109_v39, %v4266_v8  ;;  %5549 = vrcp.f32 %v8184_v58  ;;  %v3855_v13 = vand.u32 2147483647, %v3764_v40 }
 0xb76   : > { %v3863_v39 = vsub.f32 1.0, %v3862_v14  ;;  %vm3851_vm6 = vweird.f32 %v3764_v40  ;;  %v3858_v30 = vor.u32 1.1754944e-38, %v3857_v15  ;;  %vm3867_vm9 = vweird.f32 %v8186_v25 }
 0xb77   : > { %v4286_v6 = vmul.f32 %v5544_v32, %v4285_v24  ;;  %vm3856_vm10 = vcmp.eq.f32.partialorder %v3855_v13, 8.507059e+37  ;;  %vm3866_vm11 = vweird.f32 %v8171_v52  ;;  %v3873_v49 = vor.u32 1.1754944e-38, %v3872_v4 }
 0xb78   : > { %v3864_v22 = vmul.f32 %v8186_v25, %v3863_v39  ;;  %vm3868_vm12 = vmor %vm3866_vm11, %vm3867_vm9  ;;  %v3887_v8 = vand.u32 2147483648, %v8184_v58 }
 0xb79   : > { %4993 = vmatmul.msk.f32.gmra.mxu1 %vm586_vm0, %v4267_v55  ;;  %v4287_v33 = vadd.f32 %v5544_v32, %v4286_v6 }
 0xb7a   : > { %v3959_v31 = vpop.f32.mrf.mxu2  ;;  %v5548_v54 = vpop.eup %5547  ;;  %v3865_v34 = vadd.f32 %v8186_v25, %v3864_v22  ;;  %v3888_v51 = vor.u32 1.1754944e-38, %v3887_v8 }
 0xb7b   : > { %4969 = vmatmul.msk.f32.gmra.mxu3 %vm831_vm1, %v3959_v31  ;;  %v3847_v28 = vmul.f32 %v5548_v54, %v3764_v40  ;;  %v5550_v5 = vpop.eup %5549  ;;  %vm3852_vm5 = vweird.f32 %v5548_v54  ;;  %v4291_v61 = vsel %vm8202_vm4, %v5544_v32, %v4287_v33 }
 0xb7c   : > { %v3877_v57 = vmul.f32 %v5550_v5, %v8184_v58  ;;  %vm3853_vm8 = vmor %vm3851_vm6, %vm3852_vm5  ;;  %v4296_v20 = vsel %vm4293_vm7, %v4295_v3, %v4291_v61  ;;  %v3869_v32 = vsel %vm3868_vm12, %v8186_v25, %v3865_v34  ;;  %vm3882_vm14 = vweird.f32 %v5550_v5  ;;  %v4231_v24 = vpop.xlane.xlu1 %4230 }
 0xb7d   : > { %v3848_v1 = vsub.f32 1.0, %v3847_v28  ;;  %v4297_v12 = vmul.f32 %v8121_v26, %v4296_v20  ;;  %v3874_v44 = vsel %vm3871_vm13, %v3873_v49, %v3869_v32  ;;  %vm3883_vm2 = vmor %vm3881_vm15, %vm3882_vm14  ;;  %5551 = vrcp.f32 %v4231_v24 }
 0xb7e   : > { %v3878_v21 = vsub.f32 1.0, %v3877_v57  ;;  %v3875_v26 = vmul.f32 %v8095_v18, %v3874_v44  ;;  %vm4318_vm9 = vweird.f32 %v4231_v24  ;;  %v4322_v22 = vand.u32 2147483647, %v4231_v24 }
 0xb7f   : > { %v3849_v41 = vmul.f32 %v5548_v54, %v3848_v1  ;;  %v4354_v32 = vand.u32 2147483648, %v4237_v43  ;;  %v4352_v49 = vand.u32 2147483647, %v4237_v43 }
 0xb80   : > { %v3879_v19 = vmul.f32 %v5550_v5, %v3878_v21  ;;  %vm4323_vm11 = vcmp.eq.f32.partialorder %v4322_v22, 8.507059e+37 }
 0xb81   : > { %4994 = vmatmul.msk.f32.gmra.mxu1 %vm586_vm0, %v4282_v36  ;;  %v3850_v60 = vadd.f32 %v5548_v54, %v3849_v41  ;;  %v4324_v41 = vand.u32 2147483648, %v4231_v24  ;;  %v4355_v8 = vor.u32 1.1754944e-38, %v4354_v32 }
 0xb82   : > { %v3880_v40 = vadd.f32 %v5550_v5, %v3879_v19 }
 0xb83   : > { %v3854_v48 = vsel %vm3853_vm8, %v5548_v54, %v3850_v60  ;;  %v5552_v27 = vpop.eup %5551  ;;  %v4325_v60 = vor.u32 1.1754944e-38, %v4324_v41 }
 0xb84   : > { %v3859_v7 = vsel %vm3856_vm10, %v3858_v30, %v3854_v48  ;;  %v3884_v52 = vsel %vm3883_vm2, %v5550_v5, %v3880_v40  ;;  %v4234_v55 = vpop.xlane.xlu1 %4233  ;;  %vm4319_vm6 = vweird.f32 %v5552_v27 }
 0xb85   : > { %v3860_v47 = vmul.f32 %v8128_v9, %v3859_v7  ;;  %v3885_v9 = vand.u32 2147483647, %v8184_v58  ;;  %v4314_v58 = vmul.f32 %v5552_v27, %v4231_v24  ;;  %vm4320_vm10 = vmor %vm4318_vm9, %vm4319_vm6  ;;  %v4339_v34 = vand.u32 2147483648, %v4234_v55 }
 0xb86   : > { %vm4333_vm13 = vweird.f32 %v4234_v55  ;;  %v4337_v21 = vand.u32 2147483647, %v4234_v55 }
 0xb87   : > { %4965 = vmatmul.msk.f32.gmra.mxu2 %vm586_vm0, %v3860_v47  ;;  %vm3886_vm3 = vcmp.eq.f32.partialorder %v3885_v9, 8.507059e+37  ;;  %v4315_v6 = vsub.f32 1.0, %v4314_v58  ;;  %v4340_v0 = vor.u32 1.1754944e-38, %v4339_v34  ;;  %v830_v47 = vld [vmem:[#allocation13 + $0x38] sm:$0xff] }
 0xb88   : > { %v3889_v25 = vsel %vm3886_vm3, %v3888_v51, %v3884_v52  ;;  %vm4338_vm15 = vcmp.eq.f32.partialorder %v4337_v21, 8.507059e+37  ;;  %4486 = vmatpush.msra.mxu2 %v830_v47  ;;  %vm4348_vm3 = vweird.f32 %v4237_v43 }
 0xb89   : > { %4995 = vmatmul.msk.f32.gmra.mxu1 %vm586_vm0, %v4297_v12  ;;  %v3890_v11 = vmul.f32 %v8099_v63, %v3889_v25  ;;  %v4316_v28 = vmul.f32 %v5552_v27, %v4315_v6 }
 0xb8b   : > { %v4317_v1 = vadd.f32 %v5552_v27, %v4316_v28 }
 0xb8d   : > { %v4321_v3 = vsel %vm4320_vm10, %v5552_v27, %v4317_v1 }
 0xb8e   : > { %v4326_v30 = vsel %vm4323_vm11, %v4325_v60, %v4321_v3 }
 0xb8f   : > { %4966 = vmatmul.msk.f32.gmra.mxu2 %vm586_vm0, %v3875_v26  ;;  %v4327_v4 = vmul.f32 %v8134_v16, %v4326_v30 }
 0xb97   : > { %4967 = vmatmul.msk.f32.gmra.mxu2 %vm586_vm0, %v3890_v11 }
 0xba4   : > { %v4228_v14 = vpop.xlane.xlu2 %4227 }
 0xba5   : > { %5553 = vrcp.f32 %v4228_v14  ;;  %v4309_v45 = vand.u32 2147483648, %v4228_v14  ;;  %v4307_v33 = vand.u32 2147483647, %v4228_v14  ;;  %vm4303_vm5 = vweird.f32 %v4228_v14 }
 0xba6   : > { %5555 = vrcp.f32 %v4234_v55 }
 0xba7   : > { %5557 = vrcp.f32 %v4237_v43  ;;  %v4310_v35 = vor.u32 1.1754944e-38, %v4309_v45  ;;  %vm4308_vm8 = vcmp.eq.f32.partialorder %v4307_v33, 8.507059e+37 }
 0xbab   : > { %v5554_v18 = vpop.eup %5553 }
 0xbac   : > { %v4299_v62 = vmul.f32 %v5554_v18, %v4228_v14  ;;  %v5556_v31 = vpop.eup %5555  ;;  %vm4304_vm4 = vweird.f32 %v5554_v18 }
 0xbad   : > { %v4329_v63 = vmul.f32 %v5556_v31, %v4234_v55  ;;  %vm4305_vm7 = vmor %vm4303_vm5, %vm4304_vm4  ;;  %v5558_v56 = vpop.eup %5557  ;;  %vm4334_vm12 = vweird.f32 %v5556_v31  ;;  %vm4353_vm5 = vcmp.eq.f32.partialorder %v4352_v49, 8.507059e+37 }
 0xbae   : > { %v4300_v54 = vsub.f32 1.0, %v4299_v62  ;;  %v4344_v13 = vmul.f32 %v5558_v56, %v4237_v43  ;;  %vm4335_vm14 = vmor %vm4333_vm13, %vm4334_vm12  ;;  %vm4349_vm2 = vweird.f32 %v5558_v56 }
 0xbaf   : > { %v4330_v23 = vsub.f32 1.0, %v4329_v63  ;;  %vm4350_vm4 = vmor %vm4348_vm3, %vm4349_vm2 }
 0xbb0   : > { %v4301_v39 = vmul.f32 %v5554_v18, %v4300_v54  ;;  %v4345_v48 = vsub.f32 1.0, %v4344_v13 }
 0xbb1   : > { %v4331_v61 = vmul.f32 %v5556_v31, %v4330_v23 }
 0xbb2   : > { %v4302_v5 = vadd.f32 %v5554_v18, %v4301_v39  ;;  %v4346_v7 = vmul.f32 %v5558_v56, %v4345_v48 }
 0xbb3   : > { %v4332_v20 = vadd.f32 %v5556_v31, %v4331_v61 }
 0xbb4   : > { %v4306_v36 = vsel %vm4305_vm7, %v5554_v18, %v4302_v5  ;;  %v4347_v19 = vadd.f32 %v5558_v56, %v4346_v7 }
 0xbb5   : > { %v4311_v15 = vsel %vm4308_vm8, %v4310_v35, %v4306_v36 }
 0xbb6   : > { %v4312_v57 = vmul.f32 %v8149_v10, %v4311_v15  ;;  %v4336_v10 = vsel %vm4335_vm14, %v5556_v31, %v4332_v20  ;;  %v4351_v16 = vsel %vm4350_vm4, %v5558_v56, %v4347_v19  ;;  %v5302_v31 = vld [vmem:[%s8328_s9] ss:$0 sm:$0xff] }
 0xbb7   : > { %v4341_v12 = vsel %vm4338_vm15, %v4340_v0, %v4336_v10  ;;  %v4356_v9 = vsel %vm4353_vm5, %v4355_v8, %v4351_v16 }
 0xbb8   : > { %4996 = vmatmul.msk.f32.gmra.mxu1 %vm586_vm0, %v4312_v57  ;;  %v4342_v40 = vmul.f32 %v8142_v53, %v4341_v12  ;;  %v4357_v26 = vmul.f32 %v8116_v38, %v4356_v9 }
 0xbc0   : > { %4997 = vmatmul.msk.f32.gmra.mxu1 %vm586_vm0, %v4327_v4 }
 0xbc5   : > { %v3962_v44 = vpop.f32.mrf.mxu2 }
 0xbc6   : > { %4970 = vmatmul.msk.f32.gmra.mxu3 %vm831_vm1, %v3962_v44 }
 0xbc8   : > { %4998 = vmatmul.msk.f32.gmra.mxu1 %vm586_vm0, %v4342_v40 }
 0xbd0   : > { %4999 = vmatmul.msk.f32.gmra.mxu1 %vm586_vm0, %v4357_v26 }
 0xbe0   : > { %v3965_v52 = vpop.f32.mrf.mxu2 }
 0xbe1   : > { %4971 = vmatmul.msk.f32.gmra.mxu3 %vm831_vm1, %v3965_v52 }
 0xbe8   : > { %v3968_v51 = vpop.f32.mrf.mxu2 }
 0xbe9   : > { %4972 = vmatmul.msk.f32.gmra.mxu3 %vm831_vm1, %v3968_v51 }
 0xbee   : > { %v4423_v53 = vpop.f32.mrf.mxu1 }
 0xbef   : > { %5000 = vmatmul.msk.f32.vlgmr.msra.gmra.mxu2 %vm831_vm1, %v4423_v53 }
 0xbf6   : > { %v4426_v25 = vpop.f32.mrf.mxu1  ;;  %v4021_v43 = vpop.f32.mrf.mxu3 }
 0xbf7   : > { %5001 = vmatmul.msk.f32.gmra.mxu2 %vm831_vm1, %v4426_v25  ;;  %v4045_v62 = vadd.f32 %v4021_v43, %v7936_v2 }
 0xbfe   : > { %v4429_v11 = vpop.f32.mrf.mxu1  ;;  %v4024_v63 = vpop.f32.mrf.mxu3 }
 0xbff   : > { %5002 = vmatmul.msk.f32.gmra.mxu2 %vm831_vm1, %v4429_v11  ;;  %v4046_v39 = vadd.f32 %v4024_v63, %v7942_v37 }
 0xc06   : > { %v4432_v24 = vpop.f32.mrf.mxu1 }
 0xc07   : > { %5003 = vmatmul.msk.f32.gmra.mxu2 %vm831_vm1, %v4432_v24 }
 0xc0a   : > { %v3971_v38 = vpop.f32.mrf.mxu2 }
 0xc0b   : > { %4973 = vmatmul.msk.f32.gmra.mxu3 %vm831_vm1, %v3971_v38 }
 0xc12   : > { %v3974_v27 = vpop.f32.mrf.mxu2 }
 0xc13   : > { %4974 = vmatmul.msk.f32.gmra.mxu3 %vm831_vm1, %v3974_v27 }
 0xc1a   : > { %v3977_v55 = vpop.f32.mrf.mxu2 }
 0xc1b   : > { %4975 = vmatmul.msk.f32.gmra.mxu3 %vm831_vm1, %v3977_v55 }
 0xc35   : > { %v4435_v14 = vpop.f32.mrf.mxu1 }
 0xc36   : > { %5004 = vmatmul.msk.f32.gmra.mxu2 %vm831_vm1, %v4435_v14 }
 0xc3d   : > { %v4438_v58 = vpop.f32.mrf.mxu1 }
 0xc3e   : > { %5005 = vmatmul.msk.f32.gmra.mxu2 %vm831_vm1, %v4438_v58 }
 0xc45   : > { %v4441_v18 = vpop.f32.mrf.mxu1 }
 0xc46   : > { %5006 = vmatmul.msk.f32.gmra.mxu2 %vm831_vm1, %v4441_v18 }
 0xc49   : > { %v4027_v35 = vpop.f32.mrf.mxu3 }
 0xc4a   : > { %v4047_v1 = vadd.f32 %v4027_v35, %v7957_v59 }
 0xc4d   : > { %v4444_v6 = vpop.f32.mrf.mxu1 }
 0xc4e   : > { %5007 = vmatmul.msk.f32.gmra.mxu2 %vm831_vm1, %v4444_v6 }
 0xc64   : > { %v4030_v41 = vpop.f32.mrf.mxu3 }
 0xc65   : > { %v4048_v15 = vadd.f32 %v4030_v41, %v7964_v50 }
 0xc6c   : > { %v4033_v13 = vpop.f32.mrf.mxu3 }
 0xc6d   : > { %v4049_v61 = vadd.f32 %v4033_v13, %v7970_v42 }
 0xc72   : > { %v4488_v54 = vpop.f32.mrf.mxu2 }
 0xc73   : > { %v4512_v28 = vadd.f32 %v4488_v54, %v4045_v62 }
 0xc75   : > { %v4524_v45 = vadd.f32 %v5302_v31, %v4512_v28 }
 0xc77   : > { %4532 = vst.msk [vmem:[%s8255_s23] sm:$0xff] %vm586_vm0, %v4524_v45 }
 0xc7a   : > { %v4491_v33 = vpop.f32.mrf.mxu2 }
 0xc7b   : > { %v4513_v2 = vadd.f32 %v4491_v33, %v4046_v39 }
 0xc7d   : > { %v4525_v5 = vadd.f32 %v5302_v31, %v4513_v2 }
 0xc7f   : > { %4533 = vst.msk [vmem:[%s8255_s23 + $0x8] sm:$0xff] %vm586_vm0, %v4525_v5 }
 0xc82   : > { %v4494_v23 = vpop.f32.mrf.mxu2 }
 0xc83   : > { %v4514_v36 = vadd.f32 %v4494_v23, %v4047_v1 }
 0xc85   : > { %v4526_v56 = vadd.f32 %v5302_v31, %v4514_v36 }
 0xc87   : > { %4534 = vst.msk [vmem:[%s8255_s23 + $0x10] sm:$0xff] %vm586_vm0, %v4526_v56 }
 0xc8a   : > { %v4497_v22 = vpop.f32.mrf.mxu2 }
 0xc8b   : > { %v4515_v37 = vadd.f32 %v4497_v22, %v4048_v15 }
 0xc8d   : > { %v4527_v57 = vadd.f32 %v5302_v31, %v4515_v37 }
 0xc8e   : > { %v4036_v59 = vpop.f32.mrf.mxu3 }
 0xc8f   : > { %4535 = vst.msk [vmem:[%s8255_s23 + $0x18] sm:$0xff] %vm586_vm0, %v4527_v57  ;;  %v4050_v50 = vadd.f32 %v4036_v59, %v7976_v17 }
 0xc96   : > { %v4039_v34 = vpop.f32.mrf.mxu3 }
 0xc97   : > { %v4051_v4 = vadd.f32 %v4039_v34, %v7982_v29 }
 0xc9e   : > { %v4042_v0 = vpop.f32.mrf.mxu3 }
 0xc9f   : > { %v4052_v17 = vadd.f32 %v4042_v0, %v7986_v46 }
 0xcb9   : > { %v4500_v3 = vpop.f32.mrf.mxu2 }
 0xcba   : > { %v4516_v60 = vadd.f32 %v4500_v3, %v4049_v61 }
 0xcbc   : > { %v4528_v30 = vadd.f32 %v5302_v31, %v4516_v60 }
 0xcbe   : > { %4536 = vst.msk [vmem:[%s8255_s23 + $0x20] sm:$0xff] %vm586_vm0, %v4528_v30 }
 0xcc1   : > { %v4503_v48 = vpop.f32.mrf.mxu2 }
 0xcc2   : > { %v4517_v20 = vadd.f32 %v4503_v48, %v4050_v50 }
 0xcc4   : > { %v4529_v21 = vadd.f32 %v5302_v31, %v4517_v20 }
 0xcc6   : > { %4537 = vst.msk [vmem:[%s8255_s23 + $0x28] sm:$0xff] %vm586_vm0, %v4529_v21 }
 0xcc9   : > { %v4506_v42 = vpop.f32.mrf.mxu2 }
 0xcca   : > { %v4518_v7 = vadd.f32 %v4506_v42, %v4051_v4 }
 0xccc   : > { %v4530_v10 = vadd.f32 %v5302_v31, %v4518_v7 }
 0xcce   : > { %4538 = vst.msk [vmem:[%s8255_s23 + $0x30] sm:$0xff] %vm586_vm0, %v4530_v10 }
 0xcd1   : > { %v4509_v47 = vpop.f32.mrf.mxu2 }
 0xcd2   : > { %v4519_v29 = vadd.f32 %v4509_v47, %v4052_v17 }
 0xcd4   : > { %v4531_v12 = vadd.f32 %v5302_v31, %v4519_v29 }
 0xcd6   : > { %4539 = vst.msk [vmem:[%s8255_s23 + $0x38] sm:$0xff] %vm586_vm0, %v4531_v12 }
 0xcd7   : > { %5802 = shalt.err (!%p5799_p0)
}
 0xcd8   : > { %s5888_s8 = smov 128   ;;  %s5889_s15 = smov 8  }
 0xcd9   : > { %5060 = dma.vmem_to_hbm [thread:$0]  (%p6064_p7), %s4556_s27, 1024, %s4558_s21, %s4541_s10, %s5888_s8, %s5888_s8, %s5889_s15  }
 0xcda PF: > { %s8449_s2 = sld [smem:[#allocation22_spill]]  ;;  %p5083_p3 = pnand %p4713_p11, %p6000_p6 }
 0xcdc   : > { %p5084_p5 = pneg %p5083_p3 }
 0xce0   : > { %s4572_s26 = sand.u32 1, %s8449_s2  }
 0xce1   : > { %s4573_s6 = scalar_lea.sflag [#allocation6], %s4572_s26 }
 0xce2   : > { %5848 = dma.done.wait (%p5084_p5), %s4573_s6, 1024  }
 0xce3   : > { %5850 = vsyncadd (%p5084_p5), %s4573_s6, 4294966272  ;;  %s33_s24 = sadd.s32 1, %s5873_s24   ;;  %s8451_s23 = sld [smem:[#allocation23_spill]] }
 0xce4   : > { %p30_p9 = scmp.ge.s32.totalorder %s33_s24, 4   ;;  %s8452_s11 = sld [smem:[#allocation28_spill]] }
 0xce5   : > { %s8453_s10 = sld [smem:[#allocation24_spill]]  ;;  %s8455_s21 = smov %s5857_s22 }
 0xce6   : > { %s8454_s14 = sld [smem:[#allocation26_spill]] }
 0xce8   :  { %32 = sbr.rel (!%p30_p9) target bundleno = 15 (0xf), region = 146 }
 0xce9   : > { %s8456_s22 = smov %s8451_s23 }
 0xcea   : > { %s8457_s23 = smov %s8452_s11 }
 0xcec   : > { %s8458_s11 = smov %s8454_s14 }
 0xced   :  { %4579 = vsyncpa [#allocation5], 1 }
 0xcee   :  { %4581 = vsyncpa [#allocation5 + $0x1], 1 }
 0xcef   :  { %4582 = vsyncpa [#allocation8], 1 }
 0xcf0   :  { %4584 = vsyncpa [#allocation8 + $0x1], 1 }
 0xcf1   :  { %4585 = vsyncpa [#allocation11], 1 }
 0xcf2   :  { %4586 = vsyncpa [#allocation14], 1 }
 0xcf3   :  { %4587 = vsyncpa [#allocation6], 1 }
 0xcf4   :  { %4589 = vsyncpa [#allocation6 + $0x1], 1 }

</bundles_post_ra>
